<compile_context>
chip_gen: v7x
topology: tpu7x:2x2x1
jax: 0.10.0
libtpu: 0.0.40
codegen_flags: <defaults>
</compile_context>

<pallas_src>
import jax
import jax.numpy as jnp
from jax import lax
from jax.experimental import pallas as pl
from jax.experimental.pallas import tpu as pltpu

INPUT_SIZE = 2
HIDDEN_SIZE = 128      # = lane width
NUM_LAYERS = 2         # the kernel hard-wires the 2 stacked LSTM layers
OUTPUT_PAIRS = 7
SEQ_LEN = 8
BATCH = 4
LANES = 128
SUBLANES = 8


def lstm_tracker_kernel(x2d_ref,    # (T*Bp, I)  f32 time-major, batch-padded, flattened
                        wih0_ref,   # (I, 4H)    f32 layer-0 input weights (transposed, gate-prescaled)
                        b0_ref,     # (1, 4H)    f32 b_ih0 + b_hh0 (gate-prescaled)
                        whh0_ref,   # (H, 4H)    bf16 layer-0 hidden weights (transposed, gate-prescaled)
                        w1s_ref,    # (2H, 4H)   bf16 stacked [W_ih1; W_hh1] (transposed, gate-prescaled)
                        b1_ref,     # (1, 4H)    f32 b_ih1 + b_hh1 (gate-prescaled)
                        wfc_ref,    # (H, 128)   f32 fc weight (transposed, lane-padded)
                        bfc_ref,    # (1, 128)   f32 fc bias (lane-padded)
                        out_ref,    # (Bp, 128)  f32 fc(h_n[-1]) (lane-padded)
                        gx_s):      # (T*Bp, 4H) f32 scratch: hoisted layer-0 input projection
    H = whh0_ref.shape[0]
    Bp = out_ref.shape[0]
    T = x2d_ref.shape[0] // Bp

    # ---- hoisted layer-0 input projection (one matmul for all timesteps) ----
    gx_s[...] = (jnp.dot(x2d_ref[...], wih0_ref[...],
                         preferred_element_type=jnp.float32)
                 + b0_ref[...])

    # Hoist the layer-1 bias broadcast out of the unrolled loop (no CSE of
    # broadcast_in_dim).
    b1 = jnp.broadcast_to(b1_ref[...], (Bp, 4 * H))

    def gates_to_hc(gates, c_prev):
        # i/f/o gate pre-activations were pre-scaled by 0.5 in prepare_params(),
        # so sigmoid(z) == 0.5 * tanh(z_prescaled) + 0.5 with no inner multiply.
        i = 0.5 * jnp.tanh(gates[:, 0 * H:1 * H]) + 0.5
        f = 0.5 * jnp.tanh(gates[:, 1 * H:2 * H]) + 0.5
        g = jnp.tanh(gates[:, 2 * H:3 * H])
        o = 0.5 * jnp.tanh(gates[:, 3 * H:4 * H]) + 0.5
        c_new = f * c_prev + i * g
        h_new = o * jnp.tanh(c_new)
        return h_new, c_new

    zeros = jnp.zeros((Bp, H), jnp.float32)   # h_0 = c_0 = 0 (matches torch.zeros init)
    h0, c0, h1, c1 = zeros, zeros, zeros, zeros

    # Statically unrolled time loop: state stays in vregs, scheduler sees the
    # full 2-layer wavefront DAG.
    for t in range(T):
        # layer 0: input contribution precomputed in gx_s
        gates0 = (gx_s[pl.ds(t * Bp, Bp), :]
                  + jnp.dot(h0.astype(jnp.bfloat16), whh0_ref[...],
                            preferred_element_type=jnp.float32))
        h0, c0 = gates_to_hc(gates0, c0)

        # layer 1: single fused K=2H matmul on stacked [W_ih1; W_hh1]
        x1 = jnp.concatenate([h0, h1], axis=-1).astype(jnp.bfloat16)   # (Bp, 2H)
        gates1 = (jnp.dot(x1, w1s_ref[...],
                          preferred_element_type=jnp.float32)
                  + b1)
        h1, c1 = gates_to_hc(gates1, c1)

    # fc on the last layer's final hidden state (f32, lane-dense output).
    out_ref[...] = (jnp.dot(h1, wfc_ref[...],
                            preferred_element_type=jnp.float32)
                    + bfc_ref[...])


def prepare_params(params):
    """One-time prep: gate pre-scaling, layer-1 weight stacking, bf16 casts,
    fc lane padding. Kept out of the per-call (jitted) forward path."""
    H, P2 = HIDDEN_SIZE, 2 * OUTPUT_PAIRS
    # PyTorch gate order along 4H: [i, f, g, o]. Pre-scale i/f/o columns by 0.5.
    scale = jnp.concatenate([jnp.full((H,), 0.5, jnp.float32),
                             jnp.full((H,), 0.5, jnp.float32),
                             jnp.ones((H,), jnp.float32),
                             jnp.full((H,), 0.5, jnp.float32)])[None, :]   # (1, 4H)

    wih0 = params["wih0_t"].astype(jnp.float32) * scale                    # (I, 4H)
    b0 = params["b0"].astype(jnp.float32) * scale                          # (1, 4H)
    whh0 = (params["whh0_t"].astype(jnp.float32) * scale).astype(jnp.bfloat16)
    w1s = (jnp.concatenate([params["wih1_t"], params["whh1_t"]], axis=0)
           .astype(jnp.float32) * scale).astype(jnp.bfloat16)              # (2H, 4H)
    b1 = params["b1"].astype(jnp.float32) * scale                          # (1, 4H)
    wfc = jnp.pad(params["wfc_t"].astype(jnp.float32), ((0, 0), (0, LANES - P2)))
    bfc = jnp.pad(params["bfc"].astype(jnp.float32), ((0, 0), (0, LANES - P2)))
    return {"wih0": wih0, "b0": b0, "whh0": whh0, "w1s": w1s, "b1": b1,
            "wfc": wfc, "bfc": bfc}


def lstm_vehicle_tracker_forward(x, prep):
    """x: (B, T, I) batch_first like PyTorch; prep: prepare_params() output.
    Returns (B, OUTPUT_PAIRS, 2). Intended to be called under jax.jit."""
    B, T, I = x.shape
    H = HIDDEN_SIZE
    P2 = 2 * OUTPUT_PAIRS
    Bp = ((B + SUBLANES - 1) // SUBLANES) * SUBLANES   # pad batch to sublane tile

    # time-major, zero-pad batch, flatten (T, Bp, I) -> (T*Bp, I)
    x_tm = jnp.transpose(x.astype(jnp.float32), (1, 0, 2))        # (T, B, I)
    x_tm = jnp.pad(x_tm, ((0, 0), (0, Bp - B), (0, 0)))           # (T, Bp, I)
    x2d = x_tm.reshape(T * Bp, I)

    inputs = (x2d, prep["wih0"], prep["b0"], prep["whh0"], prep["w1s"],
              prep["b1"], prep["wfc"], prep["bfc"])

    vmem = pl.BlockSpec(memory_space=pltpu.MemorySpace.VMEM)
    out = pl.pallas_call(
        lstm_tracker_kernel,
        out_shape=jax.ShapeDtypeStruct((Bp, LANES), jnp.float32),
        in_specs=[vmem] * len(inputs),
        out_specs=vmem,
        scratch_shapes=[
            pltpu.VMEM((T * Bp, 4 * H), jnp.float32),   # hoisted layer-0 projection
        ],
    )(*inputs)
    return out[:B, :P2].reshape(B, OUTPUT_PAIRS, 2)


def init_params(key):
    """Deterministic init matching PyTorch LSTM/Linear shapes (uniform(-1/sqrt(H), 1/sqrt(H)))."""
    H, I, P = HIDDEN_SIZE, INPUT_SIZE, OUTPUT_PAIRS
    k = 1.0 / jnp.sqrt(jnp.float32(H))
    ks = jax.random.split(key, 10)

    def u(kk, shape):
        return jax.random.uniform(kk, shape, jnp.float32, -k, k)

    # PyTorch parameter shapes: weight_ih_l0 (4H, I), weight_hh_l* (4H, H), biases (4H,)
    w_ih0 = u(ks[0], (4 * H, I))
    w_hh0 = u(ks[1], (4 * H, H))
    b_ih0 = u(ks[2], (4 * H,))
    b_hh0 = u(ks[3], (4 * H,))
    w_ih1 = u(ks[4], (4 * H, H))
    w_hh1 = u(ks[5], (4 * H, H))
    b_ih1 = u(ks[6], (4 * H,))
    b_hh1 = u(ks[7], (4 * H,))
    # fc: Linear(H, 2P) -> weight (2P, H), bias (2P,)
    w_fc = jax.random.uniform(ks[8], (2 * P, H), jnp.float32, -k, k)
    b_fc = jax.random.uniform(ks[9], (2 * P,), jnp.float32, -k, k)

    return {
        "wih0_t": w_ih0.T, "whh0_t": w_hh0.T, "b0": (b_ih0 + b_hh0)[None, :],
        "wih1_t": w_ih1.T, "whh1_t": w_hh1.T, "b1": (b_ih1 + b_hh1)[None, :],
        "wfc_t": w_fc.T, "bfc": b_fc[None, :],
    }


def reference_forward(x, params):
    """Pure-JAX f32 reference reproducing torch nn.LSTM(2 layers, batch_first) + Linear."""
    H = HIDDEN_SIZE
    B = x.shape[0]

    def cell(x_t, h, c, wih_t, whh_t, b):
        gates = x_t @ wih_t + h @ whh_t + b
        i = jax.nn.sigmoid(gates[:, 0 * H:1 * H])
        f = jax.nn.sigmoid(gates[:, 1 * H:2 * H])
        g = jnp.tanh(gates[:, 2 * H:3 * H])
        o = jax.nn.sigmoid(gates[:, 3 * H:4 * H])
        c_new = f * c + i * g
        return o * jnp.tanh(c_new), c_new

    def step(carry, x_t):
        h0, c0, h1, c1 = carry
        h0, c0 = cell(x_t, h0, c0, params["wih0_t"], params["whh0_t"], params["b0"])
        h1, c1 = cell(h0, h1, c1, params["wih1_t"], params["whh1_t"], params["b1"])
        return (h0, c0, h1, c1), None

    z = jnp.zeros((B, H), jnp.float32)
    (h0, c0, h1, c1), _ = lax.scan(step, (z, z, z, z), jnp.transpose(x, (1, 0, 2)))
    out = h1 @ params["wfc_t"] + params["bfc"]
    return out.reshape(B, OUTPUT_PAIRS, 2)


def matched_reference_forward(x, prep):
    """Pure-JAX reference mirroring the kernel's numerics (prescaled gates,
    tanh-form sigmoid, bf16 matmul operands, f32 accumulation) for a tighter
    correctness check than the f32 reference."""
    H, P2 = HIDDEN_SIZE, 2 * OUTPUT_PAIRS
    B, T, _ = x.shape
    xf = x.astype(jnp.float32)
    gx = (jnp.dot(xf.reshape(B * T, -1), prep["wih0"],
                  preferred_element_type=jnp.float32) + prep["b0"]).reshape(B, T, 4 * H)

    def act(gates, c):
        i = 0.5 * jnp.tanh(gates[:, 0 * H:1 * H]) + 0.5
        f = 0.5 * jnp.tanh(gates[:, 1 * H:2 * H]) + 0.5
        g = jnp.tanh(gates[:, 2 * H:3 * H])
        o = 0.5 * jnp.tanh(gates[:, 3 * H:4 * H]) + 0.5
        c = f * c + i * g
        return o * jnp.tanh(c), c

    z = jnp.zeros((B, H), jnp.float32)
    h0, c0, h1, c1 = z, z, z, z
    for t in range(T):
        g0 = gx[:, t] + jnp.dot(h0.astype(jnp.bfloat16), prep["whh0"],
                                preferred_element_type=jnp.float32)
        h0, c0 = act(g0, c0)
        x1 = jnp.concatenate([h0, h1], axis=-1).astype(jnp.bfloat16)
        g1 = jnp.dot(x1, prep["w1s"], preferred_element_type=jnp.float32) + prep["b1"]
        h1, c1 = act(g1, c1)
    out = jnp.dot(h1, prep["wfc"][:, :P2],
                  preferred_element_type=jnp.float32) + prep["bfc"][:, :P2]
    return out.reshape(B, OUTPUT_PAIRS, 2)


if __name__ == "__main__":
    key = jax.random.PRNGKey(0)
    kp, kx = jax.random.split(key)
    params = init_params(kp)
    prep = prepare_params(params)          # one-time parameter prep (off the hot path)
    x = jax.random.normal(kx, (BATCH, SEQ_LEN, INPUT_SIZE), jnp.float32)

    fwd = jax.jit(lstm_vehicle_tracker_forward)
    out = jax.block_until_ready(fwd(x, prep))

    ref = jax.block_until_ready(reference_forward(x, params))
    ref_matched = jax.block_until_ready(matched_reference_forward(x, prep))

    assert out.shape == (BATCH, OUTPUT_PAIRS, 2), out.shape
    # vs f32 PyTorch-semantics reference (bf16 recurrent weights -> loosened tol).
    assert jnp.allclose(out, ref, atol=2e-2, rtol=2e-2), float(jnp.max(jnp.abs(out - ref)))
    # vs bf16-matched reference (same math as the kernel) at tighter tolerance.
    assert jnp.allclose(out, ref_matched, atol=5e-3, rtol=5e-3), float(
        jnp.max(jnp.abs(out - ref_matched)))

    print("KERNEL_OK")
</pallas_src>

<mosaic_0001>
module attributes {stable_mosaic.version = 11 : i64} {
  func.func @lstm_tracker_kernel(%arg0: memref<64x2xf32, #tpu.memory_space<vmem>>, %arg1: memref<2x512xf32, #tpu.memory_space<vmem>>, %arg2: memref<1x512xf32, #tpu.memory_space<vmem>>, %arg3: memref<128x512xbf16, #tpu.memory_space<vmem>>, %arg4: memref<256x512xbf16, #tpu.memory_space<vmem>>, %arg5: memref<1x512xf32, #tpu.memory_space<vmem>>, %arg6: memref<128x128xf32, #tpu.memory_space<vmem>>, %arg7: memref<1x128xf32, #tpu.memory_space<vmem>>, %arg8: memref<8x128xf32, #tpu.memory_space<vmem>>, %arg9: memref<64x512xf32, #tpu.memory_space<vmem>>) attributes {dimension_semantics = [], scalar_prefetch = 0 : i64, scratch_operands = 1 : i64, tpu.core_type = #tpu.core_type<tc>} {
    %c0 = arith.constant 0 : index
    %c0_0 = arith.constant 0 : index
    %0 = vector.load %arg0[%c0, %c0_0] : memref<64x2xf32, #tpu.memory_space<vmem>>, vector<64x2xf32>
    %c0_1 = arith.constant 0 : index
    %c0_2 = arith.constant 0 : index
    %1 = vector.load %arg1[%c0_1, %c0_2] : memref<2x512xf32, #tpu.memory_space<vmem>>, vector<2x512xf32>
    %cst = arith.constant dense<0.000000e+00> : vector<64x512xf32>
    %2 = tpu.matmul %0, %1, %cst {dimension_numbers = #tpu.dot_dimension_numbers<[1], [0], [0], [1], [0, 0, 1, 1], [], []>} : vector<64x2xf32>, vector<2x512xf32>, vector<64x512xf32> -> vector<64x512xf32>
    %c0_3 = arith.constant 0 : index
    %c0_4 = arith.constant 0 : index
    %3 = vector.load %arg2[%c0_3, %c0_4] : memref<1x512xf32, #tpu.memory_space<vmem>>, vector<1x512xf32>
    %4 = vector.broadcast %3 : vector<1x512xf32> to vector<64x512xf32>
    %5 = arith.addf %2, %4 : vector<64x512xf32>
    %c0_5 = arith.constant 0 : index
    %c0_6 = arith.constant 0 : index
    %6 = vector.load %arg9[%c0_5, %c0_6] : memref<64x512xf32, #tpu.memory_space<vmem>>, vector<64x512xf32>
    tpu.vector_store %arg9[%c0_5, %c0_6], %5 {strides = array<i32>} : memref<64x512xf32, #tpu.memory_space<vmem>>, vector<64x512xf32>,
    %c0_7 = arith.constant 0 : index
    %c0_8 = arith.constant 0 : index
    %7 = vector.load %arg5[%c0_7, %c0_8] : memref<1x512xf32, #tpu.memory_space<vmem>>, vector<1x512xf32>
    %8 = vector.shape_cast %7 : vector<1x512xf32> to vector<1x512xf32>
    %9 = vector.broadcast %8 : vector<1x512xf32> to vector<8x512xf32>
    %cst_9 = arith.constant 0.000000e+00 : f32
    %10 = vector.broadcast %cst_9 : f32 to vector<8x128xf32>
    %c0_10 = arith.constant 0 : index
    %c0_11 = arith.constant 0 : index
    %11 = vector.load %arg9[%c0_10, %c0_11] : memref<64x512xf32, #tpu.memory_space<vmem>>, vector<8x512xf32>
    %12 = arith.truncf %10 : vector<8x128xf32> to vector<8x128xbf16>
    %c0_12 = arith.constant 0 : index
    %c0_13 = arith.constant 0 : index
    %13 = vector.load %arg3[%c0_12, %c0_13] : memref<128x512xbf16, #tpu.memory_space<vmem>>, vector<128x512xbf16>
    %cst_14 = arith.constant dense<0.000000e+00> : vector<8x512xf32>
    %14 = tpu.matmul %12, %13, %cst_14 {dimension_numbers = #tpu.dot_dimension_numbers<[1], [0], [0], [1], [0, 0, 1, 1], [], []>} : vector<8x128xbf16>, vector<128x512xbf16>, vector<8x512xf32> -> vector<8x512xf32>
    %15 = arith.addf %11, %14 : vector<8x512xf32>
    %16 = vector.extract_strided_slice %15 {offsets = [0, 0], sizes = [8, 128], strides = [1, 1]} : vector<8x512xf32> to vector<8x128xf32>
    %17 = math.tanh %16 : vector<8x128xf32>
    %cst_15 = arith.constant 5.000000e-01 : f32
    %18 = vector.broadcast %cst_15 : f32 to vector<8x128xf32>
    %19 = arith.mulf %18, %17 : vector<8x128xf32>
    %cst_16 = arith.constant 5.000000e-01 : f32
    %20 = vector.broadcast %cst_16 : f32 to vector<8x128xf32>
    %21 = arith.addf %19, %20 : vector<8x128xf32>
    %22 = vector.extract_strided_slice %15 {offsets = [0, 128], sizes = [8, 128], strides = [1, 1]} : vector<8x512xf32> to vector<8x128xf32>
    %23 = math.tanh %22 : vector<8x128xf32>
    %cst_17 = arith.constant 5.000000e-01 : f32
    %24 = vector.broadcast %cst_17 : f32 to vector<8x128xf32>
    %25 = arith.mulf %24, %23 : vector<8x128xf32>
    %cst_18 = arith.constant 5.000000e-01 : f32
    %26 = vector.broadcast %cst_18 : f32 to vector<8x128xf32>
    %27 = arith.addf %25, %26 : vector<8x128xf32>
    %28 = vector.extract_strided_slice %15 {offsets = [0, 256], sizes = [8, 128], strides = [1, 1]} : vector<8x512xf32> to vector<8x128xf32>
    %29 = math.tanh %28 : vector<8x128xf32>
    %30 = vector.extract_strided_slice %15 {offsets = [0, 384], sizes = [8, 128], strides = [1, 1]} : vector<8x512xf32> to vector<8x128xf32>
    %31 = math.tanh %30 : vector<8x128xf32>
    %cst_19 = arith.constant 5.000000e-01 : f32
    %32 = vector.broadcast %cst_19 : f32 to vector<8x128xf32>
    %33 = arith.mulf %32, %31 : vector<8x128xf32>
    %cst_20 = arith.constant 5.000000e-01 : f32
    %34 = vector.broadcast %cst_20 : f32 to vector<8x128xf32>
    %35 = arith.addf %33, %34 : vector<8x128xf32>
    %36 = arith.mulf %27, %10 : vector<8x128xf32>
    %37 = arith.mulf %21, %29 : vector<8x128xf32>
    %38 = arith.addf %36, %37 : vector<8x128xf32>
    %39 = math.tanh %38 : vector<8x128xf32>
    %40 = arith.mulf %35, %39 : vector<8x128xf32>
    %41 = tpu.concatenate %40, %10 in 1 : vector<8x128xf32>, vector<8x128xf32> -> vector<8x256xf32>
    %42 = arith.truncf %41 : vector<8x256xf32> to vector<8x256xbf16>
    %c0_21 = arith.constant 0 : index
    %c0_22 = arith.constant 0 : index
    %43 = vector.load %arg4[%c0_21, %c0_22] : memref<256x512xbf16, #tpu.memory_space<vmem>>, vector<256x512xbf16>
    %cst_23 = arith.constant dense<0.000000e+00> : vector<8x512xf32>
    %44 = tpu.matmul %42, %43, %cst_23 {dimension_numbers = #tpu.dot_dimension_numbers<[1], [0], [0], [1], [0, 0, 1, 1], [], []>} : vector<8x256xbf16>, vector<256x512xbf16>, vector<8x512xf32> -> vector<8x512xf32>
    %45 = arith.addf %44, %9 : vector<8x512xf32>
    %46 = vector.extract_strided_slice %45 {offsets = [0, 0], sizes = [8, 128], strides = [1, 1]} : vector<8x512xf32> to vector<8x128xf32>
    %47 = math.tanh %46 : vector<8x128xf32>
    %cst_24 = arith.constant 5.000000e-01 : f32
    %48 = vector.broadcast %cst_24 : f32 to vector<8x128xf32>
    %49 = arith.mulf %48, %47 : vector<8x128xf32>
    %cst_25 = arith.constant 5.000000e-01 : f32
    %50 = vector.broadcast %cst_25 : f32 to vector<8x128xf32>
    %51 = arith.addf %49, %50 : vector<8x128xf32>
    %52 = vector.extract_strided_slice %45 {offsets = [0, 128], sizes = [8, 128], strides = [1, 1]} : vector<8x512xf32> to vector<8x128xf32>
    %53 = math.tanh %52 : vector<8x128xf32>
    %cst_26 = arith.constant 5.000000e-01 : f32
    %54 = vector.broadcast %cst_26 : f32 to vector<8x128xf32>
    %55 = arith.mulf %54, %53 : vector<8x128xf32>
    %cst_27 = arith.constant 5.000000e-01 : f32
    %56 = vector.broadcast %cst_27 : f32 to vector<8x128xf32>
    %57 = arith.addf %55, %56 : vector<8x128xf32>
    %58 = vector.extract_strided_slice %45 {offsets = [0, 256], sizes = [8, 128], strides = [1, 1]} : vector<8x512xf32> to vector<8x128xf32>
    %59 = math.tanh %58 : vector<8x128xf32>
    %60 = vector.extract_strided_slice %45 {offsets = [0, 384], sizes = [8, 128], strides = [1, 1]} : vector<8x512xf32> to vector<8x128xf32>
    %61 = math.tanh %60 : vector<8x128xf32>
    %cst_28 = arith.constant 5.000000e-01 : f32
    %62 = vector.broadcast %cst_28 : f32 to vector<8x128xf32>
    %63 = arith.mulf %62, %61 : vector<8x128xf32>
    %cst_29 = arith.constant 5.000000e-01 : f32
    %64 = vector.broadcast %cst_29 : f32 to vector<8x128xf32>
    %65 = arith.addf %63, %64 : vector<8x128xf32>
    %66 = arith.mulf %57, %10 : vector<8x128xf32>
    %67 = arith.mulf %51, %59 : vector<8x128xf32>
    %68 = arith.addf %66, %67 : vector<8x128xf32>
    %69 = math.tanh %68 : vector<8x128xf32>
    %70 = arith.mulf %65, %69 : vector<8x128xf32>
    %c8 = arith.constant 8 : index
    %c0_30 = arith.constant 0 : index
    %71 = vector.load %arg9[%c8, %c0_30] : memref<64x512xf32, #tpu.memory_space<vmem>>, vector<8x512xf32>
    %72 = arith.truncf %40 : vector<8x128xf32> to vector<8x128xbf16>
    %c0_31 = arith.constant 0 : index
    %c0_32 = arith.constant 0 : index
    %73 = vector.load %arg3[%c0_31, %c0_32] : memref<128x512xbf16, #tpu.memory_space<vmem>>, vector<128x512xbf16>
    %cst_33 = arith.constant dense<0.000000e+00> : vector<8x512xf32>
    %74 = tpu.matmul %72, %73, %cst_33 {dimension_numbers = #tpu.dot_dimension_numbers<[1], [0], [0], [1], [0, 0, 1, 1], [], []>} : vector<8x128xbf16>, vector<128x512xbf16>, vector<8x512xf32> -> vector<8x512xf32>
    %75 = arith.addf %71, %74 : vector<8x512xf32>
    %76 = vector.extract_strided_slice %75 {offsets = [0, 0], sizes = [8, 128], strides = [1, 1]} : vector<8x512xf32> to vector<8x128xf32>
    %77 = math.tanh %76 : vector<8x128xf32>
    %cst_34 = arith.constant 5.000000e-01 : f32
    %78 = vector.broadcast %cst_34 : f32 to vector<8x128xf32>
    %79 = arith.mulf %78, %77 : vector<8x128xf32>
    %cst_35 = arith.constant 5.000000e-01 : f32
    %80 = vector.broadcast %cst_35 : f32 to vector<8x128xf32>
    %81 = arith.addf %79, %80 : vector<8x128xf32>
    %82 = vector.extract_strided_slice %75 {offsets = [0, 128], sizes = [8, 128], strides = [1, 1]} : vector<8x512xf32> to vector<8x128xf32>
    %83 = math.tanh %82 : vector<8x128xf32>
    %cst_36 = arith.constant 5.000000e-01 : f32
    %84 = vector.broadcast %cst_36 : f32 to vector<8x128xf32>
    %85 = arith.mulf %84, %83 : vector<8x128xf32>
    %cst_37 = arith.constant 5.000000e-01 : f32
    %86 = vector.broadcast %cst_37 : f32 to vector<8x128xf32>
    %87 = arith.addf %85, %86 : vector<8x128xf32>
    %88 = vector.extract_strided_slice %75 {offsets = [0, 256], sizes = [8, 128], strides = [1, 1]} : vector<8x512xf32> to vector<8x128xf32>
    %89 = math.tanh %88 : vector<8x128xf32>
    %90 = vector.extract_strided_slice %75 {offsets = [0, 384], sizes = [8, 128], strides = [1, 1]} : vector<8x512xf32> to vector<8x128xf32>
    %91 = math.tanh %90 : vector<8x128xf32>
    %cst_38 = arith.constant 5.000000e-01 : f32
    %92 = vector.broadcast %cst_38 : f32 to vector<8x128xf32>
    %93 = arith.mulf %92, %91 : vector<8x128xf32>
    %cst_39 = arith.constant 5.000000e-01 : f32
    %94 = vector.broadcast %cst_39 : f32 to vector<8x128xf32>
    %95 = arith.addf %93, %94 : vector<8x128xf32>
    %96 = arith.mulf %87, %38 : vector<8x128xf32>
    %97 = arith.mulf %81, %89 : vector<8x128xf32>
    %98 = arith.addf %96, %97 : vector<8x128xf32>
    %99 = math.tanh %98 : vector<8x128xf32>
    %100 = arith.mulf %95, %99 : vector<8x128xf32>
    %101 = tpu.concatenate %100, %70 in 1 : vector<8x128xf32>, vector<8x128xf32> -> vector<8x256xf32>
    %102 = arith.truncf %101 : vector<8x256xf32> to vector<8x256xbf16>
    %c0_40 = arith.constant 0 : index
    %c0_41 = arith.constant 0 : index
    %103 = vector.load %arg4[%c0_40, %c0_41] : memref<256x512xbf16, #tpu.memory_space<vmem>>, vector<256x512xbf16>
    %cst_42 = arith.constant dense<0.000000e+00> : vector<8x512xf32>
    %104 = tpu.matmul %102, %103, %cst_42 {dimension_numbers = #tpu.dot_dimension_numbers<[1], [0], [0], [1], [0, 0, 1, 1], [], []>} : vector<8x256xbf16>, vector<256x512xbf16>, vector<8x512xf32> -> vector<8x512xf32>
    %105 = arith.addf %104, %9 : vector<8x512xf32>
    %106 = vector.extract_strided_slice %105 {offsets = [0, 0], sizes = [8, 128], strides = [1, 1]} : vector<8x512xf32> to vector<8x128xf32>
    %107 = math.tanh %106 : vector<8x128xf32>
    %cst_43 = arith.constant 5.000000e-01 : f32
    %108 = vector.broadcast %cst_43 : f32 to vector<8x128xf32>
    %109 = arith.mulf %108, %107 : vector<8x128xf32>
    %cst_44 = arith.constant 5.000000e-01 : f32
    %110 = vector.broadcast %cst_44 : f32 to vector<8x128xf32>
    %111 = arith.addf %109, %110 : vector<8x128xf32>
    %112 = vector.extract_strided_slice %105 {offsets = [0, 128], sizes = [8, 128], strides = [1, 1]} : vector<8x512xf32> to vector<8x128xf32>
    %113 = math.tanh %112 : vector<8x128xf32>
    %cst_45 = arith.constant 5.000000e-01 : f32
    %114 = vector.broadcast %cst_45 : f32 to vector<8x128xf32>
    %115 = arith.mulf %114, %113 : vector<8x128xf32>
    %cst_46 = arith.constant 5.000000e-01 : f32
    %116 = vector.broadcast %cst_46 : f32 to vector<8x128xf32>
    %117 = arith.addf %115, %116 : vector<8x128xf32>
    %118 = vector.extract_strided_slice %105 {offsets = [0, 256], sizes = [8, 128], strides = [1, 1]} : vector<8x512xf32> to vector<8x128xf32>
    %119 = math.tanh %118 : vector<8x128xf32>
    %120 = vector.extract_strided_slice %105 {offsets = [0, 384], sizes = [8, 128], strides = [1, 1]} : vector<8x512xf32> to vector<8x128xf32>
    %121 = math.tanh %120 : vector<8x128xf32>
    %cst_47 = arith.constant 5.000000e-01 : f32
    %122 = vector.broadcast %cst_47 : f32 to vector<8x128xf32>
    %123 = arith.mulf %122, %121 : vector<8x128xf32>
    %cst_48 = arith.constant 5.000000e-01 : f32
    %124 = vector.broadcast %cst_48 : f32 to vector<8x128xf32>
    %125 = arith.addf %123, %124 : vector<8x128xf32>
    %126 = arith.mulf %117, %68 : vector<8x128xf32>
    %127 = arith.mulf %111, %119 : vector<8x128xf32>
    %128 = arith.addf %126, %127 : vector<8x128xf32>
    %129 = math.tanh %128 : vector<8x128xf32>
    %130 = arith.mulf %125, %129 : vector<8x128xf32>
    %c16 = arith.constant 16 : index
    %c0_49 = arith.constant 0 : index
    %131 = vector.load %arg9[%c16, %c0_49] : memref<64x512xf32, #tpu.memory_space<vmem>>, vector<8x512xf32>
    %132 = arith.truncf %100 : vector<8x128xf32> to vector<8x128xbf16>
    %c0_50 = arith.constant 0 : index
    %c0_51 = arith.constant 0 : index
    %133 = vector.load %arg3[%c0_50, %c0_51] : memref<128x512xbf16, #tpu.memory_space<vmem>>, vector<128x512xbf16>
    %cst_52 = arith.constant dense<0.000000e+00> : vector<8x512xf32>
    %134 = tpu.matmul %132, %133, %cst_52 {dimension_numbers = #tpu.dot_dimension_numbers<[1], [0], [0], [1], [0, 0, 1, 1], [], []>} : vector<8x128xbf16>, vector<128x512xbf16>, vector<8x512xf32> -> vector<8x512xf32>
    %135 = arith.addf %131, %134 : vector<8x512xf32>
    %136 = vector.extract_strided_slice %135 {offsets = [0, 0], sizes = [8, 128], strides = [1, 1]} : vector<8x512xf32> to vector<8x128xf32>
    %137 = math.tanh %136 : vector<8x128xf32>
    %cst_53 = arith.constant 5.000000e-01 : f32
    %138 = vector.broadcast %cst_53 : f32 to vector<8x128xf32>
    %139 = arith.mulf %138, %137 : vector<8x128xf32>
    %cst_54 = arith.constant 5.000000e-01 : f32
    %140 = vector.broadcast %cst_54 : f32 to vector<8x128xf32>
    %141 = arith.addf %139, %140 : vector<8x128xf32>
    %142 = vector.extract_strided_slice %135 {offsets = [0, 128], sizes = [8, 128], strides = [1, 1]} : vector<8x512xf32> to vector<8x128xf32>
    %143 = math.tanh %142 : vector<8x128xf32>
    %cst_55 = arith.constant 5.000000e-01 : f32
    %144 = vector.broadcast %cst_55 : f32 to vector<8x128xf32>
    %145 = arith.mulf %144, %143 : vector<8x128xf32>
    %cst_56 = arith.constant 5.000000e-01 : f32
    %146 = vector.broadcast %cst_56 : f32 to vector<8x128xf32>
    %147 = arith.addf %145, %146 : vector<8x128xf32>
    %148 = vector.extract_strided_slice %135 {offsets = [0, 256], sizes = [8, 128], strides = [1, 1]} : vector<8x512xf32> to vector<8x128xf32>
    %149 = math.tanh %148 : vector<8x128xf32>
    %150 = vector.extract_strided_slice %135 {offsets = [0, 384], sizes = [8, 128], strides = [1, 1]} : vector<8x512xf32> to vector<8x128xf32>
    %151 = math.tanh %150 : vector<8x128xf32>
    %cst_57 = arith.constant 5.000000e-01 : f32
    %152 = vector.broadcast %cst_57 : f32 to vector<8x128xf32>
    %153 = arith.mulf %152, %151 : vector<8x128xf32>
    %cst_58 = arith.constant 5.000000e-01 : f32
    %154 = vector.broadcast %cst_58 : f32 to vector<8x128xf32>
    %155 = arith.addf %153, %154 : vector<8x128xf32>
    %156 = arith.mulf %147, %98 : vector<8x128xf32>
    %157 = arith.mulf %141, %149 : vector<8x128xf32>
    %158 = arith.addf %156, %157 : vector<8x128xf32>
    %159 = math.tanh %158 : vector<8x128xf32>
    %160 = arith.mulf %155, %159 : vector<8x128xf32>
    %161 = tpu.concatenate %160, %130 in 1 : vector<8x128xf32>, vector<8x128xf32> -> vector<8x256xf32>
    %162 = arith.truncf %161 : vector<8x256xf32> to vector<8x256xbf16>
    %c0_59 = arith.constant 0 : index
    %c0_60 = arith.constant 0 : index
    %163 = vector.load %arg4[%c0_59, %c0_60] : memref<256x512xbf16, #tpu.memory_space<vmem>>, vector<256x512xbf16>
    %cst_61 = arith.constant dense<0.000000e+00> : vector<8x512xf32>
    %164 = tpu.matmul %162, %163, %cst_61 {dimension_numbers = #tpu.dot_dimension_numbers<[1], [0], [0], [1], [0, 0, 1, 1], [], []>} : vector<8x256xbf16>, vector<256x512xbf16>, vector<8x512xf32> -> vector<8x512xf32>
    %165 = arith.addf %164, %9 : vector<8x512xf32>
    %166 = vector.extract_strided_slice %165 {offsets = [0, 0], sizes = [8, 128], strides = [1, 1]} : vector<8x512xf32> to vector<8x128xf32>
    %167 = math.tanh %166 : vector<8x128xf32>
    %cst_62 = arith.constant 5.000000e-01 : f32
    %168 = vector.broadcast %cst_62 : f32 to vector<8x128xf32>
    %169 = arith.mulf %168, %167 : vector<8x128xf32>
    %cst_63 = arith.constant 5.000000e-01 : f32
    %170 = vector.broadcast %cst_63 : f32 to vector<8x128xf32>
    %171 = arith.addf %169, %170 : vector<8x128xf32>
    %172 = vector.extract_strided_slice %165 {offsets = [0, 128], sizes = [8, 128], strides = [1, 1]} : vector<8x512xf32> to vector<8x128xf32>
    %173 = math.tanh %172 : vector<8x128xf32>
    %cst_64 = arith.constant 5.000000e-01 : f32
    %174 = vector.broadcast %cst_64 : f32 to vector<8x128xf32>
    %175 = arith.mulf %174, %173 : vector<8x128xf32>
    %cst_65 = arith.constant 5.000000e-01 : f32
    %176 = vector.broadcast %cst_65 : f32 to vector<8x128xf32>
    %177 = arith.addf %175, %176 : vector<8x128xf32>
    %178 = vector.extract_strided_slice %165 {offsets = [0, 256], sizes = [8, 128], strides = [1, 1]} : vector<8x512xf32> to vector<8x128xf32>
    %179 = math.tanh %178 : vector<8x128xf32>
    %180 = vector.extract_strided_slice %165 {offsets = [0, 384], sizes = [8, 128], strides = [1, 1]} : vector<8x512xf32> to vector<8x128xf32>
    %181 = math.tanh %180 : vector<8x128xf32>
    %cst_66 = arith.constant 5.000000e-01 : f32
    %182 = vector.broadcast %cst_66 : f32 to vector<8x128xf32>
    %183 = arith.mulf %182, %181 : vector<8x128xf32>
    %cst_67 = arith.constant 5.000000e-01 : f32
    %184 = vector.broadcast %cst_67 : f32 to vector<8x128xf32>
    %185 = arith.addf %183, %184 : vector<8x128xf32>
    %186 = arith.mulf %177, %128 : vector<8x128xf32>
    %187 = arith.mulf %171, %179 : vector<8x128xf32>
    %188 = arith.addf %186, %187 : vector<8x128xf32>
    %189 = math.tanh %188 : vector<8x128xf32>
    %190 = arith.mulf %185, %189 : vector<8x128xf32>
    %c24 = arith.constant 24 : index
    %c0_68 = arith.constant 0 : index
    %191 = vector.load %arg9[%c24, %c0_68] : memref<64x512xf32, #tpu.memory_space<vmem>>, vector<8x512xf32>
    %192 = arith.truncf %160 : vector<8x128xf32> to vector<8x128xbf16>
    %c0_69 = arith.constant 0 : index
    %c0_70 = arith.constant 0 : index
    %193 = vector.load %arg3[%c0_69, %c0_70] : memref<128x512xbf16, #tpu.memory_space<vmem>>, vector<128x512xbf16>
    %cst_71 = arith.constant dense<0.000000e+00> : vector<8x512xf32>
    %194 = tpu.matmul %192, %193, %cst_71 {dimension_numbers = #tpu.dot_dimension_numbers<[1], [0], [0], [1], [0, 0, 1, 1], [], []>} : vector<8x128xbf16>, vector<128x512xbf16>, vector<8x512xf32> -> vector<8x512xf32>
    %195 = arith.addf %191, %194 : vector<8x512xf32>
    %196 = vector.extract_strided_slice %195 {offsets = [0, 0], sizes = [8, 128], strides = [1, 1]} : vector<8x512xf32> to vector<8x128xf32>
    %197 = math.tanh %196 : vector<8x128xf32>
    %cst_72 = arith.constant 5.000000e-01 : f32
    %198 = vector.broadcast %cst_72 : f32 to vector<8x128xf32>
    %199 = arith.mulf %198, %197 : vector<8x128xf32>
    %cst_73 = arith.constant 5.000000e-01 : f32
    %200 = vector.broadcast %cst_73 : f32 to vector<8x128xf32>
    %201 = arith.addf %199, %200 : vector<8x128xf32>
    %202 = vector.extract_strided_slice %195 {offsets = [0, 128], sizes = [8, 128], strides = [1, 1]} : vector<8x512xf32> to vector<8x128xf32>
    %203 = math.tanh %202 : vector<8x128xf32>
    %cst_74 = arith.constant 5.000000e-01 : f32
    %204 = vector.broadcast %cst_74 : f32 to vector<8x128xf32>
    %205 = arith.mulf %204, %203 : vector<8x128xf32>
    %cst_75 = arith.constant 5.000000e-01 : f32
    %206 = vector.broadcast %cst_75 : f32 to vector<8x128xf32>
    %207 = arith.addf %205, %206 : vector<8x128xf32>
    %208 = vector.extract_strided_slice %195 {offsets = [0, 256], sizes = [8, 128], strides = [1, 1]} : vector<8x512xf32> to vector<8x128xf32>
    %209 = math.tanh %208 : vector<8x128xf32>
    %210 = vector.extract_strided_slice %195 {offsets = [0, 384], sizes = [8, 128], strides = [1, 1]} : vector<8x512xf32> to vector<8x128xf32>
    %211 = math.tanh %210 : vector<8x128xf32>
    %cst_76 = arith.constant 5.000000e-01 : f32
    %212 = vector.broadcast %cst_76 : f32 to vector<8x128xf32>
    %213 = arith.mulf %212, %211 : vector<8x128xf32>
    %cst_77 = arith.constant 5.000000e-01 : f32
    %214 = vector.broadcast %cst_77 : f32 to vector<8x128xf32>
    %215 = arith.addf %213, %214 : vector<8x128xf32>
    %216 = arith.mulf %207, %158 : vector<8x128xf32>
    %217 = arith.mulf %201, %209 : vector<8x128xf32>
    %218 = arith.addf %216, %217 : vector<8x128xf32>
    %219 = math.tanh %218 : vector<8x128xf32>
    %220 = arith.mulf %215, %219 : vector<8x128xf32>
    %221 = tpu.concatenate %220, %190 in 1 : vector<8x128xf32>, vector<8x128xf32> -> vector<8x256xf32>
    %222 = arith.truncf %221 : vector<8x256xf32> to vector<8x256xbf16>
    %c0_78 = arith.constant 0 : index
    %c0_79 = arith.constant 0 : index
    %223 = vector.load %arg4[%c0_78, %c0_79] : memref<256x512xbf16, #tpu.memory_space<vmem>>, vector<256x512xbf16>
    %cst_80 = arith.constant dense<0.000000e+00> : vector<8x512xf32>
    %224 = tpu.matmul %222, %223, %cst_80 {dimension_numbers = #tpu.dot_dimension_numbers<[1], [0], [0], [1], [0, 0, 1, 1], [], []>} : vector<8x256xbf16>, vector<256x512xbf16>, vector<8x512xf32> -> vector<8x512xf32>
    %225 = arith.addf %224, %9 : vector<8x512xf32>
    %226 = vector.extract_strided_slice %225 {offsets = [0, 0], sizes = [8, 128], strides = [1, 1]} : vector<8x512xf32> to vector<8x128xf32>
    %227 = math.tanh %226 : vector<8x128xf32>
    %cst_81 = arith.constant 5.000000e-01 : f32
    %228 = vector.broadcast %cst_81 : f32 to vector<8x128xf32>
    %229 = arith.mulf %228, %227 : vector<8x128xf32>
    %cst_82 = arith.constant 5.000000e-01 : f32
    %230 = vector.broadcast %cst_82 : f32 to vector<8x128xf32>
    %231 = arith.addf %229, %230 : vector<8x128xf32>
    %232 = vector.extract_strided_slice %225 {offsets = [0, 128], sizes = [8, 128], strides = [1, 1]} : vector<8x512xf32> to vector<8x128xf32>
    %233 = math.tanh %232 : vector<8x128xf32>
    %cst_83 = arith.constant 5.000000e-01 : f32
    %234 = vector.broadcast %cst_83 : f32 to vector<8x128xf32>
    %235 = arith.mulf %234, %233 : vector<8x128xf32>
    %cst_84 = arith.constant 5.000000e-01 : f32
    %236 = vector.broadcast %cst_84 : f32 to vector<8x128xf32>
    %237 = arith.addf %235, %236 : vector<8x128xf32>
    %238 = vector.extract_strided_slice %225 {offsets = [0, 256], sizes = [8, 128], strides = [1, 1]} : vector<8x512xf32> to vector<8x128xf32>
    %239 = math.tanh %238 : vector<8x128xf32>
    %240 = vector.extract_strided_slice %225 {offsets = [0, 384], sizes = [8, 128], strides = [1, 1]} : vector<8x512xf32> to vector<8x128xf32>
    %241 = math.tanh %240 : vector<8x128xf32>
    %cst_85 = arith.constant 5.000000e-01 : f32
    %242 = vector.broadcast %cst_85 : f32 to vector<8x128xf32>
    %243 = arith.mulf %242, %241 : vector<8x128xf32>
    %cst_86 = arith.constant 5.000000e-01 : f32
    %244 = vector.broadcast %cst_86 : f32 to vector<8x128xf32>
    %245 = arith.addf %243, %244 : vector<8x128xf32>
    %246 = arith.mulf %237, %188 : vector<8x128xf32>
    %247 = arith.mulf %231, %239 : vector<8x128xf32>
    %248 = arith.addf %246, %247 : vector<8x128xf32>
    %249 = math.tanh %248 : vector<8x128xf32>
    %250 = arith.mulf %245, %249 : vector<8x128xf32>
    %c32 = arith.constant 32 : index
    %c0_87 = arith.constant 0 : index
    %251 = vector.load %arg9[%c32, %c0_87] : memref<64x512xf32, #tpu.memory_space<vmem>>, vector<8x512xf32>
    %252 = arith.truncf %220 : vector<8x128xf32> to vector<8x128xbf16>
    %c0_88 = arith.constant 0 : index
    %c0_89 = arith.constant 0 : index
    %253 = vector.load %arg3[%c0_88, %c0_89] : memref<128x512xbf16, #tpu.memory_space<vmem>>, vector<128x512xbf16>
    %cst_90 = arith.constant dense<0.000000e+00> : vector<8x512xf32>
    %254 = tpu.matmul %252, %253, %cst_90 {dimension_numbers = #tpu.dot_dimension_numbers<[1], [0], [0], [1], [0, 0, 1, 1], [], []>} : vector<8x128xbf16>, vector<128x512xbf16>, vector<8x512xf32> -> vector<8x512xf32>
    %255 = arith.addf %251, %254 : vector<8x512xf32>
    %256 = vector.extract_strided_slice %255 {offsets = [0, 0], sizes = [8, 128], strides = [1, 1]} : vector<8x512xf32> to vector<8x128xf32>
    %257 = math.tanh %256 : vector<8x128xf32>
    %cst_91 = arith.constant 5.000000e-01 : f32
    %258 = vector.broadcast %cst_91 : f32 to vector<8x128xf32>
    %259 = arith.mulf %258, %257 : vector<8x128xf32>
    %cst_92 = arith.constant 5.000000e-01 : f32
    %260 = vector.broadcast %cst_92 : f32 to vector<8x128xf32>
    %261 = arith.addf %259, %260 : vector<8x128xf32>
    %262 = vector.extract_strided_slice %255 {offsets = [0, 128], sizes = [8, 128], strides = [1, 1]} : vector<8x512xf32> to vector<8x128xf32>
    %263 = math.tanh %262 : vector<8x128xf32>
    %cst_93 = arith.constant 5.000000e-01 : f32
    %264 = vector.broadcast %cst_93 : f32 to vector<8x128xf32>
    %265 = arith.mulf %264, %263 : vector<8x128xf32>
    %cst_94 = arith.constant 5.000000e-01 : f32
    %266 = vector.broadcast %cst_94 : f32 to vector<8x128xf32>
    %267 = arith.addf %265, %266 : vector<8x128xf32>
    %268 = vector.extract_strided_slice %255 {offsets = [0, 256], sizes = [8, 128], strides = [1, 1]} : vector<8x512xf32> to vector<8x128xf32>
    %269 = math.tanh %268 : vector<8x128xf32>
    %270 = vector.extract_strided_slice %255 {offsets = [0, 384], sizes = [8, 128], strides = [1, 1]} : vector<8x512xf32> to vector<8x128xf32>
    %271 = math.tanh %270 : vector<8x128xf32>
    %cst_95 = arith.constant 5.000000e-01 : f32
    %272 = vector.broadcast %cst_95 : f32 to vector<8x128xf32>
    %273 = arith.mulf %272, %271 : vector<8x128xf32>
    %cst_96 = arith.constant 5.000000e-01 : f32
    %274 = vector.broadcast %cst_96 : f32 to vector<8x128xf32>
    %275 = arith.addf %273, %274 : vector<8x128xf32>
    %276 = arith.mulf %267, %218 : vector<8x128xf32>
    %277 = arith.mulf %261, %269 : vector<8x128xf32>
    %278 = arith.addf %276, %277 : vector<8x128xf32>
    %279 = math.tanh %278 : vector<8x128xf32>
    %280 = arith.mulf %275, %279 : vector<8x128xf32>
    %281 = tpu.concatenate %280, %250 in 1 : vector<8x128xf32>, vector<8x128xf32> -> vector<8x256xf32>
    %282 = arith.truncf %281 : vector<8x256xf32> to vector<8x256xbf16>
    %c0_97 = arith.constant 0 : index
    %c0_98 = arith.constant 0 : index
    %283 = vector.load %arg4[%c0_97, %c0_98] : memref<256x512xbf16, #tpu.memory_space<vmem>>, vector<256x512xbf16>
    %cst_99 = arith.constant dense<0.000000e+00> : vector<8x512xf32>
    %284 = tpu.matmul %282, %283, %cst_99 {dimension_numbers = #tpu.dot_dimension_numbers<[1], [0], [0], [1], [0, 0, 1, 1], [], []>} : vector<8x256xbf16>, vector<256x512xbf16>, vector<8x512xf32> -> vector<8x512xf32>
    %285 = arith.addf %284, %9 : vector<8x512xf32>
    %286 = vector.extract_strided_slice %285 {offsets = [0, 0], sizes = [8, 128], strides = [1, 1]} : vector<8x512xf32> to vector<8x128xf32>
    %287 = math.tanh %286 : vector<8x128xf32>
    %cst_100 = arith.constant 5.000000e-01 : f32
    %288 = vector.broadcast %cst_100 : f32 to vector<8x128xf32>
    %289 = arith.mulf %288, %287 : vector<8x128xf32>
    %cst_101 = arith.constant 5.000000e-01 : f32
    %290 = vector.broadcast %cst_101 : f32 to vector<8x128xf32>
    %291 = arith.addf %289, %290 : vector<8x128xf32>
    %292 = vector.extract_strided_slice %285 {offsets = [0, 128], sizes = [8, 128], strides = [1, 1]} : vector<8x512xf32> to vector<8x128xf32>
    %293 = math.tanh %292 : vector<8x128xf32>
    %cst_102 = arith.constant 5.000000e-01 : f32
    %294 = vector.broadcast %cst_102 : f32 to vector<8x128xf32>
    %295 = arith.mulf %294, %293 : vector<8x128xf32>
    %cst_103 = arith.constant 5.000000e-01 : f32
    %296 = vector.broadcast %cst_103 : f32 to vector<8x128xf32>
    %297 = arith.addf %295, %296 : vector<8x128xf32>
    %298 = vector.extract_strided_slice %285 {offsets = [0, 256], sizes = [8, 128], strides = [1, 1]} : vector<8x512xf32> to vector<8x128xf32>
    %299 = math.tanh %298 : vector<8x128xf32>
    %300 = vector.extract_strided_slice %285 {offsets = [0, 384], sizes = [8, 128], strides = [1, 1]} : vector<8x512xf32> to vector<8x128xf32>
    %301 = math.tanh %300 : vector<8x128xf32>
    %cst_104 = arith.constant 5.000000e-01 : f32
    %302 = vector.broadcast %cst_104 : f32 to vector<8x128xf32>
    %303 = arith.mulf %302, %301 : vector<8x128xf32>
    %cst_105 = arith.constant 5.000000e-01 : f32
    %304 = vector.broadcast %cst_105 : f32 to vector<8x128xf32>
    %305 = arith.addf %303, %304 : vector<8x128xf32>
    %306 = arith.mulf %297, %248 : vector<8x128xf32>
    %307 = arith.mulf %291, %299 : vector<8x128xf32>
    %308 = arith.addf %306, %307 : vector<8x128xf32>
    %309 = math.tanh %308 : vector<8x128xf32>
    %310 = arith.mulf %305, %309 : vector<8x128xf32>
    %c40 = arith.constant 40 : index
    %c0_106 = arith.constant 0 : index
    %311 = vector.load %arg9[%c40, %c0_106] : memref<64x512xf32, #tpu.memory_space<vmem>>, vector<8x512xf32>
    %312 = arith.truncf %280 : vector<8x128xf32> to vector<8x128xbf16>
    %c0_107 = arith.constant 0 : index
    %c0_108 = arith.constant 0 : index
    %313 = vector.load %arg3[%c0_107, %c0_108] : memref<128x512xbf16, #tpu.memory_space<vmem>>, vector<128x512xbf16>
    %cst_109 = arith.constant dense<0.000000e+00> : vector<8x512xf32>
    %314 = tpu.matmul %312, %313, %cst_109 {dimension_numbers = #tpu.dot_dimension_numbers<[1], [0], [0], [1], [0, 0, 1, 1], [], []>} : vector<8x128xbf16>, vector<128x512xbf16>, vector<8x512xf32> -> vector<8x512xf32>
    %315 = arith.addf %311, %314 : vector<8x512xf32>
    %316 = vector.extract_strided_slice %315 {offsets = [0, 0], sizes = [8, 128], strides = [1, 1]} : vector<8x512xf32> to vector<8x128xf32>
    %317 = math.tanh %316 : vector<8x128xf32>
    %cst_110 = arith.constant 5.000000e-01 : f32
    %318 = vector.broadcast %cst_110 : f32 to vector<8x128xf32>
    %319 = arith.mulf %318, %317 : vector<8x128xf32>
    %cst_111 = arith.constant 5.000000e-01 : f32
    %320 = vector.broadcast %cst_111 : f32 to vector<8x128xf32>
    %321 = arith.addf %319, %320 : vector<8x128xf32>
    %322 = vector.extract_strided_slice %315 {offsets = [0, 128], sizes = [8, 128], strides = [1, 1]} : vector<8x512xf32> to vector<8x128xf32>
    %323 = math.tanh %322 : vector<8x128xf32>
    %cst_112 = arith.constant 5.000000e-01 : f32
    %324 = vector.broadcast %cst_112 : f32 to vector<8x128xf32>
    %325 = arith.mulf %324, %323 : vector<8x128xf32>
    %cst_113 = arith.constant 5.000000e-01 : f32
    %326 = vector.broadcast %cst_113 : f32 to vector<8x128xf32>
    %327 = arith.addf %325, %326 : vector<8x128xf32>
    %328 = vector.extract_strided_slice %315 {offsets = [0, 256], sizes = [8, 128], strides = [1, 1]} : vector<8x512xf32> to vector<8x128xf32>
    %329 = math.tanh %328 : vector<8x128xf32>
    %330 = vector.extract_strided_slice %315 {offsets = [0, 384], sizes = [8, 128], strides = [1, 1]} : vector<8x512xf32> to vector<8x128xf32>
    %331 = math.tanh %330 : vector<8x128xf32>
    %cst_114 = arith.constant 5.000000e-01 : f32
    %332 = vector.broadcast %cst_114 : f32 to vector<8x128xf32>
    %333 = arith.mulf %332, %331 : vector<8x128xf32>
    %cst_115 = arith.constant 5.000000e-01 : f32
    %334 = vector.broadcast %cst_115 : f32 to vector<8x128xf32>
    %335 = arith.addf %333, %334 : vector<8x128xf32>
    %336 = arith.mulf %327, %278 : vector<8x128xf32>
    %337 = arith.mulf %321, %329 : vector<8x128xf32>
    %338 = arith.addf %336, %337 : vector<8x128xf32>
    %339 = math.tanh %338 : vector<8x128xf32>
    %340 = arith.mulf %335, %339 : vector<8x128xf32>
    %341 = tpu.concatenate %340, %310 in 1 : vector<8x128xf32>, vector<8x128xf32> -> vector<8x256xf32>
    %342 = arith.truncf %341 : vector<8x256xf32> to vector<8x256xbf16>
    %c0_116 = arith.constant 0 : index
    %c0_117 = arith.constant 0 : index
    %343 = vector.load %arg4[%c0_116, %c0_117] : memref<256x512xbf16, #tpu.memory_space<vmem>>, vector<256x512xbf16>
    %cst_118 = arith.constant dense<0.000000e+00> : vector<8x512xf32>
    %344 = tpu.matmul %342, %343, %cst_118 {dimension_numbers = #tpu.dot_dimension_numbers<[1], [0], [0], [1], [0, 0, 1, 1], [], []>} : vector<8x256xbf16>, vector<256x512xbf16>, vector<8x512xf32> -> vector<8x512xf32>
    %345 = arith.addf %344, %9 : vector<8x512xf32>
    %346 = vector.extract_strided_slice %345 {offsets = [0, 0], sizes = [8, 128], strides = [1, 1]} : vector<8x512xf32> to vector<8x128xf32>
    %347 = math.tanh %346 : vector<8x128xf32>
    %cst_119 = arith.constant 5.000000e-01 : f32
    %348 = vector.broadcast %cst_119 : f32 to vector<8x128xf32>
    %349 = arith.mulf %348, %347 : vector<8x128xf32>
    %cst_120 = arith.constant 5.000000e-01 : f32
    %350 = vector.broadcast %cst_120 : f32 to vector<8x128xf32>
    %351 = arith.addf %349, %350 : vector<8x128xf32>
    %352 = vector.extract_strided_slice %345 {offsets = [0, 128], sizes = [8, 128], strides = [1, 1]} : vector<8x512xf32> to vector<8x128xf32>
    %353 = math.tanh %352 : vector<8x128xf32>
    %cst_121 = arith.constant 5.000000e-01 : f32
    %354 = vector.broadcast %cst_121 : f32 to vector<8x128xf32>
    %355 = arith.mulf %354, %353 : vector<8x128xf32>
    %cst_122 = arith.constant 5.000000e-01 : f32
    %356 = vector.broadcast %cst_122 : f32 to vector<8x128xf32>
    %357 = arith.addf %355, %356 : vector<8x128xf32>
    %358 = vector.extract_strided_slice %345 {offsets = [0, 256], sizes = [8, 128], strides = [1, 1]} : vector<8x512xf32> to vector<8x128xf32>
    %359 = math.tanh %358 : vector<8x128xf32>
    %360 = vector.extract_strided_slice %345 {offsets = [0, 384], sizes = [8, 128], strides = [1, 1]} : vector<8x512xf32> to vector<8x128xf32>
    %361 = math.tanh %360 : vector<8x128xf32>
    %cst_123 = arith.constant 5.000000e-01 : f32
    %362 = vector.broadcast %cst_123 : f32 to vector<8x128xf32>
    %363 = arith.mulf %362, %361 : vector<8x128xf32>
    %cst_124 = arith.constant 5.000000e-01 : f32
    %364 = vector.broadcast %cst_124 : f32 to vector<8x128xf32>
    %365 = arith.addf %363, %364 : vector<8x128xf32>
    %366 = arith.mulf %357, %308 : vector<8x128xf32>
    %367 = arith.mulf %351, %359 : vector<8x128xf32>
    %368 = arith.addf %366, %367 : vector<8x128xf32>
    %369 = math.tanh %368 : vector<8x128xf32>
    %370 = arith.mulf %365, %369 : vector<8x128xf32>
    %c48 = arith.constant 48 : index
    %c0_125 = arith.constant 0 : index
    %371 = vector.load %arg9[%c48, %c0_125] : memref<64x512xf32, #tpu.memory_space<vmem>>, vector<8x512xf32>
    %372 = arith.truncf %340 : vector<8x128xf32> to vector<8x128xbf16>
    %c0_126 = arith.constant 0 : index
    %c0_127 = arith.constant 0 : index
    %373 = vector.load %arg3[%c0_126, %c0_127] : memref<128x512xbf16, #tpu.memory_space<vmem>>, vector<128x512xbf16>
    %cst_128 = arith.constant dense<0.000000e+00> : vector<8x512xf32>
    %374 = tpu.matmul %372, %373, %cst_128 {dimension_numbers = #tpu.dot_dimension_numbers<[1], [0], [0], [1], [0, 0, 1, 1], [], []>} : vector<8x128xbf16>, vector<128x512xbf16>, vector<8x512xf32> -> vector<8x512xf32>
    %375 = arith.addf %371, %374 : vector<8x512xf32>
    %376 = vector.extract_strided_slice %375 {offsets = [0, 0], sizes = [8, 128], strides = [1, 1]} : vector<8x512xf32> to vector<8x128xf32>
    %377 = math.tanh %376 : vector<8x128xf32>
    %cst_129 = arith.constant 5.000000e-01 : f32
    %378 = vector.broadcast %cst_129 : f32 to vector<8x128xf32>
    %379 = arith.mulf %378, %377 : vector<8x128xf32>
    %cst_130 = arith.constant 5.000000e-01 : f32
    %380 = vector.broadcast %cst_130 : f32 to vector<8x128xf32>
    %381 = arith.addf %379, %380 : vector<8x128xf32>
    %382 = vector.extract_strided_slice %375 {offsets = [0, 128], sizes = [8, 128], strides = [1, 1]} : vector<8x512xf32> to vector<8x128xf32>
    %383 = math.tanh %382 : vector<8x128xf32>
    %cst_131 = arith.constant 5.000000e-01 : f32
    %384 = vector.broadcast %cst_131 : f32 to vector<8x128xf32>
    %385 = arith.mulf %384, %383 : vector<8x128xf32>
    %cst_132 = arith.constant 5.000000e-01 : f32
    %386 = vector.broadcast %cst_132 : f32 to vector<8x128xf32>
    %387 = arith.addf %385, %386 : vector<8x128xf32>
    %388 = vector.extract_strided_slice %375 {offsets = [0, 256], sizes = [8, 128], strides = [1, 1]} : vector<8x512xf32> to vector<8x128xf32>
    %389 = math.tanh %388 : vector<8x128xf32>
    %390 = vector.extract_strided_slice %375 {offsets = [0, 384], sizes = [8, 128], strides = [1, 1]} : vector<8x512xf32> to vector<8x128xf32>
    %391 = math.tanh %390 : vector<8x128xf32>
    %cst_133 = arith.constant 5.000000e-01 : f32
    %392 = vector.broadcast %cst_133 : f32 to vector<8x128xf32>
    %393 = arith.mulf %392, %391 : vector<8x128xf32>
    %cst_134 = arith.constant 5.000000e-01 : f32
    %394 = vector.broadcast %cst_134 : f32 to vector<8x128xf32>
    %395 = arith.addf %393, %394 : vector<8x128xf32>
    %396 = arith.mulf %387, %338 : vector<8x128xf32>
    %397 = arith.mulf %381, %389 : vector<8x128xf32>
    %398 = arith.addf %396, %397 : vector<8x128xf32>
    %399 = math.tanh %398 : vector<8x128xf32>
    %400 = arith.mulf %395, %399 : vector<8x128xf32>
    %401 = tpu.concatenate %400, %370 in 1 : vector<8x128xf32>, vector<8x128xf32> -> vector<8x256xf32>
    %402 = arith.truncf %401 : vector<8x256xf32> to vector<8x256xbf16>
    %c0_135 = arith.constant 0 : index
    %c0_136 = arith.constant 0 : index
    %403 = vector.load %arg4[%c0_135, %c0_136] : memref<256x512xbf16, #tpu.memory_space<vmem>>, vector<256x512xbf16>
    %cst_137 = arith.constant dense<0.000000e+00> : vector<8x512xf32>
    %404 = tpu.matmul %402, %403, %cst_137 {dimension_numbers = #tpu.dot_dimension_numbers<[1], [0], [0], [1], [0, 0, 1, 1], [], []>} : vector<8x256xbf16>, vector<256x512xbf16>, vector<8x512xf32> -> vector<8x512xf32>
    %405 = arith.addf %404, %9 : vector<8x512xf32>
    %406 = vector.extract_strided_slice %405 {offsets = [0, 0], sizes = [8, 128], strides = [1, 1]} : vector<8x512xf32> to vector<8x128xf32>
    %407 = math.tanh %406 : vector<8x128xf32>
    %cst_138 = arith.constant 5.000000e-01 : f32
    %408 = vector.broadcast %cst_138 : f32 to vector<8x128xf32>
    %409 = arith.mulf %408, %407 : vector<8x128xf32>
    %cst_139 = arith.constant 5.000000e-01 : f32
    %410 = vector.broadcast %cst_139 : f32 to vector<8x128xf32>
    %411 = arith.addf %409, %410 : vector<8x128xf32>
    %412 = vector.extract_strided_slice %405 {offsets = [0, 128], sizes = [8, 128], strides = [1, 1]} : vector<8x512xf32> to vector<8x128xf32>
    %413 = math.tanh %412 : vector<8x128xf32>
    %cst_140 = arith.constant 5.000000e-01 : f32
    %414 = vector.broadcast %cst_140 : f32 to vector<8x128xf32>
    %415 = arith.mulf %414, %413 : vector<8x128xf32>
    %cst_141 = arith.constant 5.000000e-01 : f32
    %416 = vector.broadcast %cst_141 : f32 to vector<8x128xf32>
    %417 = arith.addf %415, %416 : vector<8x128xf32>
    %418 = vector.extract_strided_slice %405 {offsets = [0, 256], sizes = [8, 128], strides = [1, 1]} : vector<8x512xf32> to vector<8x128xf32>
    %419 = math.tanh %418 : vector<8x128xf32>
    %420 = vector.extract_strided_slice %405 {offsets = [0, 384], sizes = [8, 128], strides = [1, 1]} : vector<8x512xf32> to vector<8x128xf32>
    %421 = math.tanh %420 : vector<8x128xf32>
    %cst_142 = arith.constant 5.000000e-01 : f32
    %422 = vector.broadcast %cst_142 : f32 to vector<8x128xf32>
    %423 = arith.mulf %422, %421 : vector<8x128xf32>
    %cst_143 = arith.constant 5.000000e-01 : f32
    %424 = vector.broadcast %cst_143 : f32 to vector<8x128xf32>
    %425 = arith.addf %423, %424 : vector<8x128xf32>
    %426 = arith.mulf %417, %368 : vector<8x128xf32>
    %427 = arith.mulf %411, %419 : vector<8x128xf32>
    %428 = arith.addf %426, %427 : vector<8x128xf32>
    %429 = math.tanh %428 : vector<8x128xf32>
    %430 = arith.mulf %425, %429 : vector<8x128xf32>
    %c56 = arith.constant 56 : index
    %c0_144 = arith.constant 0 : index
    %431 = vector.load %arg9[%c56, %c0_144] : memref<64x512xf32, #tpu.memory_space<vmem>>, vector<8x512xf32>
    %432 = arith.truncf %400 : vector<8x128xf32> to vector<8x128xbf16>
    %c0_145 = arith.constant 0 : index
    %c0_146 = arith.constant 0 : index
    %433 = vector.load %arg3[%c0_145, %c0_146] : memref<128x512xbf16, #tpu.memory_space<vmem>>, vector<128x512xbf16>
    %cst_147 = arith.constant dense<0.000000e+00> : vector<8x512xf32>
    %434 = tpu.matmul %432, %433, %cst_147 {dimension_numbers = #tpu.dot_dimension_numbers<[1], [0], [0], [1], [0, 0, 1, 1], [], []>} : vector<8x128xbf16>, vector<128x512xbf16>, vector<8x512xf32> -> vector<8x512xf32>
    %435 = arith.addf %431, %434 : vector<8x512xf32>
    %436 = vector.extract_strided_slice %435 {offsets = [0, 0], sizes = [8, 128], strides = [1, 1]} : vector<8x512xf32> to vector<8x128xf32>
    %437 = math.tanh %436 : vector<8x128xf32>
    %cst_148 = arith.constant 5.000000e-01 : f32
    %438 = vector.broadcast %cst_148 : f32 to vector<8x128xf32>
    %439 = arith.mulf %438, %437 : vector<8x128xf32>
    %cst_149 = arith.constant 5.000000e-01 : f32
    %440 = vector.broadcast %cst_149 : f32 to vector<8x128xf32>
    %441 = arith.addf %439, %440 : vector<8x128xf32>
    %442 = vector.extract_strided_slice %435 {offsets = [0, 128], sizes = [8, 128], strides = [1, 1]} : vector<8x512xf32> to vector<8x128xf32>
    %443 = math.tanh %442 : vector<8x128xf32>
    %cst_150 = arith.constant 5.000000e-01 : f32
    %444 = vector.broadcast %cst_150 : f32 to vector<8x128xf32>
    %445 = arith.mulf %444, %443 : vector<8x128xf32>
    %cst_151 = arith.constant 5.000000e-01 : f32
    %446 = vector.broadcast %cst_151 : f32 to vector<8x128xf32>
    %447 = arith.addf %445, %446 : vector<8x128xf32>
    %448 = vector.extract_strided_slice %435 {offsets = [0, 256], sizes = [8, 128], strides = [1, 1]} : vector<8x512xf32> to vector<8x128xf32>
    %449 = math.tanh %448 : vector<8x128xf32>
    %450 = vector.extract_strided_slice %435 {offsets = [0, 384], sizes = [8, 128], strides = [1, 1]} : vector<8x512xf32> to vector<8x128xf32>
    %451 = math.tanh %450 : vector<8x128xf32>
    %cst_152 = arith.constant 5.000000e-01 : f32
    %452 = vector.broadcast %cst_152 : f32 to vector<8x128xf32>
    %453 = arith.mulf %452, %451 : vector<8x128xf32>
    %cst_153 = arith.constant 5.000000e-01 : f32
    %454 = vector.broadcast %cst_153 : f32 to vector<8x128xf32>
    %455 = arith.addf %453, %454 : vector<8x128xf32>
    %456 = arith.mulf %447, %398 : vector<8x128xf32>
    %457 = arith.mulf %441, %449 : vector<8x128xf32>
    %458 = arith.addf %456, %457 : vector<8x128xf32>
    %459 = math.tanh %458 : vector<8x128xf32>
    %460 = arith.mulf %455, %459 : vector<8x128xf32>
    %461 = tpu.concatenate %460, %430 in 1 : vector<8x128xf32>, vector<8x128xf32> -> vector<8x256xf32>
    %462 = arith.truncf %461 : vector<8x256xf32> to vector<8x256xbf16>
    %c0_154 = arith.constant 0 : index
    %c0_155 = arith.constant 0 : index
    %463 = vector.load %arg4[%c0_154, %c0_155] : memref<256x512xbf16, #tpu.memory_space<vmem>>, vector<256x512xbf16>
    %cst_156 = arith.constant dense<0.000000e+00> : vector<8x512xf32>
    %464 = tpu.matmul %462, %463, %cst_156 {dimension_numbers = #tpu.dot_dimension_numbers<[1], [0], [0], [1], [0, 0, 1, 1], [], []>} : vector<8x256xbf16>, vector<256x512xbf16>, vector<8x512xf32> -> vector<8x512xf32>
    %465 = arith.addf %464, %9 : vector<8x512xf32>
    %466 = vector.extract_strided_slice %465 {offsets = [0, 0], sizes = [8, 128], strides = [1, 1]} : vector<8x512xf32> to vector<8x128xf32>
    %467 = math.tanh %466 : vector<8x128xf32>
    %cst_157 = arith.constant 5.000000e-01 : f32
    %468 = vector.broadcast %cst_157 : f32 to vector<8x128xf32>
    %469 = arith.mulf %468, %467 : vector<8x128xf32>
    %cst_158 = arith.constant 5.000000e-01 : f32
    %470 = vector.broadcast %cst_158 : f32 to vector<8x128xf32>
    %471 = arith.addf %469, %470 : vector<8x128xf32>
    %472 = vector.extract_strided_slice %465 {offsets = [0, 128], sizes = [8, 128], strides = [1, 1]} : vector<8x512xf32> to vector<8x128xf32>
    %473 = math.tanh %472 : vector<8x128xf32>
    %cst_159 = arith.constant 5.000000e-01 : f32
    %474 = vector.broadcast %cst_159 : f32 to vector<8x128xf32>
    %475 = arith.mulf %474, %473 : vector<8x128xf32>
    %cst_160 = arith.constant 5.000000e-01 : f32
    %476 = vector.broadcast %cst_160 : f32 to vector<8x128xf32>
    %477 = arith.addf %475, %476 : vector<8x128xf32>
    %478 = vector.extract_strided_slice %465 {offsets = [0, 256], sizes = [8, 128], strides = [1, 1]} : vector<8x512xf32> to vector<8x128xf32>
    %479 = math.tanh %478 : vector<8x128xf32>
    %480 = vector.extract_strided_slice %465 {offsets = [0, 384], sizes = [8, 128], strides = [1, 1]} : vector<8x512xf32> to vector<8x128xf32>
    %481 = math.tanh %480 : vector<8x128xf32>
    %cst_161 = arith.constant 5.000000e-01 : f32
    %482 = vector.broadcast %cst_161 : f32 to vector<8x128xf32>
    %483 = arith.mulf %482, %481 : vector<8x128xf32>
    %cst_162 = arith.constant 5.000000e-01 : f32
    %484 = vector.broadcast %cst_162 : f32 to vector<8x128xf32>
    %485 = arith.addf %483, %484 : vector<8x128xf32>
    %486 = arith.mulf %477, %428 : vector<8x128xf32>
    %487 = arith.mulf %471, %479 : vector<8x128xf32>
    %488 = arith.addf %486, %487 : vector<8x128xf32>
    %489 = math.tanh %488 : vector<8x128xf32>
    %490 = arith.mulf %485, %489 : vector<8x128xf32>
    %c0_163 = arith.constant 0 : index
    %c0_164 = arith.constant 0 : index
    %491 = vector.load %arg6[%c0_163, %c0_164] : memref<128x128xf32, #tpu.memory_space<vmem>>, vector<128x128xf32>
    %cst_165 = arith.constant dense<0.000000e+00> : vector<8x128xf32>
    %492 = tpu.matmul %490, %491, %cst_165 {dimension_numbers = #tpu.dot_dimension_numbers<[1], [0], [0], [1], [0, 0, 1, 1], [], []>} : vector<8x128xf32>, vector<128x128xf32>, vector<8x128xf32> -> vector<8x128xf32>
    %c0_166 = arith.constant 0 : index
    %c0_167 = arith.constant 0 : index
    %493 = vector.load %arg7[%c0_166, %c0_167] : memref<1x128xf32, #tpu.memory_space<vmem>>, vector<1x128xf32>
    %494 = vector.broadcast %493 : vector<1x128xf32> to vector<8x128xf32>
    %495 = arith.addf %492, %494 : vector<8x128xf32>
    %c0_168 = arith.constant 0 : index
    %c0_169 = arith.constant 0 : index
    %496 = vector.load %arg8[%c0_168, %c0_169] : memref<8x128xf32, #tpu.memory_space<vmem>>, vector<8x128xf32>
    tpu.vector_store %arg8[%c0_168, %c0_169], %495 {strides = array<i32>} : memref<8x128xf32, #tpu.memory_space<vmem>>, vector<8x128xf32>,
    return
  }
}

</mosaic_0001>

<bundles_post_ra>
// kernel: lstm_vehicle_tracker_forward.1
= control target key start
LH: loop header
LB: loop body
LE: loop exit
PB: predicated region body
PF: predicated region fallthrough
CT: control target
= control target key end

     0   :  { %13 = vsyncpa [#allocation4], 0  ;;  %s5079_s0 = inlined_call_operand.vmem [shape: f32[64,2], index: 0, kind: input, shape index: {}]   ;;  %s5080_s1 = inlined_call_operand.vmem [shape: f32[2,512], index: 1, kind: input, shape index: {}]   ;;  %s5081_s2 = inlined_call_operand.vmem [shape: f32[1,512], index: 2, kind: input, shape index: {}]   ;;  %s5082_s3 = inlined_call_operand.hbm [shape: bf16[128,512], index: 3, kind: input, shape index: {}]   ;;  %s5083_s4 = inlined_call_operand.hbm [shape: bf16[256,512], index: 4, kind: input, shape index: {}]   ;;  %s5084_s5 = inlined_call_operand.vmem [shape: f32[1,512], index: 5, kind: input, shape index: {}]   ;;  %s5085_s6 = inlined_call_operand.vmem [shape: f32[128,128], index: 6, kind: input, shape index: {}]   ;;  %s5086_s7 = inlined_call_operand.vmem [shape: f32[1,128], index: 7, kind: input, shape index: {}]   ;;  %s5087_s8 = inlined_call_operand.vmem [shape: f32[8,128], index: 8, kind: output, shape index: {}]  }
   0x1   :  { %14 = vsyncpa [#allocation6], 0  ;;  %s3476_s27 = smov [#allocation3]   ;;  %s3428_s9 = scalar_lea.hbm %s5082_s3, 4096 }
   0x2   :  { %s26_s28 = sshll.u32 %s3476_s27, 4  ;;  %p3429_p0 = scmp.ne.s32.totalorder %s5082_s3, %s3428_s9  ;;  %s27_s28 = int_to_ptr.vmem [resolvable:$true] %s26_s28 }
   0x3   :  { %p3432_p1 = scmp.lt.u32.totalorder %s3428_s9, %s5082_s3 }
   0x5   :  { %p3434_p2 = pnand %p3432_p1, %p3429_p0 }
   0x7   :  { %3437 = shalt.err (!%p3434_p2)
}
   0x8   :  { %s3438_s14 = scalar_lea.vmem %s27_s28, 4096  ;;  %p3443_p4 = scmp.lt.s32.totalorder %s27_s28, %s27_s28 }
   0x9   :  { %p3439_p3 = scmp.ne.s32.totalorder %s27_s28, %s3438_s14  ;;  %p3444_p5 = scmp.lt.s32.totalorder %s3438_s14, %s3438_s14 }
   0xb   :  { %p3445_p6 = por %p3444_p5, %p3443_p4 }
   0xd   :  { %p3446_p7 = pnand %p3445_p6, %p3439_p3 }
   0xf   :  { %3449 = shalt.err (!%p3446_p7)
}
  0x10   :  { %s3477_s15 = smov 256   ;;  %s3478_s16 = smov 16  }
  0x11   :  { %32 = dma.hbm_to_vmem [thread:$0]  %s5082_s3, 4096, %s27_s28, [#allocation4], %s3477_s15, %s3477_s15, %s3478_s16  }
  0x12   :  { %s3479_s19 = smov [#allocation5]   ;;  %s3450_s23 = scalar_lea.hbm %s5083_s4, 8192 }
  0x13   :  { %s38_s20 = sshll.u32 %s3479_s19, 4  ;;  %p3451_p8 = scmp.ne.s32.totalorder %s5083_s4, %s3450_s23  ;;  %s39_s20 = int_to_ptr.vmem [resolvable:$true] %s38_s20 }
  0x14   :  { %p3454_p9 = scmp.lt.u32.totalorder %s3450_s23, %s5083_s4 }
  0x16   :  { %p3456_p10 = pnand %p3454_p9, %p3451_p8 }
  0x18   :  { %3459 = shalt.err (!%p3456_p10)
}
  0x19   :  { %s3460_s29 = scalar_lea.vmem %s39_s20, 8192  ;;  %p3465_p12 = scmp.lt.s32.totalorder %s39_s20, %s39_s20 }
  0x1a   :  { %p3461_p11 = scmp.ne.s32.totalorder %s39_s20, %s3460_s29  ;;  %p3466_p13 = scmp.lt.s32.totalorder %s3460_s29, %s3460_s29 }
  0x1c   :  { %p3467_p0 = por %p3466_p13, %p3465_p12 }
  0x1e   :  { %p3468_p1 = pnand %p3467_p0, %p3461_p11 }
  0x20   :  { %3471 = shalt.err (!%p3468_p1)
}
  0x21   :  { %44 = dma.hbm_to_vmem [thread:$0]  %s5083_s4, 8192, %s39_s20, [#allocation6], %s3477_s15, %s3477_s15, %s3478_s16  }
  0x22   :  { %3472 = dma.done.wait [#allocation4], 4096  }
  0x23   :  { %3473 = vsyncadd [#allocation4], 4294963200 }
  0x24   :  { %3474 = dma.done.wait [#allocation6], 8192  }
  0x25   :  { %3475 = vsyncadd [#allocation6], 4294959104  ;;  %v69_v0 = vlaneseq  ;;  %v3480_v1 = vmov 1983009808   ;;  %v5088_v3 = vmov 0.0   ;;  %v66_v7 = vld [vmem:[%s5080_s1] sm:$0xff] }
  0x26   :  { %v92_v2 = vunpack.c.l.s4 %v3480_v1  ;;  %205 = vmatprep.mubr.f32.mxu0 %v5088_v3  ;;  %318 = vmatprep.mubr.f32.mxu1 %v5088_v3  ;;  %v90_v9 = vcombine.high %v66_v7, %v66_v7  ;;  %vm132_vm0 = vcmask 1041408   ;;  %v58_v12 = vld [vmem:[%s5079_s0] sm:$0xff]  ;;  %vm107_vm1 = vcmask 15360   ;;  %v3571_v16 = vld [vmem:[#allocation3 + $0xc] ss:$16 sps:$4 sm:$0xff]   ;;  %v60_v23 = vld [vmem:[%s5079_s0 + $0x10] sm:$0xff] }
  0x27   :  { %v3556_v4 = vshrl.u32 %v69_v0, 7  ;;  %v3565_v13 = vld [vmem:[#allocation3 + $0x4] ss:$16 sps:$4 sm:$0xff]   ;;  %v3568_v15 = vld [vmem:[#allocation3] ss:$16 sps:$4 sm:$0xff]   ;;  %v59_v18 = vld [vmem:[%s5079_s0 + $0x8] sm:$0xff] }
  0x28   :  { %v93_v5 = vunpack.c.0.s8 %v92_v2  ;;  %v3575_v17 = vld [vmem:[#allocation3 + $0x8] ss:$16 sps:$4 sm:$0xff]   ;;  %v3582_v19 = vld [vmem:[#allocation3 + $0x24] ss:$16 sps:$4 sm:$0xff]   ;;  %v3586_v20 = vld [vmem:[#allocation3 + $0x20] ss:$16 sps:$4 sm:$0xff]  }
  0x29   :  { %v3590_v21 = vld [vmem:[#allocation3 + $0x2c] ss:$16 sps:$4 sm:$0xff]   ;;  %v3594_v22 = vld [vmem:[#allocation3 + $0x28] ss:$16 sps:$4 sm:$0xff]   ;;  %v3601_v24 = vld [vmem:[#allocation3 + $0x44] ss:$16 sps:$4 sm:$0xff]  }
  0x2a   :  { %v96_v6 = vsub.s32 %v93_v5, %v3556_v4  ;;  %v3605_v25 = vld [vmem:[#allocation3 + $0x40] ss:$16 sps:$4 sm:$0xff]   ;;  %v3609_v26 = vld [vmem:[#allocation3 + $0x4c] ss:$16 sps:$4 sm:$0xff]   ;;  %v3613_v27 = vld [vmem:[#allocation3 + $0x48] ss:$16 sps:$4 sm:$0xff]  }
  0x2b   :  { %v61_v28 = vld [vmem:[%s5079_s0 + $0x18] sm:$0xff]  ;;  %v3620_v29 = vld [vmem:[#allocation3 + $0x64] ss:$16 sps:$4 sm:$0xff]   ;;  %v3624_v30 = vld [vmem:[#allocation3 + $0x60] ss:$16 sps:$4 sm:$0xff]   ;;  %v5089_v53 = vmov 0  }
  0x2c   :  { %v97_v8 = vrot.slane %v66_v7, %v96_v6  ;;  %v104_v11 = vrot.slane %v90_v9, %v96_v6  ;;  %v3628_v31 = vld [vmem:[#allocation3 + $0x6c] ss:$16 sps:$4 sm:$0xff]   ;;  %v3632_v32 = vld [vmem:[#allocation3 + $0x68] ss:$16 sps:$4 sm:$0xff]   ;;  %v62_v33 = vld [vmem:[%s5079_s0 + $0x20] sm:$0xff]  ;;  %vm3484_vm2 = vmmov 0  }
  0x2d   :  { %v3639_v34 = vld [vmem:[#allocation3 + $0x84] ss:$16 sps:$4 sm:$0xff]   ;;  %v3643_v35 = vld [vmem:[#allocation3 + $0x80] ss:$16 sps:$4 sm:$0xff]   ;;  %v3645_v36 = vld [vmem:[#allocation3 + $0x8c] ss:$16 sps:$4 sm:$0xff]  }
  0x2e   :  { %v105_v10 = vcombine.high %v97_v8, %v97_v8  ;;  %v106_v14 = vcombine.high %v104_v11, %v104_v11  ;;  %v3649_v37 = vld [vmem:[#allocation3 + $0x88] ss:$16 sps:$4 sm:$0xff]   ;;  %v3656_v39 = vld [vmem:[#allocation3 + $0xa4] ss:$16 sps:$4 sm:$0xff]   ;;  %v3660_v40 = vld [vmem:[#allocation3 + $0xa0] ss:$16 sps:$4 sm:$0xff]  }
  0x2f   :  { %v63_v38 = vld [vmem:[%s5079_s0 + $0x28] sm:$0xff]  ;;  %v64_v43 = vld [vmem:[%s5079_s0 + $0x30] sm:$0xff]  ;;  %v65_v48 = vld [vmem:[%s5079_s0 + $0x38] sm:$0xff] }
  0x30   :  { %2729 = vmatprep.subr.msk.mxu0 %vm132_vm0, %v105_v10  ;;  %2739 = vmatprep.subr.msk.mxu1 %vm132_vm0, %v106_v14  ;;  %v3662_v41 = vld [vmem:[#allocation3 + $0xac] ss:$16 sps:$4 sm:$0xff]   ;;  %v3666_v42 = vld [vmem:[#allocation3 + $0xa8] ss:$16 sps:$4 sm:$0xff]   ;;  %v3673_v44 = vld [vmem:[#allocation3 + $0xc4] ss:$16 sps:$4 sm:$0xff]  }
  0x31   :  { %2730 = vmatpush1.msk.msra.mxu0 %vm132_vm0, %v97_v8  ;;  %2740 = vmatpush1.msk.msra.mxu1 %vm132_vm0, %v104_v11  ;;  %v3677_v45 = vld [vmem:[#allocation3 + $0xc0] ss:$16 sps:$4 sm:$0xff]   ;;  %v3681_v46 = vld [vmem:[#allocation3 + $0xcc] ss:$16 sps:$4 sm:$0xff]   ;;  %v3685_v47 = vld [vmem:[#allocation3 + $0xc8] ss:$16 sps:$4 sm:$0xff]  }
  0x32   :  { %2731 = vmatmul.mubr.msk.f32.vlgmr.msra.gmra.mrb[0].mxu0 %vm107_vm1, %v58_v12  ;;  %617 = vmatprep.subr.bf16.mxu0 %v3565_v13  ;;  %v3692_v49 = vld [vmem:[#allocation3 + $0xe4] ss:$16 sps:$4 sm:$0xff]   ;;  %v3696_v50 = vld [vmem:[#allocation3 + $0xe0] ss:$16 sps:$4 sm:$0xff]   ;;  %v3700_v51 = vld [vmem:[#allocation3 + $0xec] ss:$16 sps:$4 sm:$0xff]  }
  0x33   :  { %618 = vmatpush1.bf16.msra.mxu0 %v3568_v15  ;;  %2741 = vmatmul.mubr.msk.f32.vlgmr.msra.gmra.mrb[0].mxu1 %vm107_vm1, %v58_v12  ;;  %v3704_v52 = vld [vmem:[#allocation3 + $0xe8] ss:$16 sps:$4 sm:$0xff]   ;;  %v3720_v54 = vld [vmem:[#allocation5 + $0x4] ss:$16 sps:$4 sm:$0xff]   ;;  %v3722_v55 = vld [vmem:[#allocation5 + $0xc] ss:$16 sps:$4 sm:$0xff]  }
  0x34   :  { %658 = vmatprep.subr.bf16.mxu1 %v3571_v16  ;;  %211 = vmatprep.mubr.f32.mxu0 %v5088_v3  ;;  %v3724_v56 = vld [vmem:[#allocation5] ss:$16 sps:$4 sm:$0xff]   ;;  %v3726_v57 = vld [vmem:[#allocation5 + $0x8] ss:$16 sps:$4 sm:$0xff]   ;;  %v3732_v58 = vld [vmem:[#allocation5 + $0x24] ss:$16 sps:$4 sm:$0xff]  }
  0x35   :  { %659 = vmatpush1.bf16.msra.mxu1 %v3575_v17  ;;  %619 = vmatprep.subr.bf16.mxu0 %v3582_v19  ;;  %v3734_v59 = vld [vmem:[#allocation5 + $0x2c] ss:$16 sps:$4 sm:$0xff]   ;;  %v3736_v60 = vld [vmem:[#allocation5 + $0x20] ss:$16 sps:$4 sm:$0xff]   ;;  %v3738_v61 = vld [vmem:[#allocation5 + $0x28] ss:$16 sps:$4 sm:$0xff]  }
  0x36   :  { %2732 = vmatmul.mubr.msk.f32.gmra.mrb[2].mxu0 %vm107_vm1, %v59_v18  ;;  %324 = vmatprep.mubr.f32.mxu1 %v5088_v3  ;;  %v3744_v62 = vld [vmem:[#allocation5 + $0x44] ss:$16 sps:$4 sm:$0xff]   ;;  %v3746_v63 = vld [vmem:[#allocation5 + $0x4c] ss:$16 sps:$4 sm:$0xff]   ;;  %v3748_v0 = vld [vmem:[#allocation5 + $0x40] ss:$16 sps:$4 sm:$0xff]  }
  0x37   :  { %620 = vmatpush1.bf16.msra.mxu0 %v3586_v20  ;;  %2742 = vmatmul.mubr.msk.f32.gmra.mrb[2].mxu1 %vm107_vm1, %v59_v18  ;;  %5361 = vst [vmem:[#allocation9_spill] sm:$0xff] %v3748_v0  ;;  %v3750_v1 = vld [vmem:[#allocation5 + $0x48] ss:$16 sps:$4 sm:$0xff]   ;;  %v3756_v2 = vld [vmem:[#allocation5 + $0x64] ss:$16 sps:$4 sm:$0xff]  }
  0x38   :  { %660 = vmatprep.subr.bf16.mxu1 %v3590_v21  ;;  %217 = vmatprep.mubr.f32.mxu0 %v5088_v3  ;;  %5362 = vst [vmem:[#allocation10_spill] sm:$0xff] %v3750_v1  ;;  %5363 = vst [vmem:[#allocation11_spill] sm:$0xff] %v3756_v2  ;;  %v3758_v5 = vld [vmem:[#allocation5 + $0x6c] ss:$16 sps:$4 sm:$0xff]   ;;  %v3760_v6 = vld [vmem:[#allocation5 + $0x60] ss:$16 sps:$4 sm:$0xff]  }
  0x39   :  { %661 = vmatpush1.bf16.msra.mxu1 %v3594_v22  ;;  %621 = vmatprep.subr.bf16.mxu0 %v3601_v24  ;;  %5364 = vst [vmem:[#allocation12_spill] sm:$0xff] %v3758_v5  ;;  %5365 = vst [vmem:[#allocation13_spill] sm:$0xff] %v3760_v6  ;;  %v3762_v7 = vld [vmem:[#allocation5 + $0x68] ss:$16 sps:$4 sm:$0xff]   ;;  %v3768_v8 = vld [vmem:[#allocation5 + $0x84] ss:$16 sps:$4 sm:$0xff]  }
  0x3a   :  { %2733 = vmatmul.mubr.msk.f32.gmra.mrb[4].mxu0 %vm107_vm1, %v60_v23  ;;  %330 = vmatprep.mubr.f32.mxu1 %v5088_v3  ;;  %5366 = vst [vmem:[#allocation14_spill] sm:$0xff] %v3762_v7  ;;  %5367 = vst [vmem:[#allocation15_spill] sm:$0xff] %v3768_v8  ;;  %v3770_v9 = vld [vmem:[#allocation5 + $0x8c] ss:$16 sps:$4 sm:$0xff]   ;;  %v3772_v10 = vld [vmem:[#allocation5 + $0x80] ss:$16 sps:$4 sm:$0xff]  }
  0x3b   :  { %622 = vmatpush1.bf16.msra.mxu0 %v3605_v25  ;;  %2743 = vmatmul.mubr.msk.f32.gmra.mrb[4].mxu1 %vm107_vm1, %v60_v23  ;;  %5368 = vst [vmem:[#allocation16_spill] sm:$0xff] %v3770_v9  ;;  %5369 = vst [vmem:[#allocation17_spill] sm:$0xff] %v3772_v10  ;;  %v3774_v11 = vld [vmem:[#allocation5 + $0x88] ss:$16 sps:$4 sm:$0xff]   ;;  %v3780_v12 = vld [vmem:[#allocation5 + $0xa4] ss:$16 sps:$4 sm:$0xff]  }
  0x3c   :  { %662 = vmatprep.subr.bf16.mxu1 %v3609_v26  ;;  %223 = vmatprep.mubr.f32.mxu0 %v5088_v3  ;;  %5370 = vst [vmem:[#allocation18_spill] sm:$0xff] %v3774_v11  ;;  %5371 = vst [vmem:[#allocation19_spill] sm:$0xff] %v3780_v12  ;;  %v3782_v14 = vld [vmem:[#allocation5 + $0xac] ss:$16 sps:$4 sm:$0xff]   ;;  %v3784_v18 = vld [vmem:[#allocation5 + $0xa0] ss:$16 sps:$4 sm:$0xff]  }
  0x3d   :  { %663 = vmatpush1.bf16.msra.mxu1 %v3613_v27  ;;  %623 = vmatprep.subr.bf16.mxu0 %v3620_v29  ;;  %5372 = vst [vmem:[#allocation20_spill] sm:$0xff] %v3782_v14  ;;  %5373 = vst [vmem:[#allocation21_spill] sm:$0xff] %v3784_v18  ;;  %v3786_v23 = vld [vmem:[#allocation5 + $0xa8] ss:$16 sps:$4 sm:$0xff]  }
  0x3e   :  { %2734 = vmatmul.mubr.msk.f32.gmra.mrb[6].mxu0 %vm107_vm1, %v61_v28  ;;  %336 = vmatprep.mubr.f32.mxu1 %v5088_v3  ;;  %5374 = vst [vmem:[#allocation22_spill] sm:$0xff] %v3786_v23 }
  0x3f   :  { %624 = vmatpush1.bf16.msra.mxu0 %v3624_v30  ;;  %2744 = vmatmul.mubr.msk.f32.gmra.mrb[6].mxu1 %vm107_vm1, %v61_v28  ;;  %v3792_v28 = vld [vmem:[#allocation5 + $0xc4] ss:$16 sps:$4 sm:$0xff]  }
  0x40   :  { %664 = vmatprep.subr.bf16.mxu1 %v3628_v31  ;;  %229 = vmatprep.mubr.f32.mxu0 %v5088_v3  ;;  %5375 = vst [vmem:[#allocation23_spill] sm:$0xff] %v3792_v28 }
  0x41   :  { %665 = vmatpush1.bf16.msra.mxu1 %v3632_v32  ;;  %625 = vmatprep.subr.bf16.mxu0 %v3639_v34 }
  0x42   :  { %2735 = vmatmul.mubr.msk.f32.gmra.mrb[8].mxu0 %vm107_vm1, %v62_v33  ;;  %342 = vmatprep.mubr.f32.mxu1 %v5088_v3 }
  0x43   :  { %626 = vmatpush1.bf16.msra.mxu0 %v3643_v35  ;;  %2745 = vmatmul.mubr.msk.f32.gmra.mrb[8].mxu1 %vm107_vm1, %v62_v33  ;;  %v3794_v33 = vld [vmem:[#allocation5 + $0xcc] ss:$16 sps:$4 sm:$0xff]  }
  0x44   :  { %666 = vmatprep.subr.bf16.mxu1 %v3645_v36  ;;  %235 = vmatprep.mubr.f32.mxu0 %v5088_v3  ;;  %5376 = vst [vmem:[#allocation24_spill] sm:$0xff] %v3794_v33 }
  0x45   :  { %667 = vmatpush1.bf16.msra.mxu1 %v3649_v37  ;;  %627 = vmatprep.subr.bf16.mxu0 %v3656_v39 }
  0x46   :  { %2736 = vmatmul.mubr.msk.f32.gmra.mrb[10].mxu0 %vm107_vm1, %v63_v38  ;;  %348 = vmatprep.mubr.f32.mxu1 %v5088_v3 }
  0x47   :  { %628 = vmatpush1.bf16.msra.mxu0 %v3660_v40  ;;  %2746 = vmatmul.mubr.msk.f32.gmra.mrb[10].mxu1 %vm107_vm1, %v63_v38  ;;  %v3796_v38 = vld [vmem:[#allocation5 + $0xc0] ss:$16 sps:$4 sm:$0xff]  }
  0x48   :  { %668 = vmatprep.subr.bf16.mxu1 %v3662_v41  ;;  %241 = vmatprep.mubr.f32.mxu0 %v5088_v3  ;;  %5377 = vst [vmem:[#allocation25_spill] sm:$0xff] %v3796_v38 }
  0x49   :  { %669 = vmatpush1.bf16.msra.mxu1 %v3666_v42  ;;  %629 = vmatprep.subr.bf16.mxu0 %v3673_v44 }
  0x4a   :  { %2737 = vmatmul.mubr.msk.f32.gmra.mrb[12].mxu0 %vm107_vm1, %v64_v43  ;;  %354 = vmatprep.mubr.f32.mxu1 %v5088_v3 }
  0x4b   :  { %630 = vmatpush1.bf16.msra.mxu0 %v3677_v45  ;;  %2747 = vmatmul.mubr.msk.f32.gmra.mrb[12].mxu1 %vm107_vm1, %v64_v43  ;;  %v3798_v43 = vld [vmem:[#allocation5 + $0xc8] ss:$16 sps:$4 sm:$0xff]  }
  0x4c   :  { %670 = vmatprep.subr.bf16.mxu1 %v3681_v46  ;;  %247 = vmatprep.mubr.f32.mxu0 %v5088_v3  ;;  %5378 = vst [vmem:[#allocation26_spill] sm:$0xff] %v3798_v43 }
  0x4d   :  { %671 = vmatpush1.bf16.msra.mxu1 %v3685_v47  ;;  %631 = vmatprep.subr.bf16.mxu0 %v3692_v49 }
  0x4e   :  { %2738 = vmatmul.mubr.msk.f32.gmra.mrb[14].mxu0 %vm107_vm1, %v65_v48  ;;  %360 = vmatprep.mubr.f32.mxu1 %v5088_v3  ;;  %v3806_v3 = vld [vmem:[#allocation5 + $0xec] ss:$16 sps:$4 sm:$0xff]  }
  0x4f   :  { %632 = vmatpush1.bf16.msra.mxu0 %v3696_v50  ;;  %2748 = vmatmul.mubr.msk.f32.gmra.mrb[14].mxu1 %vm107_vm1, %v65_v48  ;;  %v3804_v48 = vld [vmem:[#allocation5 + $0xe4] ss:$16 sps:$4 sm:$0xff]   ;;  %5380 = vst [vmem:[#allocation28_spill] sm:$0xff] %v3806_v3 }
  0x50   :  { %672 = vmatprep.subr.bf16.mxu1 %v3700_v51  ;;  %649 = vmatprep.mubr.bf16.mxu0 %v5089_v53  ;;  %5379 = vst [vmem:[#allocation27_spill] sm:$0xff] %v3804_v48 }
  0x51   :  { %673 = vmatpush1.bf16.msra.mxu1 %v3704_v52  ;;  %690 = vmatprep.mubr.bf16.mxu1 %v5089_v53 }
  0x52   :  { %650 = vmatmul.mubr.bf16.vlgmr.msra.gmra.mrb[16].mxu0 %v5089_v53  ;;  %1104 = vmatprep.subr.bf16.mxu0 %v3720_v54 }
  0x53   :  { %1145 = vmatprep.subr.bf16.mxu1 %v3722_v55  ;;  %1105 = vmatpush1.bf16.msra.mxu0 %v3724_v56 }
  0x54   :  { %691 = vmatmul.mubr.bf16.vlgmr.msra.gmra.mrb[16].mxu1 %v5089_v53  ;;  %1106 = vmatprep.subr.bf16.mxu0 %v3732_v58  ;;  %v3808_v53 = vld [vmem:[#allocation5 + $0xe0] ss:$16 sps:$4 sm:$0xff]  }
  0x55   :  { %1146 = vmatpush1.bf16.msra.mxu1 %v3726_v57  ;;  %5381 = vst [vmem:[#allocation29_spill] sm:$0xff] %v3808_v53 }
  0x56   :  { %1147 = vmatprep.subr.bf16.mxu1 %v3734_v59 }
  0x57   :  { %1107 = vmatpush1.bf16.msra.mxu0 %v3736_v60 }
  0x58   :  { %1108 = vmatprep.subr.bf16.mxu0 %v3744_v62 }
  0x59   :  { %1148 = vmatpush1.bf16.msra.mxu1 %v3738_v61 }
  0x5a   :  { %1149 = vmatprep.subr.bf16.mxu1 %v3746_v63 }
  0x5b   :  { %1109 = vmatpush1.bf16.msra.mxu0 %v3748_v0 }
  0x5c   :  { %1110 = vmatprep.subr.bf16.mxu0 %v3756_v2 }
  0x5d   :  { %1150 = vmatpush1.bf16.msra.mxu1 %v3750_v1 }
  0x5e   :  { %1151 = vmatprep.subr.bf16.mxu1 %v3758_v5 }
  0x5f   :  { %1111 = vmatpush1.bf16.msra.mxu0 %v3760_v6 }
  0x60   :  { %1112 = vmatprep.subr.bf16.mxu0 %v3768_v8 }
  0x61   :  { %1152 = vmatpush1.bf16.msra.mxu1 %v3762_v7 }
  0x62   :  { %1153 = vmatprep.subr.bf16.mxu1 %v3770_v9 }
  0x63   :  { %1113 = vmatpush1.bf16.msra.mxu0 %v3772_v10 }
  0x64   :  { %1114 = vmatprep.subr.bf16.mxu0 %v3780_v12 }
  0x65   :  { %1154 = vmatpush1.bf16.msra.mxu1 %v3774_v11 }
  0x66   :  { %1155 = vmatprep.subr.bf16.mxu1 %v3782_v14 }
  0x67   :  { %1115 = vmatpush1.bf16.msra.mxu0 %v3784_v18 }
  0x68   :  { %1116 = vmatprep.subr.bf16.mxu0 %v3792_v28  ;;  %v3822_v28 = vld [vmem:[#allocation5 + $0x108] ss:$16 sps:$4 sm:$0xff]  }
  0x69   :  { %1156 = vmatpush1.bf16.msra.mxu1 %v3786_v23  ;;  %v3810_v23 = vld [vmem:[#allocation5 + $0xe8] ss:$16 sps:$4 sm:$0xff]   ;;  %5386 = vst [vmem:[#allocation34_spill] sm:$0xff] %v3822_v28 }
  0x6a   :  { %1157 = vmatprep.subr.bf16.mxu1 %v3794_v33  ;;  %5382 = vst [vmem:[#allocation30_spill] sm:$0xff] %v3810_v23  ;;  %v3816_v33 = vld [vmem:[#allocation5 + $0x104] ss:$16 sps:$4 sm:$0xff]  }
  0x6b   :  { %1117 = vmatpush1.bf16.msra.mxu0 %v3796_v38  ;;  %5383 = vst [vmem:[#allocation31_spill] sm:$0xff] %v3816_v33  ;;  %v3818_v38 = vld [vmem:[#allocation5 + $0x10c] ss:$16 sps:$4 sm:$0xff]  }
  0x6c   :  { %1118 = vmatprep.subr.bf16.mxu0 %v3804_v48  ;;  %5384 = vst [vmem:[#allocation32_spill] sm:$0xff] %v3818_v38  ;;  %v3834_v48 = vld [vmem:[#allocation5 + $0x128] ss:$16 sps:$4 sm:$0xff]  }
  0x6d   :  { %1158 = vmatpush1.bf16.msra.mxu1 %v3798_v43  ;;  %v3820_v43 = vld [vmem:[#allocation5 + $0x100] ss:$16 sps:$4 sm:$0xff]   ;;  %5390 = vst [vmem:[#allocation38_spill] sm:$0xff] %v3834_v48 }
  0x6e   :  { %1159 = vmatprep.subr.bf16.mxu1 %v3806_v3  ;;  %5385 = vst [vmem:[#allocation33_spill] sm:$0xff] %v3820_v43  ;;  %v3828_v3 = vld [vmem:[#allocation5 + $0x124] ss:$16 sps:$4 sm:$0xff]  }
  0x6f   :  { %1119 = vmatpush1.bf16.msra.mxu0 %v3808_v53  ;;  %5387 = vst [vmem:[#allocation35_spill] sm:$0xff] %v3828_v3  ;;  %v3830_v53 = vld [vmem:[#allocation5 + $0x12c] ss:$16 sps:$4 sm:$0xff]  }
  0x70   :  { %1120 = vmatprep.subr.bf16.mxu0 %v3816_v33  ;;  %5388 = vst [vmem:[#allocation36_spill] sm:$0xff] %v3830_v53  ;;  %v3846_v33 = vld [vmem:[#allocation5 + $0x148] ss:$16 sps:$4 sm:$0xff]  }
  0x71   :  { %1160 = vmatpush1.bf16.msra.mxu1 %v3810_v23  ;;  %v3832_v23 = vld [vmem:[#allocation5 + $0x120] ss:$16 sps:$4 sm:$0xff]   ;;  %5394 = vst [vmem:[#allocation42_spill] sm:$0xff] %v3846_v33 }
  0x72   :  { %1161 = vmatprep.subr.bf16.mxu1 %v3818_v38  ;;  %5389 = vst [vmem:[#allocation37_spill] sm:$0xff] %v3832_v23  ;;  %v3840_v38 = vld [vmem:[#allocation5 + $0x144] ss:$16 sps:$4 sm:$0xff]  }
  0x73   :  { %1121 = vmatpush1.bf16.msra.mxu0 %v3820_v43  ;;  %5391 = vst [vmem:[#allocation39_spill] sm:$0xff] %v3840_v38  ;;  %v3842_v43 = vld [vmem:[#allocation5 + $0x14c] ss:$16 sps:$4 sm:$0xff]  }
  0x74   :  { %1122 = vmatprep.subr.bf16.mxu0 %v3828_v3  ;;  %5392 = vst [vmem:[#allocation40_spill] sm:$0xff] %v3842_v43  ;;  %v3858_v3 = vld [vmem:[#allocation5 + $0x168] ss:$16 sps:$4 sm:$0xff]  }
  0x75   :  { %1162 = vmatpush1.bf16.msra.mxu1 %v3822_v28  ;;  %v3844_v28 = vld [vmem:[#allocation5 + $0x140] ss:$16 sps:$4 sm:$0xff]   ;;  %5398 = vst [vmem:[#allocation46_spill] sm:$0xff] %v3858_v3 }
  0x76   :  { %1163 = vmatprep.subr.bf16.mxu1 %v3830_v53  ;;  %5393 = vst [vmem:[#allocation41_spill] sm:$0xff] %v3844_v28  ;;  %v3852_v53 = vld [vmem:[#allocation5 + $0x164] ss:$16 sps:$4 sm:$0xff]  }
  0x77   :  { %1123 = vmatpush1.bf16.msra.mxu0 %v3832_v23  ;;  %5395 = vst [vmem:[#allocation43_spill] sm:$0xff] %v3852_v53  ;;  %v3854_v23 = vld [vmem:[#allocation5 + $0x16c] ss:$16 sps:$4 sm:$0xff]  }
  0x78   :  { %1124 = vmatprep.subr.bf16.mxu0 %v3840_v38  ;;  %5396 = vst [vmem:[#allocation44_spill] sm:$0xff] %v3854_v23  ;;  %v3870_v38 = vld [vmem:[#allocation5 + $0x188] ss:$16 sps:$4 sm:$0xff]  }
  0x79   :  { %1164 = vmatpush1.bf16.msra.mxu1 %v3834_v48  ;;  %v3856_v48 = vld [vmem:[#allocation5 + $0x160] ss:$16 sps:$4 sm:$0xff]   ;;  %5402 = vst [vmem:[#allocation50_spill] sm:$0xff] %v3870_v38 }
  0x7a   :  { %1165 = vmatprep.subr.bf16.mxu1 %v3842_v43  ;;  %5397 = vst [vmem:[#allocation45_spill] sm:$0xff] %v3856_v48  ;;  %v3864_v43 = vld [vmem:[#allocation5 + $0x184] ss:$16 sps:$4 sm:$0xff]  }
  0x7b   :  { %1125 = vmatpush1.bf16.msra.mxu0 %v3844_v28  ;;  %5399 = vst [vmem:[#allocation47_spill] sm:$0xff] %v3864_v43  ;;  %v3866_v28 = vld [vmem:[#allocation5 + $0x18c] ss:$16 sps:$4 sm:$0xff]  }
  0x7c   :  { %1126 = vmatprep.subr.bf16.mxu0 %v3852_v53  ;;  %5400 = vst [vmem:[#allocation48_spill] sm:$0xff] %v3866_v28  ;;  %v3882_v53 = vld [vmem:[#allocation5 + $0x1a8] ss:$16 sps:$4 sm:$0xff]  }
  0x7d   :  { %1166 = vmatpush1.bf16.msra.mxu1 %v3846_v33  ;;  %v3868_v33 = vld [vmem:[#allocation5 + $0x180] ss:$16 sps:$4 sm:$0xff]   ;;  %5406 = vst [vmem:[#allocation54_spill] sm:$0xff] %v3882_v53 }
  0x7e   :  { %1167 = vmatprep.subr.bf16.mxu1 %v3854_v23  ;;  %5401 = vst [vmem:[#allocation49_spill] sm:$0xff] %v3868_v33  ;;  %v3876_v23 = vld [vmem:[#allocation5 + $0x1a4] ss:$16 sps:$4 sm:$0xff]  }
  0x7f   :  { %1127 = vmatpush1.bf16.msra.mxu0 %v3856_v48  ;;  %5403 = vst [vmem:[#allocation51_spill] sm:$0xff] %v3876_v23  ;;  %v3878_v48 = vld [vmem:[#allocation5 + $0x1ac] ss:$16 sps:$4 sm:$0xff]  }
  0x80   :  { %1128 = vmatprep.subr.bf16.mxu0 %v3864_v43  ;;  %5404 = vst [vmem:[#allocation52_spill] sm:$0xff] %v3878_v48  ;;  %v3894_v43 = vld [vmem:[#allocation5 + $0x1c8] ss:$16 sps:$4 sm:$0xff]  }
  0x81   :  { %1168 = vmatpush1.bf16.msra.mxu1 %v3858_v3  ;;  %v3880_v3 = vld [vmem:[#allocation5 + $0x1a0] ss:$16 sps:$4 sm:$0xff]   ;;  %5410 = vst [vmem:[#allocation58_spill] sm:$0xff] %v3894_v43 }
  0x82   :  { %1169 = vmatprep.subr.bf16.mxu1 %v3866_v28  ;;  %5405 = vst [vmem:[#allocation53_spill] sm:$0xff] %v3880_v3  ;;  %v3888_v28 = vld [vmem:[#allocation5 + $0x1c4] ss:$16 sps:$4 sm:$0xff]  }
  0x83   :  { %1129 = vmatpush1.bf16.msra.mxu0 %v3868_v33  ;;  %5407 = vst [vmem:[#allocation55_spill] sm:$0xff] %v3888_v28  ;;  %v3890_v33 = vld [vmem:[#allocation5 + $0x1cc] ss:$16 sps:$4 sm:$0xff]  }
  0x84   :  { %1130 = vmatprep.subr.bf16.mxu0 %v3876_v23  ;;  %5408 = vst [vmem:[#allocation56_spill] sm:$0xff] %v3890_v33  ;;  %v3906_v23 = vld [vmem:[#allocation5 + $0x1e8] ss:$16 sps:$4 sm:$0xff]  }
  0x85   :  { %1170 = vmatpush1.bf16.msra.mxu1 %v3870_v38  ;;  %v3892_v38 = vld [vmem:[#allocation5 + $0x1c0] ss:$16 sps:$4 sm:$0xff]   ;;  %5414 = vst [vmem:[#allocation62_spill] sm:$0xff] %v3906_v23 }
  0x86   :  { %1171 = vmatprep.subr.bf16.mxu1 %v3878_v48  ;;  %5409 = vst [vmem:[#allocation57_spill] sm:$0xff] %v3892_v38  ;;  %v3900_v48 = vld [vmem:[#allocation5 + $0x1e4] ss:$16 sps:$4 sm:$0xff]  }
  0x87   :  { %1131 = vmatpush1.bf16.msra.mxu0 %v3880_v3  ;;  %5411 = vst [vmem:[#allocation59_spill] sm:$0xff] %v3900_v48  ;;  %v3902_v3 = vld [vmem:[#allocation5 + $0x1ec] ss:$16 sps:$4 sm:$0xff]  }
  0x88   :  { %1132 = vmatprep.subr.bf16.mxu0 %v3888_v28  ;;  %5412 = vst [vmem:[#allocation60_spill] sm:$0xff] %v3902_v3 }
  0x89   :  { %1172 = vmatpush1.bf16.msra.mxu1 %v3882_v53  ;;  %v3904_v53 = vld [vmem:[#allocation5 + $0x1e0] ss:$16 sps:$4 sm:$0xff]  }
  0x8a   :  { %1173 = vmatprep.subr.bf16.mxu1 %v3890_v33  ;;  %5413 = vst [vmem:[#allocation61_spill] sm:$0xff] %v3904_v53  ;;  %v5204_v33 = vsub.s32 3, %v3556_v4 }
  0x8b   :  { %1133 = vmatpush1.bf16.msra.mxu0 %v3892_v38  ;;  %v5193_v38 = vsub.s32 0, %v3556_v4 }
  0x8c   :  { %1134 = vmatprep.subr.bf16.mxu0 %v3900_v48  ;;  %v67_v48 = vld [vmem:[%s5081_s2] sm:$0xf] }
  0x8d   :  { %1174 = vmatpush1.bf16.msra.mxu1 %v3894_v43  ;;  %v5171_v43 = vmov 0.0|0.0   ;;  %v84_v8 = vrot.slane %v67_v48, %v5204_v33 }
  0x8e   :  { %1175 = vmatprep.subr.bf16.mxu1 %v3902_v3  ;;  %1136 = vmatprep.mubr.bf16.mxu0 %v5171_v43 }
  0x8f   :  { %1135 = vmatpush1.bf16.msra.mxu0 %v3904_v53  ;;  %1177 = vmatprep.mubr.bf16.mxu1 %v5171_v43  ;;  %v5198_v53 = vsub.s32 1, %v3556_v4  ;;  %v72_v43 = vrot.slane %v67_v48, %v5193_v38 }
  0x90   :  { %1205 = vmatprep.subr.bf16.mxu0 %v3565_v13  ;;  %v5203_v13 = vsub.s32 2, %v3556_v4 }
  0x91   :  { %1176 = vmatpush1.bf16.msra.mxu1 %v3906_v23  ;;  %v76_v18 = vrot.slane %v67_v48, %v5198_v53 }
  0x92   :  { %1246 = vmatprep.subr.bf16.mxu1 %v3571_v16  ;;  %v80_v10 = vrot.slane %v67_v48, %v5203_v13 }
 0x105   :  { %v3920_v3 = vpop.f32.mrb[0].mxu0 }
 0x106   :  { %v3923_v23 = vpop.f32.mrb[1].mxu0  ;;  %v3926_v16 = vpop.f32.mrb[0].mxu1 }
 0x107   :  { %v3931_v28 = vpop.f32.mrb[1].mxu1 }
 0x109   :  { %v213_v14 = vpop.f32.mrb[2].mxu0 }
 0x10a   :  { %v3935_v12 = vadd.f32 %v213_v14, %v72_v43  ;;  %v215_v11 = vpop.f32.mrb[3].mxu0  ;;  %v326_v7 = vpop.f32.mrb[2].mxu1 }
 0x10b   :  { %v3939_v9 = vadd.f32 %v215_v11, %v76_v18  ;;  %v3943_v6 = vadd.f32 %v326_v7, %v80_v10  ;;  %v328_v38 = vpop.f32.mrb[3].mxu1 }
 0x10c   :  { %5415 = vst [vmem:[#allocation63_spill] sm:$0xff] %v3935_v12  ;;  %v3945_v2 = vadd.f32 %v328_v38, %v84_v8 }
 0x10d   :  { %5416 = vst [vmem:[#allocation64_spill] sm:$0xff] %v3939_v9  ;;  %5417 = vst [vmem:[#allocation65_spill] sm:$0xff] %v3943_v6  ;;  %v219_v5 = vpop.f32.mrb[4].mxu0 }
 0x10e   :  { %5418 = vst [vmem:[#allocation66_spill] sm:$0xff] %v3945_v2  ;;  %v3947_v53 = vadd.f32 %v219_v5, %v72_v43  ;;  %v221_v14 = vpop.f32.mrb[5].mxu0  ;;  %v332_v1 = vpop.f32.mrb[4].mxu1 }
 0x10f   :  { %v3949_v12 = vadd.f32 %v221_v14, %v76_v18  ;;  %v3951_v0 = vadd.f32 %v332_v1, %v80_v10  ;;  %v334_v11 = vpop.f32.mrb[5].mxu1 }
 0x110   :  { %5419 = vst [vmem:[#allocation67_spill] sm:$0xff] %v3947_v53  ;;  %v3953_v9 = vadd.f32 %v334_v11, %v84_v8 }
 0x111   :  { %5420 = vst [vmem:[#allocation68_spill] sm:$0xff] %v3949_v12  ;;  %5421 = vst [vmem:[#allocation69_spill] sm:$0xff] %v3951_v0  ;;  %v225_v13 = vpop.f32.mrb[6].mxu0 }
 0x112   :  { %5422 = vst [vmem:[#allocation70_spill] sm:$0xff] %v3953_v9  ;;  %v3955_v48 = vadd.f32 %v225_v13, %v72_v43  ;;  %v227_v7 = vpop.f32.mrb[7].mxu0  ;;  %v338_v6 = vpop.f32.mrb[6].mxu1 }
 0x113   :  { %v3957_v33 = vadd.f32 %v227_v7, %v76_v18  ;;  %v3959_v38 = vadd.f32 %v338_v6, %v80_v10  ;;  %v340_v5 = vpop.f32.mrb[7].mxu1 }
 0x114   :  { %5423 = vst [vmem:[#allocation71_spill] sm:$0xff] %v3955_v48  ;;  %v3961_v2 = vadd.f32 %v340_v5, %v84_v8 }
 0x115   :  { %5424 = vst [vmem:[#allocation72_spill] sm:$0xff] %v3957_v33  ;;  %5425 = vst [vmem:[#allocation73_spill] sm:$0xff] %v3959_v38  ;;  %v231_v53 = vpop.f32.mrb[8].mxu0 }
 0x116   :  { %5426 = vst [vmem:[#allocation74_spill] sm:$0xff] %v3961_v2  ;;  %v3963_v14 = vadd.f32 %v231_v53, %v72_v43  ;;  %v233_v1 = vpop.f32.mrb[9].mxu0  ;;  %v344_v0 = vpop.f32.mrb[8].mxu1 }
 0x117   :  { %v3965_v12 = vadd.f32 %v233_v1, %v76_v18  ;;  %v3967_v11 = vadd.f32 %v344_v0, %v80_v10  ;;  %v346_v13 = vpop.f32.mrb[9].mxu1 }
 0x118   :  { %5427 = vst [vmem:[#allocation75_spill] sm:$0xff] %v3963_v14  ;;  %v3969_v9 = vadd.f32 %v346_v13, %v84_v8 }
 0x119   :  { %5428 = vst [vmem:[#allocation76_spill] sm:$0xff] %v3965_v12  ;;  %5429 = vst [vmem:[#allocation77_spill] sm:$0xff] %v3967_v11  ;;  %v237_v48 = vpop.f32.mrb[10].mxu0 }
 0x11a   :  { %5430 = vst [vmem:[#allocation78_spill] sm:$0xff] %v3969_v9  ;;  %v3971_v7 = vadd.f32 %v237_v48, %v72_v43  ;;  %v239_v6 = vpop.f32.mrb[11].mxu0  ;;  %v350_v38 = vpop.f32.mrb[10].mxu1 }
 0x11b   :  { %v3973_v33 = vadd.f32 %v239_v6, %v76_v18  ;;  %v3975_v5 = vadd.f32 %v350_v38, %v80_v10  ;;  %v352_v53 = vpop.f32.mrb[11].mxu1 }
 0x11c   :  { %5431 = vst [vmem:[#allocation79_spill] sm:$0xff] %v3971_v7  ;;  %v3977_v2 = vadd.f32 %v352_v53, %v84_v8 }
 0x11d   :  { %5432 = vst [vmem:[#allocation80_spill] sm:$0xff] %v3973_v33  ;;  %5433 = vst [vmem:[#allocation81_spill] sm:$0xff] %v3975_v5  ;;  %v243_v14 = vpop.f32.mrb[12].mxu0 }
 0x11e   :  { %5434 = vst [vmem:[#allocation82_spill] sm:$0xff] %v3977_v2  ;;  %v3979_v1 = vadd.f32 %v243_v14, %v72_v43  ;;  %v245_v0 = vpop.f32.mrb[13].mxu0  ;;  %v356_v11 = vpop.f32.mrb[12].mxu1 }
 0x11f   :  { %v3981_v12 = vadd.f32 %v245_v0, %v76_v18  ;;  %v3983_v13 = vadd.f32 %v356_v11, %v80_v10  ;;  %v358_v48 = vpop.f32.mrb[13].mxu1  ;;  %v210_v11 = vadd.f32 %v3923_v23, %v76_v18 }
 0x120   :  { %5435 = vst [vmem:[#allocation83_spill] sm:$0xff] %v3979_v1  ;;  %v3985_v9 = vadd.f32 %v358_v48, %v84_v8  ;;  %v208_v1 = vadd.f32 %v3920_v3, %v72_v43 }
 0x121   :  { %5436 = vst [vmem:[#allocation84_spill] sm:$0xff] %v3981_v12  ;;  %5437 = vst [vmem:[#allocation85_spill] sm:$0xff] %v3983_v13  ;;  %v249_v7 = vpop.f32.mrb[14].mxu0  ;;  %v321_v13 = vadd.f32 %v3926_v16, %v80_v10 }
 0x122   :  { %5438 = vst [vmem:[#allocation86_spill] sm:$0xff] %v3985_v9  ;;  %v3987_v6 = vadd.f32 %v249_v7, %v72_v43  ;;  %v251_v38 = vpop.f32.mrb[15].mxu0  ;;  %v362_v5 = vpop.f32.mrb[14].mxu1  ;;  %v323_v7 = vadd.f32 %v3931_v28, %v84_v8 }
 0x123   :  { %v3989_v33 = vadd.f32 %v251_v38, %v76_v18  ;;  %v3991_v53 = vadd.f32 %v362_v5, %v80_v10  ;;  %v364_v14 = vpop.f32.mrb[15].mxu1 }
 0x124   :  { %5439 = vst [vmem:[#allocation87_spill] sm:$0xff] %v3987_v6  ;;  %v3994_v0 = vadd.f32 %v364_v14, %v84_v8 }
 0x125   :  { %5440 = vst [vmem:[#allocation88_spill] sm:$0xff] %v3989_v33  ;;  %5441 = vst [vmem:[#allocation89_spill] sm:$0xff] %v3991_v53  ;;  %v651_v12 = vpop.f32.mrb[16].mxu0 }
 0x126   :  { %5442 = vst [vmem:[#allocation90_spill] sm:$0xff] %v3994_v0  ;;  %v699_v48 = vadd.f32 %v651_v12, %v208_v1  ;;  %v653_v9 = vpop.f32.mrb[17].mxu0 }
 0x127   :  { %v700_v6 = vadd.f32 %v653_v9, %v210_v11  ;;  %v655_v38 = vpop.f32.mrb[18].mxu0  ;;  %v692_v33 = vpop.f32.mrb[16].mxu1 }
 0x128   :  { %3076 = vtanh.f32 %v699_v48  ;;  %v701_v5 = vadd.f32 %v692_v33, %v321_v13  ;;  %v656_v53 = vpop.f32.mrb[19].mxu0  ;;  %v694_v2 = vpop.f32.mrb[17].mxu1  ;;  %v5472_v48 = vld [vmem:[#allocation37_spill] sm:$0xff]  ;;  %v5474_v38 = vld [vmem:[#allocation39_spill] sm:$0xff] }
 0x129   :  { %3078 = vtanh.f32 %v700_v6  ;;  %v702_v3 = vadd.f32 %v694_v2, %v323_v7  ;;  %v696_v43 = vpop.f32.mrb[18].mxu1  ;;  %v5473_v7 = vld [vmem:[#allocation38_spill] sm:$0xff] }
 0x12a   :  { %v697_v14 = vpop.f32.mrb[19].mxu1  ;;  %3080 = vtanh.f32 %v701_v5  ;;  %v5475_v5 = vld [vmem:[#allocation40_spill] sm:$0xff]  ;;  %v5477_v43 = vld [vmem:[#allocation42_spill] sm:$0xff] }
 0x12b   :  { %3082 = vtanh.f32 %v702_v3  ;;  %v5476_v3 = vld [vmem:[#allocation41_spill] sm:$0xff]  ;;  %v5478_v14 = vld [vmem:[#allocation43_spill] sm:$0xff] }
 0x132   :  { %v3077_v18 = vpop.eup %3076 }
 0x133   :  { %v3079_v23 = vpop.eup %3078  ;;  %v704_v0 = vmul.f32 0.5, %v3077_v18  ;;  %v5479_v18 = vld [vmem:[#allocation44_spill] sm:$0xff] }
 0x134   :  { %v707_v10 = vmul.f32 0.5, %v3079_v23  ;;  %v3081_v16 = vpop.eup %3080  ;;  %v5480_v23 = vld [vmem:[#allocation45_spill] sm:$0xff] }
 0x135   :  { %v705_v12 = vadd.f32 0.5, %v704_v0  ;;  %v3083_v33 = vpop.eup %3082  ;;  %v5443_v0 = vmov 0  }
 0x136   :  { %v708_v8 = vadd.f32 0.5, %v707_v10  ;;  %v711_v13 = vmul.f32 0.5, %v3083_v33  ;;  %v5481_v10 = vld [vmem:[#allocation46_spill] sm:$0xff]  ;;  %v5487_v33 = vld [vmem:[#allocation52_spill] sm:$0xff] }
 0x137   :  { %v714_v9 = vmul.f32 %v3081_v16, %v705_v12  ;;  %v5482_v12 = vld [vmem:[#allocation47_spill] sm:$0xff]  ;;  %v5483_v16 = vld [vmem:[#allocation48_spill] sm:$0xff] }
 0x138   :  { %v713_v28 = vmul.f32 0.0, %v708_v8  ;;  %v712_v2 = vadd.f32 0.5, %v711_v13  ;;  %v5484_v8 = vld [vmem:[#allocation49_spill] sm:$0xff] }
 0x139   :  { %v5488_v13 = vld [vmem:[#allocation53_spill] sm:$0xff] }
 0x13a   :  { %v3999_v1 = vadd.f32 %v714_v9, %v713_v28  ;;  %v5485_v9 = vld [vmem:[#allocation50_spill] sm:$0xff]  ;;  %v5486_v28 = vld [vmem:[#allocation51_spill] sm:$0xff] }
 0x13c   :  { %3084 = vtanh.f32 %v3999_v1 }
 0x146   :  { %v3085_v6 = vpop.eup %3084 }
 0x147   :  { %v717_v53 = vmul.f32 %v3085_v6, %v712_v2  ;;  %v5489_v2 = vld [vmem:[#allocation54_spill] sm:$0xff]  ;;  %v5490_v6 = vld [vmem:[#allocation55_spill] sm:$0xff] }
 0x149   :  { %v718_v11 = vpack.c.bf16 %v717_v53, %v717_v53  ;;  %v5491_v53 = vld [vmem:[#allocation56_spill] sm:$0xff] }
 0x14b   :  { %1137 = vmatmul.mubr.bf16.vlgmr.msra.gmra.mrb[20].mxu0 %v718_v11  ;;  %1178 = vmatmul.mubr.bf16.vlgmr.msra.gmra.mrb[20].mxu1 %v718_v11 }
 0x14c   :  { %1206 = vmatpush1.bf16.msra.mxu0 %v3568_v15  ;;  %1247 = vmatpush1.bf16.msra.mxu1 %v3575_v17  ;;  %v5444_v15 = vld [vmem:[#allocation9_spill] sm:$0xff]  ;;  %v5445_v17 = vld [vmem:[#allocation10_spill] sm:$0xff] }
 0x14d   :  { %1207 = vmatprep.subr.bf16.mxu0 %v3582_v19  ;;  %1248 = vmatprep.subr.bf16.mxu1 %v3590_v21  ;;  %v5446_v19 = vld [vmem:[#allocation11_spill] sm:$0xff]  ;;  %v5448_v21 = vld [vmem:[#allocation13_spill] sm:$0xff] }
 0x14e   :  { %1237 = vmatprep.mubr.bf16.mxu0 %v5443_v0  ;;  %1278 = vmatprep.mubr.bf16.mxu1 %v5443_v0 }
 0x150   :  { %1208 = vmatpush1.bf16.msra.mxu0 %v3586_v20  ;;  %1249 = vmatpush1.bf16.msra.mxu1 %v3594_v22  ;;  %v5447_v20 = vld [vmem:[#allocation12_spill] sm:$0xff]  ;;  %v5449_v22 = vld [vmem:[#allocation14_spill] sm:$0xff] }
 0x151   :  { %1209 = vmatprep.subr.bf16.mxu0 %v3601_v24  ;;  %1250 = vmatprep.subr.bf16.mxu1 %v3609_v26  ;;  %v5450_v24 = vld [vmem:[#allocation15_spill] sm:$0xff]  ;;  %v5452_v26 = vld [vmem:[#allocation17_spill] sm:$0xff] }
 0x154   :  { %1210 = vmatpush1.bf16.msra.mxu0 %v3605_v25  ;;  %1251 = vmatpush1.bf16.msra.mxu1 %v3613_v27  ;;  %v5451_v25 = vld [vmem:[#allocation16_spill] sm:$0xff]  ;;  %v5453_v27 = vld [vmem:[#allocation18_spill] sm:$0xff] }
 0x155   :  { %1211 = vmatprep.subr.bf16.mxu0 %v3620_v29  ;;  %1252 = vmatprep.subr.bf16.mxu1 %v3628_v31  ;;  %v5454_v29 = vld [vmem:[#allocation19_spill] sm:$0xff]  ;;  %v5456_v31 = vld [vmem:[#allocation21_spill] sm:$0xff] }
 0x158   :  { %1212 = vmatpush1.bf16.msra.mxu0 %v3624_v30  ;;  %1253 = vmatpush1.bf16.msra.mxu1 %v3632_v32  ;;  %v5455_v30 = vld [vmem:[#allocation20_spill] sm:$0xff]  ;;  %v5457_v32 = vld [vmem:[#allocation22_spill] sm:$0xff] }
 0x159   :  { %1213 = vmatprep.subr.bf16.mxu0 %v3639_v34  ;;  %1254 = vmatprep.subr.bf16.mxu1 %v3645_v36  ;;  %v5458_v34 = vld [vmem:[#allocation23_spill] sm:$0xff]  ;;  %v5460_v36 = vld [vmem:[#allocation25_spill] sm:$0xff] }
 0x15c   :  { %1214 = vmatpush1.bf16.msra.mxu0 %v3643_v35  ;;  %1255 = vmatpush1.bf16.msra.mxu1 %v3649_v37  ;;  %v5459_v35 = vld [vmem:[#allocation24_spill] sm:$0xff]  ;;  %v5461_v37 = vld [vmem:[#allocation26_spill] sm:$0xff] }
 0x15d   :  { %1215 = vmatprep.subr.bf16.mxu0 %v3656_v39  ;;  %1256 = vmatprep.subr.bf16.mxu1 %v3662_v41  ;;  %v5462_v39 = vld [vmem:[#allocation27_spill] sm:$0xff]  ;;  %v5464_v41 = vld [vmem:[#allocation29_spill] sm:$0xff] }
 0x160   :  { %1216 = vmatpush1.bf16.msra.mxu0 %v3660_v40  ;;  %1257 = vmatpush1.bf16.msra.mxu1 %v3666_v42  ;;  %v5463_v40 = vld [vmem:[#allocation28_spill] sm:$0xff]  ;;  %v5465_v42 = vld [vmem:[#allocation30_spill] sm:$0xff] }
 0x161   :  { %1217 = vmatprep.subr.bf16.mxu0 %v3673_v44  ;;  %1258 = vmatprep.subr.bf16.mxu1 %v3681_v46  ;;  %v5466_v44 = vld [vmem:[#allocation31_spill] sm:$0xff]  ;;  %v5468_v46 = vld [vmem:[#allocation33_spill] sm:$0xff] }
 0x164   :  { %1218 = vmatpush1.bf16.msra.mxu0 %v3677_v45  ;;  %1259 = vmatpush1.bf16.msra.mxu1 %v3685_v47  ;;  %v5467_v45 = vld [vmem:[#allocation32_spill] sm:$0xff]  ;;  %v5469_v47 = vld [vmem:[#allocation34_spill] sm:$0xff] }
 0x165   :  { %1219 = vmatprep.subr.bf16.mxu0 %v3692_v49  ;;  %1260 = vmatprep.subr.bf16.mxu1 %v3700_v51  ;;  %v5470_v49 = vld [vmem:[#allocation35_spill] sm:$0xff] }
 0x168   :  { %1220 = vmatpush1.bf16.msra.mxu0 %v3696_v50  ;;  %1261 = vmatpush1.bf16.msra.mxu1 %v3704_v52  ;;  %v5471_v50 = vld [vmem:[#allocation36_spill] sm:$0xff] }
 0x169   :  { %1308 = vmatprep.subr.bf16.mxu0 %v3720_v54  ;;  %1349 = vmatprep.subr.bf16.mxu1 %v3722_v55 }
 0x16b   :  { %1238 = vmatmul.mubr.bf16.vlgmr.msra.gmra.mrb[24].mxu0 %v718_v11  ;;  %1279 = vmatmul.mubr.bf16.vlgmr.msra.gmra.mrb[24].mxu1 %v718_v11  ;;  %v5492_v11 = vld [vmem:[#allocation57_spill] sm:$0xff] }
 0x16c   :  { %1309 = vmatpush1.bf16.msra.mxu0 %v3724_v56  ;;  %1350 = vmatpush1.bf16.msra.mxu1 %v3726_v57 }
 0x16d   :  { %1310 = vmatprep.subr.bf16.mxu0 %v3732_v58  ;;  %1351 = vmatprep.subr.bf16.mxu1 %v3734_v59 }
 0x170   :  { %1311 = vmatpush1.bf16.msra.mxu0 %v3736_v60  ;;  %1352 = vmatpush1.bf16.msra.mxu1 %v3738_v61 }
 0x171   :  { %1312 = vmatprep.subr.bf16.mxu0 %v3744_v62  ;;  %1353 = vmatprep.subr.bf16.mxu1 %v3746_v63 }
 0x174   :  { %1313 = vmatpush1.bf16.msra.mxu0 %v5444_v15  ;;  %1354 = vmatpush1.bf16.msra.mxu1 %v5445_v17 }
 0x175   :  { %1314 = vmatprep.subr.bf16.mxu0 %v5446_v19  ;;  %1355 = vmatprep.subr.bf16.mxu1 %v5447_v20 }
 0x178   :  { %1315 = vmatpush1.bf16.msra.mxu0 %v5448_v21  ;;  %1356 = vmatpush1.bf16.msra.mxu1 %v5449_v22 }
 0x179   :  { %1316 = vmatprep.subr.bf16.mxu0 %v5450_v24  ;;  %1357 = vmatprep.subr.bf16.mxu1 %v5451_v25 }
 0x17c   :  { %1317 = vmatpush1.bf16.msra.mxu0 %v5452_v26  ;;  %1358 = vmatpush1.bf16.msra.mxu1 %v5453_v27 }
 0x17d   :  { %1318 = vmatprep.subr.bf16.mxu0 %v5454_v29  ;;  %1359 = vmatprep.subr.bf16.mxu1 %v5455_v30 }
 0x180   :  { %1319 = vmatpush1.bf16.msra.mxu0 %v5456_v31  ;;  %1360 = vmatpush1.bf16.msra.mxu1 %v5457_v32 }
 0x181   :  { %1320 = vmatprep.subr.bf16.mxu0 %v5458_v34  ;;  %1361 = vmatprep.subr.bf16.mxu1 %v5459_v35 }
 0x184   :  { %1321 = vmatpush1.bf16.msra.mxu0 %v5460_v36  ;;  %1362 = vmatpush1.bf16.msra.mxu1 %v5461_v37 }
 0x185   :  { %1322 = vmatprep.subr.bf16.mxu0 %v5462_v39  ;;  %1363 = vmatprep.subr.bf16.mxu1 %v5463_v40 }
 0x188   :  { %1323 = vmatpush1.bf16.msra.mxu0 %v5464_v41  ;;  %1364 = vmatpush1.bf16.msra.mxu1 %v5465_v42 }
 0x189   :  { %1324 = vmatprep.subr.bf16.mxu0 %v5466_v44  ;;  %1365 = vmatprep.subr.bf16.mxu1 %v5467_v45 }
 0x18c   :  { %1325 = vmatpush1.bf16.msra.mxu0 %v5468_v46  ;;  %1366 = vmatpush1.bf16.msra.mxu1 %v5469_v47 }
 0x18d   :  { %1326 = vmatprep.subr.bf16.mxu0 %v5470_v49  ;;  %1367 = vmatprep.subr.bf16.mxu1 %v5471_v50 }
 0x190   :  { %1327 = vmatpush1.bf16.msra.mxu0 %v5472_v48  ;;  %1368 = vmatpush1.bf16.msra.mxu1 %v5473_v7 }
 0x191   :  { %1328 = vmatprep.subr.bf16.mxu0 %v5474_v38  ;;  %1369 = vmatprep.subr.bf16.mxu1 %v5475_v5 }
 0x194   :  { %1329 = vmatpush1.bf16.msra.mxu0 %v5476_v3  ;;  %1370 = vmatpush1.bf16.msra.mxu1 %v5477_v43 }
 0x195   :  { %1330 = vmatprep.subr.bf16.mxu0 %v5478_v14  ;;  %1371 = vmatprep.subr.bf16.mxu1 %v5479_v18 }
 0x198   :  { %1331 = vmatpush1.bf16.msra.mxu0 %v5480_v23  ;;  %1372 = vmatpush1.bf16.msra.mxu1 %v5481_v10 }
 0x199   :  { %1332 = vmatprep.subr.bf16.mxu0 %v5482_v12  ;;  %1373 = vmatprep.subr.bf16.mxu1 %v5483_v16  ;;  %v5493_v12 = vld [vmem:[#allocation58_spill] sm:$0xff]  ;;  %v5494_v16 = vld [vmem:[#allocation59_spill] sm:$0xff] }
 0x19c   :  { %1333 = vmatpush1.bf16.msra.mxu0 %v5484_v8  ;;  %1374 = vmatpush1.bf16.msra.mxu1 %v5485_v9  ;;  %v5495_v8 = vld [vmem:[#allocation60_spill] sm:$0xff]  ;;  %v5496_v9 = vld [vmem:[#allocation61_spill] sm:$0xff] }
 0x19d   :  { %1334 = vmatprep.subr.bf16.mxu0 %v5486_v28  ;;  %1375 = vmatprep.subr.bf16.mxu1 %v5487_v33  ;;  %v5497_v28 = vld [vmem:[#allocation62_spill] sm:$0xff]  ;;  %v4098_v33 = vld [vmem:[#allocation3 + $0x4] ss:$16 sps:$4 sm:$0xff]  }
 0x19e   :  { %5498 = vst [vmem:[#allocation9_spill] sm:$0xff] %v4098_v33 }
 0x1a0   :  { %1335 = vmatpush1.bf16.msra.mxu0 %v5488_v13  ;;  %1376 = vmatpush1.bf16.msra.mxu1 %v5489_v2  ;;  %v4101_v2 = vld [vmem:[#allocation3 + $0xc] ss:$16 sps:$4 sm:$0xff]  }
 0x1a1   :  { %1336 = vmatprep.subr.bf16.mxu0 %v5490_v6  ;;  %1377 = vmatprep.subr.bf16.mxu1 %v5491_v53  ;;  %5499 = vst [vmem:[#allocation10_spill] sm:$0xff] %v4101_v2 }
 0x1a4   :  { %1337 = vmatpush1.bf16.msra.mxu0 %v5492_v11  ;;  %1378 = vmatpush1.bf16.msra.mxu1 %v5493_v12  ;;  %v399_v12 = vld [vmem:[%s5084_s5] sm:$0xf] }
 0x1a5   :  { %1338 = vmatprep.subr.bf16.mxu0 %v5494_v16  ;;  %1379 = vmatprep.subr.bf16.mxu1 %v5495_v8  ;;  %v5500_v16 = vsub.s32 0, %v3556_v4 }
 0x1a7   :  { %v4109_v11 = vrot.slane %v399_v12, %v5500_v16 }
 0x1a8   :  { %1339 = vmatpush1.bf16.msra.mxu0 %v5496_v9  ;;  %1380 = vmatpush1.bf16.msra.mxu1 %v5497_v28  ;;  %v5502_v9 = vsub.s32 1, %v3556_v4  ;;  %v5504_v28 = vsub.s32 2, %v3556_v4 }
 0x1a9   :  { %1409 = vmatprep.subr.bf16.mxu0 %v4098_v33  ;;  %1450 = vmatprep.subr.bf16.mxu1 %v4101_v2  ;;  %5501 = vst [vmem:[#allocation11_spill] sm:$0xff] %v4109_v11 }
 0x1aa   :  { %v4113_v8 = vrot.slane %v399_v12, %v5502_v9  ;;  %v4117_v53 = vrot.slane %v399_v12, %v5504_v28  ;;  %v5506_v28 = vsub.s32 3, %v3556_v4 }
 0x1ac   :  { %5503 = vst [vmem:[#allocation12_spill] sm:$0xff] %v4113_v8  ;;  %5505 = vst [vmem:[#allocation13_spill] sm:$0xff] %v4117_v53  ;;  %v4124_v3 = vrot.slane %v399_v12, %v5506_v28 }
 0x1ae   :  { %5507 = vst [vmem:[#allocation14_spill] sm:$0xff] %v4124_v3 }
 0x21e   :  { %v1138_v33 = vpop.f32.mrb[20].mxu0  ;;  %v1179_v6 = vpop.f32.mrb[20].mxu1 }
 0x21f   :  { %v1139_v2 = vadd.f32 %v1138_v33, %v4109_v11  ;;  %v1140_v13 = vpop.f32.mrb[21].mxu0  ;;  %v1181_v10 = vpop.f32.mrb[21].mxu1  ;;  %v1180_v16 = vadd.f32 %v1179_v6, %v4117_v53  ;;  %v5511_v53 = vld [vmem:[#allocation64_spill] sm:$0xff] }
 0x220   :  { %v1141_v23 = vadd.f32 %v1140_v13, %v4113_v8  ;;  %v1142_v18 = vpop.f32.mrb[22].mxu0  ;;  %v1183_v14 = vpop.f32.mrb[22].mxu1  ;;  %v1182_v5 = vadd.f32 %v1181_v10, %v4124_v3  ;;  %v5509_v10 = vld [vmem:[#allocation63_spill] sm:$0xff] }
 0x221   :  { %3086 = vtanh.f32 %v1139_v2  ;;  %v1143_v43 = vpop.f32.mrb[23].mxu0  ;;  %v1184_v9 = vpop.f32.mrb[23].mxu1 }
 0x222   :  { %3088 = vtanh.f32 %v1141_v23 }
 0x223   :  { %3090 = vtanh.f32 %v1180_v16 }
 0x224   :  { %3092 = vtanh.f32 %v1182_v5 }
 0x22b   :  { %v3087_v33 = vpop.eup %3086 }
 0x22c   :  { %v1187_v11 = vmul.f32 0.5, %v3087_v33  ;;  %v3089_v38 = vpop.eup %3088  ;;  %v5510_v33 = vld [vmem:[#allocation65_spill] sm:$0xff] }
 0x22d   :  { %v1190_v13 = vmul.f32 0.5, %v3089_v38  ;;  %v3091_v14 = vpop.eup %3090 }
 0x22e   :  { %v1188_v7 = vadd.f32 0.5, %v1187_v11  ;;  %v3093_v23 = vpop.eup %3092 }
 0x22f   :  { %v1191_v18 = vadd.f32 0.5, %v1190_v13  ;;  %v1194_v4 = vmul.f32 0.5, %v3093_v23 }
 0x230   :  { %v1197_v2 = vmul.f32 %v3091_v14, %v1188_v7  ;;  %v5512_v7 = vld [vmem:[#allocation66_spill] sm:$0xff] }
 0x231   :  { %v1196_v6 = vmul.f32 0.0, %v1191_v18  ;;  %v1195_v9 = vadd.f32 0.5, %v1194_v4 }
 0x233   :  { %v4127_v43 = vadd.f32 %v1197_v2, %v1196_v6 }
 0x235   :  { %5508 = vst [vmem:[#allocation15_spill] sm:$0xff] %v4127_v43  ;;  %3094 = vtanh.f32 %v4127_v43 }
 0x23e   :  { %v1239_v12 = vpop.f32.mrb[24].mxu0  ;;  %v1280_v16 = vpop.f32.mrb[24].mxu1 }
 0x23f   :  { %v1287_v28 = vadd.f32 %v1239_v12, %v5509_v10  ;;  %v1289_v3 = vadd.f32 %v1280_v16, %v5510_v33  ;;  %v1241_v11 = vpop.f32.mrb[25].mxu0  ;;  %v1282_v38 = vpop.f32.mrb[25].mxu1 }
 0x240   :  { %v3095_v5 = vpop.eup %3094  ;;  %v1288_v13 = vadd.f32 %v1241_v11, %v5511_v53  ;;  %v1290_v14 = vadd.f32 %v1282_v38, %v5512_v7  ;;  %v1243_v18 = vpop.f32.mrb[26].mxu0 }
 0x241   :  { %v1284_v2 = vpop.f32.mrb[26].mxu1  ;;  %3096 = vtanh.f32 %v1287_v28  ;;  %v1244_v6 = vpop.f32.mrb[27].mxu0  ;;  %v1200_v23 = vmul.f32 %v3095_v5, %v1195_v9  ;;  %v4148_v18 = vld [vmem:[#allocation3 + $0x24] ss:$16 sps:$4 sm:$0xff]  }
 0x242   :  { %v1285_v43 = vpop.f32.mrb[27].mxu1  ;;  %3098 = vtanh.f32 %v1288_v13  ;;  %v4151_v2 = vld [vmem:[#allocation3 + $0x2c] ss:$16 sps:$4 sm:$0xff]   ;;  %v4156_v6 = vld [vmem:[#allocation3 + $0x20] ss:$16 sps:$4 sm:$0xff]  }
 0x243   :  { %v1307_v8 = vpack.c.bf16 %v1200_v23, %v1200_v23  ;;  %3100 = vtanh.f32 %v1289_v3  ;;  %v4159_v23 = vld [vmem:[#allocation3 + $0x28] ss:$16 sps:$4 sm:$0xff]  }
 0x244   :  { %3102 = vtanh.f32 %v1290_v14  ;;  %v4142_v14 = vld [vmem:[#allocation3] ss:$16 sps:$4 sm:$0xff]  }
 0x245   :  { %1340 = vmatprep.mubr.bf16.mxu0 %v1307_v8  ;;  %1381 = vmatprep.mubr.bf16.mxu1 %v1307_v8 }
 0x24b   :  { %v3097_v4 = vpop.eup %3096 }
 0x24c   :  { %v1292_v12 = vmul.f32 0.5, %v3097_v4  ;;  %v3099_v16 = vpop.eup %3098  ;;  %v4162_v4 = vld [vmem:[#allocation3 + $0x44] ss:$16 sps:$4 sm:$0xff]  }
 0x24d   :  { %v1295_v33 = vmul.f32 0.5, %v3099_v16  ;;  %v3101_v53 = vpop.eup %3100  ;;  %v4168_v16 = vld [vmem:[#allocation3 + $0x40] ss:$16 sps:$4 sm:$0xff]  }
 0x24e   :  { %v1293_v10 = vadd.f32 0.5, %v1292_v12  ;;  %v3103_v43 = vpop.eup %3102  ;;  %v4165_v12 = vld [vmem:[#allocation3 + $0x4c] ss:$16 sps:$4 sm:$0xff]  }
 0x24f   :  { %v1296_v11 = vadd.f32 0.5, %v1295_v33  ;;  %v1299_v9 = vmul.f32 0.5, %v3103_v43  ;;  %v4174_v33 = vld [vmem:[#allocation3 + $0x64] ss:$16 sps:$4 sm:$0xff]   ;;  %v4189_v43 = vld [vmem:[#allocation3 + $0x8c] ss:$16 sps:$4 sm:$0xff]  }
 0x250   :  { %v1302_v38 = vmul.f32 %v3101_v53, %v1293_v10  ;;  %v4171_v10 = vld [vmem:[#allocation3 + $0x48] ss:$16 sps:$4 sm:$0xff]   ;;  %v4177_v53 = vld [vmem:[#allocation3 + $0x6c] ss:$16 sps:$4 sm:$0xff]   ;;  %5514 = vst [vmem:[#allocation17_spill] sm:$0xff] %v4189_v43 }
 0x251   :  { %v1301_v7 = vmul.f32 %v1296_v11, %v3999_v1  ;;  %v1300_v3 = vadd.f32 0.5, %v1299_v9  ;;  %v4145_v1 = vld [vmem:[#allocation3 + $0x8] ss:$16 sps:$4 sm:$0xff]   ;;  %v4180_v11 = vld [vmem:[#allocation3 + $0x60] ss:$16 sps:$4 sm:$0xff]  }
 0x252   :  { %v4192_v9 = vld [vmem:[#allocation3 + $0x80] ss:$16 sps:$4 sm:$0xff]  }
 0x253   :  { %v4135_v28 = vadd.f32 %v1302_v38, %v1301_v7  ;;  %v4183_v38 = vld [vmem:[#allocation3 + $0x68] ss:$16 sps:$4 sm:$0xff]   ;;  %v4186_v7 = vld [vmem:[#allocation3 + $0x84] ss:$16 sps:$4 sm:$0xff]   ;;  %5515 = vst [vmem:[#allocation18_spill] sm:$0xff] %v4192_v9 }
 0x254   :  { %5513 = vst [vmem:[#allocation16_spill] sm:$0xff] %v4186_v7 }
 0x255   :  { %3104 = vtanh.f32 %v4135_v28 }
 0x25f   :  { %v3105_v5 = vpop.eup %3104 }
 0x260   :  { %v1305_v8 = vmul.f32 %v3105_v5, %v1300_v3  ;;  %v4195_v3 = vld [vmem:[#allocation3 + $0x88] ss:$16 sps:$4 sm:$0xff]   ;;  %v4198_v5 = vld [vmem:[#allocation3 + $0xa4] ss:$16 sps:$4 sm:$0xff]  }
 0x261   :  { %5516 = vst [vmem:[#allocation19_spill] sm:$0xff] %v4195_v3  ;;  %5517 = vst [vmem:[#allocation20_spill] sm:$0xff] %v4198_v5 }
 0x262   :  { %v4138_v13 = vpack.c.bf16 %v1305_v8, %v1305_v8  ;;  %v4201_v8 = vld [vmem:[#allocation3 + $0xac] ss:$16 sps:$4 sm:$0xff]  }
 0x263   :  { %5518 = vst [vmem:[#allocation21_spill] sm:$0xff] %v4201_v8 }
 0x264   :  { %1341 = vmatmul.mubr.bf16.vlgmr.msra.gmra.mrb[28].mxu0 %v4138_v13  ;;  %1382 = vmatmul.mubr.bf16.vlgmr.msra.gmra.mrb[28].mxu1 %v4138_v13 }
 0x265   :  { %1410 = vmatpush1.bf16.msra.mxu0 %v4142_v14  ;;  %1451 = vmatpush1.bf16.msra.mxu1 %v4145_v1 }
 0x266   :  { %1411 = vmatprep.subr.bf16.mxu0 %v4148_v18  ;;  %1452 = vmatprep.subr.bf16.mxu1 %v4151_v2 }
 0x267   :  { %1441 = vmatprep.mubr.bf16.mxu0 %v5443_v0  ;;  %1482 = vmatprep.mubr.bf16.mxu1 %v5443_v0 }
 0x269   :  { %1412 = vmatpush1.bf16.msra.mxu0 %v4156_v6  ;;  %1453 = vmatpush1.bf16.msra.mxu1 %v4159_v23 }
 0x26a   :  { %1413 = vmatprep.subr.bf16.mxu0 %v4162_v4  ;;  %1454 = vmatprep.subr.bf16.mxu1 %v4165_v12 }
 0x26d   :  { %1414 = vmatpush1.bf16.msra.mxu0 %v4168_v16  ;;  %1455 = vmatpush1.bf16.msra.mxu1 %v4171_v10 }
 0x26e   :  { %1415 = vmatprep.subr.bf16.mxu0 %v4174_v33  ;;  %1456 = vmatprep.subr.bf16.mxu1 %v4177_v53 }
 0x271   :  { %1416 = vmatpush1.bf16.msra.mxu0 %v4180_v11  ;;  %1457 = vmatpush1.bf16.msra.mxu1 %v4183_v38 }
 0x272   :  { %1417 = vmatprep.subr.bf16.mxu0 %v4186_v7  ;;  %1458 = vmatprep.subr.bf16.mxu1 %v4189_v43  ;;  %v4204_v7 = vld [vmem:[#allocation3 + $0xa0] ss:$16 sps:$4 sm:$0xff]   ;;  %v4207_v43 = vld [vmem:[#allocation3 + $0xa8] ss:$16 sps:$4 sm:$0xff]  }
 0x273   :  { %5519 = vst [vmem:[#allocation22_spill] sm:$0xff] %v4204_v7  ;;  %5520 = vst [vmem:[#allocation23_spill] sm:$0xff] %v4207_v43 }
 0x275   :  { %1418 = vmatpush1.bf16.msra.mxu0 %v4192_v9  ;;  %1459 = vmatpush1.bf16.msra.mxu1 %v4195_v3  ;;  %v4210_v9 = vld [vmem:[#allocation3 + $0xc4] ss:$16 sps:$4 sm:$0xff]   ;;  %v4213_v3 = vld [vmem:[#allocation3 + $0xcc] ss:$16 sps:$4 sm:$0xff]  }
 0x276   :  { %1419 = vmatprep.subr.bf16.mxu0 %v4198_v5  ;;  %1460 = vmatprep.subr.bf16.mxu1 %v4201_v8  ;;  %v4216_v5 = vld [vmem:[#allocation3 + $0xc0] ss:$16 sps:$4 sm:$0xff]   ;;  %v4219_v8 = vld [vmem:[#allocation3 + $0xc8] ss:$16 sps:$4 sm:$0xff]  }
 0x279   :  { %1420 = vmatpush1.bf16.msra.mxu0 %v4204_v7  ;;  %1461 = vmatpush1.bf16.msra.mxu1 %v4207_v43  ;;  %v4222_v7 = vld [vmem:[#allocation3 + $0xe4] ss:$16 sps:$4 sm:$0xff]   ;;  %v4226_v43 = vld [vmem:[#allocation3 + $0xe0] ss:$16 sps:$4 sm:$0xff]  }
 0x27a   :  { %1421 = vmatprep.subr.bf16.mxu0 %v4210_v9  ;;  %1462 = vmatprep.subr.bf16.mxu1 %v4213_v3 }
 0x27d   :  { %1422 = vmatpush1.bf16.msra.mxu0 %v4216_v5  ;;  %1463 = vmatpush1.bf16.msra.mxu1 %v4219_v8 }
 0x27e   :  { %1423 = vmatprep.subr.bf16.mxu0 %v4222_v7  ;;  %1464 = vmatprep.subr.bf16.mxu1 %v3700_v51  ;;  %v5521_v51 = vld [vmem:[#allocation38_spill] sm:$0xff] }
 0x281   :  { %1424 = vmatpush1.bf16.msra.mxu0 %v4226_v43  ;;  %1465 = vmatpush1.bf16.msra.mxu1 %v3704_v52  ;;  %v5522_v52 = vld [vmem:[#allocation39_spill] sm:$0xff] }
 0x282   :  { %1512 = vmatprep.subr.bf16.mxu0 %v3720_v54  ;;  %1553 = vmatprep.subr.bf16.mxu1 %v3722_v55  ;;  %v5523_v54 = vld [vmem:[#allocation40_spill] sm:$0xff]  ;;  %v5524_v55 = vld [vmem:[#allocation41_spill] sm:$0xff] }
 0x284   :  { %1442 = vmatmul.mubr.bf16.vlgmr.msra.gmra.mrb[32].mxu0 %v4138_v13  ;;  %1483 = vmatmul.mubr.bf16.vlgmr.msra.gmra.mrb[32].mxu1 %v4138_v13  ;;  %v5551_v13 = vld [vmem:[#allocation14_spill] sm:$0xff] }
 0x285   :  { %1513 = vmatpush1.bf16.msra.mxu0 %v3724_v56  ;;  %1554 = vmatpush1.bf16.msra.mxu1 %v3726_v57  ;;  %v5525_v56 = vld [vmem:[#allocation42_spill] sm:$0xff]  ;;  %v5526_v57 = vld [vmem:[#allocation43_spill] sm:$0xff] }
 0x286   :  { %1514 = vmatprep.subr.bf16.mxu0 %v3732_v58  ;;  %1555 = vmatprep.subr.bf16.mxu1 %v3734_v59  ;;  %v5527_v58 = vld [vmem:[#allocation44_spill] sm:$0xff]  ;;  %v5528_v59 = vld [vmem:[#allocation45_spill] sm:$0xff] }
 0x289   :  { %1515 = vmatpush1.bf16.msra.mxu0 %v3736_v60  ;;  %1556 = vmatpush1.bf16.msra.mxu1 %v3738_v61  ;;  %v5529_v60 = vld [vmem:[#allocation46_spill] sm:$0xff]  ;;  %v5530_v61 = vld [vmem:[#allocation47_spill] sm:$0xff] }
 0x28a   :  { %1516 = vmatprep.subr.bf16.mxu0 %v3744_v62  ;;  %1557 = vmatprep.subr.bf16.mxu1 %v3746_v63  ;;  %v5531_v62 = vld [vmem:[#allocation48_spill] sm:$0xff]  ;;  %v5532_v63 = vld [vmem:[#allocation49_spill] sm:$0xff] }
 0x28d   :  { %1517 = vmatpush1.bf16.msra.mxu0 %v5444_v15  ;;  %1558 = vmatpush1.bf16.msra.mxu1 %v5445_v17  ;;  %v5533_v15 = vld [vmem:[#allocation50_spill] sm:$0xff]  ;;  %v5534_v17 = vld [vmem:[#allocation51_spill] sm:$0xff] }
 0x28e   :  { %1518 = vmatprep.subr.bf16.mxu0 %v5446_v19  ;;  %1559 = vmatprep.subr.bf16.mxu1 %v5447_v20  ;;  %v5535_v19 = vld [vmem:[#allocation52_spill] sm:$0xff]  ;;  %v5536_v20 = vld [vmem:[#allocation53_spill] sm:$0xff] }
 0x291   :  { %1519 = vmatpush1.bf16.msra.mxu0 %v5448_v21  ;;  %1560 = vmatpush1.bf16.msra.mxu1 %v5449_v22  ;;  %v5537_v21 = vld [vmem:[#allocation54_spill] sm:$0xff]  ;;  %v5538_v22 = vld [vmem:[#allocation55_spill] sm:$0xff] }
 0x292   :  { %1520 = vmatprep.subr.bf16.mxu0 %v5450_v24  ;;  %1561 = vmatprep.subr.bf16.mxu1 %v5451_v25  ;;  %v5539_v24 = vld [vmem:[#allocation56_spill] sm:$0xff]  ;;  %v5540_v25 = vld [vmem:[#allocation57_spill] sm:$0xff] }
 0x295   :  { %1521 = vmatpush1.bf16.msra.mxu0 %v5452_v26  ;;  %1562 = vmatpush1.bf16.msra.mxu1 %v5453_v27  ;;  %v5541_v26 = vld [vmem:[#allocation58_spill] sm:$0xff]  ;;  %v5542_v27 = vld [vmem:[#allocation59_spill] sm:$0xff] }
 0x296   :  { %1522 = vmatprep.subr.bf16.mxu0 %v5454_v29  ;;  %1563 = vmatprep.subr.bf16.mxu1 %v5455_v30  ;;  %v5543_v29 = vld [vmem:[#allocation60_spill] sm:$0xff]  ;;  %v5544_v30 = vld [vmem:[#allocation61_spill] sm:$0xff] }
 0x299   :  { %1523 = vmatpush1.bf16.msra.mxu0 %v5456_v31  ;;  %1564 = vmatpush1.bf16.msra.mxu1 %v5457_v32  ;;  %v5545_v31 = vld [vmem:[#allocation62_spill] sm:$0xff]  ;;  %v5546_v32 = vld [vmem:[#allocation9_spill] sm:$0xff] }
 0x29a   :  { %1524 = vmatprep.subr.bf16.mxu0 %v5458_v34  ;;  %1565 = vmatprep.subr.bf16.mxu1 %v5459_v35  ;;  %v5547_v34 = vld [vmem:[#allocation10_spill] sm:$0xff] }
 0x29d   :  { %1525 = vmatpush1.bf16.msra.mxu0 %v5460_v36  ;;  %1566 = vmatpush1.bf16.msra.mxu1 %v5461_v37  ;;  %v5548_v37 = vld [vmem:[#allocation11_spill] sm:$0xff] }
 0x29e   :  { %1526 = vmatprep.subr.bf16.mxu0 %v5462_v39  ;;  %1567 = vmatprep.subr.bf16.mxu1 %v5463_v40 }
 0x2a1   :  { %1527 = vmatpush1.bf16.msra.mxu0 %v5464_v41  ;;  %1568 = vmatpush1.bf16.msra.mxu1 %v5465_v42  ;;  %v5549_v42 = vld [vmem:[#allocation12_spill] sm:$0xff] }
 0x2a2   :  { %1528 = vmatprep.subr.bf16.mxu0 %v5466_v44  ;;  %1569 = vmatprep.subr.bf16.mxu1 %v5467_v45 }
 0x2a5   :  { %1529 = vmatpush1.bf16.msra.mxu0 %v5468_v46  ;;  %1570 = vmatpush1.bf16.msra.mxu1 %v5469_v47  ;;  %v5550_v47 = vld [vmem:[#allocation13_spill] sm:$0xff] }
 0x2a6   :  { %1530 = vmatprep.subr.bf16.mxu0 %v5470_v49  ;;  %1571 = vmatprep.subr.bf16.mxu1 %v5471_v50 }
 0x2a9   :  { %1531 = vmatpush1.bf16.msra.mxu0 %v5472_v48  ;;  %1572 = vmatpush1.bf16.msra.mxu1 %v5521_v51 }
 0x2aa   :  { %1532 = vmatprep.subr.bf16.mxu0 %v5522_v52  ;;  %1573 = vmatprep.subr.bf16.mxu1 %v5523_v54 }
 0x2ad   :  { %1533 = vmatpush1.bf16.msra.mxu0 %v5524_v55  ;;  %1574 = vmatpush1.bf16.msra.mxu1 %v5525_v56 }
 0x2ae   :  { %1534 = vmatprep.subr.bf16.mxu0 %v5526_v57  ;;  %1575 = vmatprep.subr.bf16.mxu1 %v5527_v58 }
 0x2b1   :  { %1535 = vmatpush1.bf16.msra.mxu0 %v5528_v59  ;;  %1576 = vmatpush1.bf16.msra.mxu1 %v5529_v60 }
 0x2b2   :  { %1536 = vmatprep.subr.bf16.mxu0 %v5530_v61  ;;  %1577 = vmatprep.subr.bf16.mxu1 %v5531_v62  ;;  %v5552_v61 = vld [vmem:[#allocation15_spill] sm:$0xff] }
 0x2b5   :  { %1537 = vmatpush1.bf16.msra.mxu0 %v5532_v63  ;;  %1578 = vmatpush1.bf16.msra.mxu1 %v5533_v15 }
 0x2b6   :  { %1538 = vmatprep.subr.bf16.mxu0 %v5534_v17  ;;  %1579 = vmatprep.subr.bf16.mxu1 %v5535_v19 }
 0x2b9   :  { %1539 = vmatpush1.bf16.msra.mxu0 %v5536_v20  ;;  %1580 = vmatpush1.bf16.msra.mxu1 %v5537_v21 }
 0x2ba   :  { %1540 = vmatprep.subr.bf16.mxu0 %v5538_v22  ;;  %1581 = vmatprep.subr.bf16.mxu1 %v5539_v24  ;;  %v5553_v22 = vld [vmem:[#allocation67_spill] sm:$0xff] }
 0x2bd   :  { %1541 = vmatpush1.bf16.msra.mxu0 %v5540_v25  ;;  %1582 = vmatpush1.bf16.msra.mxu1 %v5541_v26  ;;  %v5554_v25 = vld [vmem:[#allocation69_spill] sm:$0xff] }
 0x2be   :  { %1542 = vmatprep.subr.bf16.mxu0 %v5542_v27  ;;  %1583 = vmatprep.subr.bf16.mxu1 %v5543_v29 }
 0x2c1   :  { %1543 = vmatpush1.bf16.msra.mxu0 %v5544_v30  ;;  %1584 = vmatpush1.bf16.msra.mxu1 %v5545_v31  ;;  %v5555_v31 = vld [vmem:[#allocation68_spill] sm:$0xff] }
 0x2c2   :  { %1613 = vmatprep.subr.bf16.mxu0 %v5546_v32  ;;  %1654 = vmatprep.subr.bf16.mxu1 %v5547_v34 }
 0x337   :  { %v1342_v35 = vpop.f32.mrb[28].mxu0  ;;  %v1383_v36 = vpop.f32.mrb[28].mxu1 }
 0x338   :  { %v1343_v39 = vadd.f32 %v1342_v35, %v5548_v37  ;;  %v1344_v40 = vpop.f32.mrb[29].mxu0  ;;  %v1385_v41 = vpop.f32.mrb[29].mxu1  ;;  %v1384_v49 = vadd.f32 %v1383_v36, %v5550_v47  ;;  %v5556_v36 = vld [vmem:[#allocation70_spill] sm:$0xff] }
 0x339   :  { %v1345_v44 = vadd.f32 %v1344_v40, %v5549_v42  ;;  %v1346_v45 = vpop.f32.mrb[30].mxu0  ;;  %v1387_v46 = vpop.f32.mrb[30].mxu1  ;;  %v1386_v51 = vadd.f32 %v1385_v41, %v5551_v13 }
 0x33a   :  { %3106 = vtanh.f32 %v1343_v39  ;;  %v1347_v50 = vpop.f32.mrb[31].mxu0  ;;  %v1388_v48 = vpop.f32.mrb[31].mxu1 }
 0x33b   :  { %3108 = vtanh.f32 %v1345_v44 }
 0x33c   :  { %3110 = vtanh.f32 %v1384_v49 }
 0x33d   :  { %3112 = vtanh.f32 %v1386_v51 }
 0x344   :  { %v3107_v52 = vpop.eup %3106 }
 0x345   :  { %v1391_v54 = vmul.f32 0.5, %v3107_v52  ;;  %v3109_v55 = vpop.eup %3108 }
 0x346   :  { %v1394_v57 = vmul.f32 0.5, %v3109_v55  ;;  %v3111_v58 = vpop.eup %3110 }
 0x347   :  { %v1392_v56 = vadd.f32 0.5, %v1391_v54  ;;  %v3113_v15 = vpop.eup %3112 }
 0x348   :  { %v1395_v59 = vadd.f32 0.5, %v1394_v57  ;;  %v1398_v17 = vmul.f32 0.5, %v3113_v15 }
 0x349   :  { %v1401_v60 = vmul.f32 %v3111_v58, %v1392_v56 }
 0x34a   :  { %v1400_v62 = vmul.f32 %v1395_v59, %v5552_v61  ;;  %v1399_v21 = vadd.f32 0.5, %v1398_v17 }
 0x34c   :  { %v4303_v63 = vadd.f32 %v1401_v60, %v1400_v62 }
 0x34e   :  { %3114 = vtanh.f32 %v4303_v63 }
 0x357   :  { %v1443_v19 = vpop.f32.mrb[32].mxu0  ;;  %v1484_v20 = vpop.f32.mrb[32].mxu1 }
 0x358   :  { %v1491_v24 = vadd.f32 %v1443_v19, %v5553_v22  ;;  %v1493_v26 = vadd.f32 %v1484_v20, %v5554_v25  ;;  %v1445_v27 = vpop.f32.mrb[33].mxu0  ;;  %v1486_v29 = vpop.f32.mrb[33].mxu1  ;;  %v5558_v20 = vld [vmem:[#allocation17_spill] sm:$0xff]  ;;  %v5560_v22 = vld [vmem:[#allocation19_spill] sm:$0xff] }
 0x359   :  { %v3115_v30 = vpop.eup %3114  ;;  %v1492_v35 = vadd.f32 %v1445_v27, %v5555_v31  ;;  %v1494_v39 = vadd.f32 %v1486_v29, %v5556_v36  ;;  %v1447_v40 = vpop.f32.mrb[34].mxu0  ;;  %v5562_v25 = vld [vmem:[#allocation21_spill] sm:$0xff]  ;;  %v5564_v27 = vld [vmem:[#allocation23_spill] sm:$0xff]  ;;  %v4343_v29 = vld [vmem:[#allocation3 + $0xec] ss:$16 sps:$4 sm:$0xff]  }
 0x35a   :  { %v1488_v41 = vpop.f32.mrb[34].mxu1  ;;  %3116 = vtanh.f32 %v1491_v24  ;;  %v1448_v44 = vpop.f32.mrb[35].mxu0  ;;  %v1404_v46 = vmul.f32 %v3115_v30, %v1399_v21  ;;  %v5559_v21 = vld [vmem:[#allocation18_spill] sm:$0xff]  ;;  %v5561_v24 = vld [vmem:[#allocation20_spill] sm:$0xff]  ;;  %v4350_v31 = vld [vmem:[#allocation5 + $0x4] ss:$16 sps:$4 sm:$0xff]  }
 0x35b   :  { %v1489_v45 = vpop.f32.mrb[35].mxu1  ;;  %3118 = vtanh.f32 %v1492_v35  ;;  %v4347_v30 = vld [vmem:[#allocation3 + $0xe8] ss:$16 sps:$4 sm:$0xff]   ;;  %v4353_v35 = vld [vmem:[#allocation5 + $0xc] ss:$16 sps:$4 sm:$0xff]  }
 0x35c   :  { %v1511_v49 = vpack.c.bf16 %v1404_v46, %v1404_v46  ;;  %3120 = vtanh.f32 %v1493_v26  ;;  %v5563_v26 = vld [vmem:[#allocation22_spill] sm:$0xff]  ;;  %v4356_v36 = vld [vmem:[#allocation5] ss:$16 sps:$4 sm:$0xff]   ;;  %v4362_v40 = vld [vmem:[#allocation5 + $0x24] ss:$16 sps:$4 sm:$0xff]  }
 0x35d   :  { %3122 = vtanh.f32 %v1494_v39  ;;  %v4359_v39 = vld [vmem:[#allocation5 + $0x8] ss:$16 sps:$4 sm:$0xff]   ;;  %v4365_v41 = vld [vmem:[#allocation5 + $0x2c] ss:$16 sps:$4 sm:$0xff]   ;;  %v4368_v44 = vld [vmem:[#allocation5 + $0x20] ss:$16 sps:$4 sm:$0xff]  }
 0x35e   :  { %1544 = vmatprep.mubr.bf16.mxu0 %v1511_v49  ;;  %1585 = vmatprep.mubr.bf16.mxu1 %v1511_v49  ;;  %v4371_v45 = vld [vmem:[#allocation5 + $0x28] ss:$16 sps:$4 sm:$0xff]   ;;  %v4374_v46 = vld [vmem:[#allocation5 + $0x44] ss:$16 sps:$4 sm:$0xff]   ;;  %v4377_v49 = vld [vmem:[#allocation5 + $0x4c] ss:$16 sps:$4 sm:$0xff]  }
 0x364   :  { %v3117_v50 = vpop.eup %3116 }
 0x365   :  { %v1496_v48 = vmul.f32 0.5, %v3117_v50  ;;  %v3119_v51 = vpop.eup %3118  ;;  %v4380_v50 = vld [vmem:[#allocation5 + $0x40] ss:$16 sps:$4 sm:$0xff]  }
 0x366   :  { %v1499_v54 = vmul.f32 0.5, %v3119_v51  ;;  %v3121_v55 = vpop.eup %3120  ;;  %5565 = vst [vmem:[#allocation24_spill] sm:$0xff] %v4380_v50  ;;  %v4386_v51 = vld [vmem:[#allocation5 + $0x64] ss:$16 sps:$4 sm:$0xff]  }
 0x367   :  { %v1497_v52 = vadd.f32 0.5, %v1496_v48  ;;  %v3123_v60 = vpop.eup %3122  ;;  %v4383_v48 = vld [vmem:[#allocation5 + $0x48] ss:$16 sps:$4 sm:$0xff]   ;;  %5567 = vst [vmem:[#allocation26_spill] sm:$0xff] %v4386_v51 }
 0x368   :  { %v1500_v56 = vadd.f32 0.5, %v1499_v54  ;;  %v1503_v61 = vmul.f32 0.5, %v3123_v60  ;;  %5566 = vst [vmem:[#allocation25_spill] sm:$0xff] %v4383_v48  ;;  %v4392_v54 = vld [vmem:[#allocation5 + $0x60] ss:$16 sps:$4 sm:$0xff]  }
 0x369   :  { %v1506_v57 = vmul.f32 %v3121_v55, %v1497_v52  ;;  %v4389_v52 = vld [vmem:[#allocation5 + $0x6c] ss:$16 sps:$4 sm:$0xff]   ;;  %5569 = vst [vmem:[#allocation28_spill] sm:$0xff] %v4392_v54  ;;  %v4395_v55 = vld [vmem:[#allocation5 + $0x68] ss:$16 sps:$4 sm:$0xff]  }
 0x36a   :  { %v1505_v58 = vmul.f32 %v1500_v56, %v4135_v28  ;;  %v1504_v62 = vadd.f32 0.5, %v1503_v61  ;;  %v5557_v28 = vld [vmem:[#allocation16_spill] sm:$0xff]  ;;  %5568 = vst [vmem:[#allocation27_spill] sm:$0xff] %v4389_v52  ;;  %5570 = vst [vmem:[#allocation29_spill] sm:$0xff] %v4395_v55  ;;  %v4398_v56 = vld [vmem:[#allocation5 + $0x84] ss:$16 sps:$4 sm:$0xff]  }
 0x36b   :  { %5571 = vst [vmem:[#allocation30_spill] sm:$0xff] %v4398_v56  ;;  %v4407_v60 = vld [vmem:[#allocation5 + $0x88] ss:$16 sps:$4 sm:$0xff]   ;;  %v4410_v61 = vld [vmem:[#allocation5 + $0xa4] ss:$16 sps:$4 sm:$0xff]  }
 0x36c   :  { %v4311_v59 = vadd.f32 %v1506_v57, %v1505_v58  ;;  %v4401_v57 = vld [vmem:[#allocation5 + $0x8c] ss:$16 sps:$4 sm:$0xff]   ;;  %v4404_v58 = vld [vmem:[#allocation5 + $0x80] ss:$16 sps:$4 sm:$0xff]   ;;  %5574 = vst [vmem:[#allocation33_spill] sm:$0xff] %v4407_v60  ;;  %5575 = vst [vmem:[#allocation34_spill] sm:$0xff] %v4410_v61 }
 0x36d   :  { %5572 = vst [vmem:[#allocation31_spill] sm:$0xff] %v4401_v57  ;;  %5573 = vst [vmem:[#allocation32_spill] sm:$0xff] %v4404_v58 }
 0x36e   :  { %3124 = vtanh.f32 %v4311_v59 }
 0x378   :  { %v3125_v15 = vpop.eup %3124 }
 0x379   :  { %v1509_v17 = vmul.f32 %v3125_v15, %v1504_v62  ;;  %v4413_v62 = vld [vmem:[#allocation5 + $0xac] ss:$16 sps:$4 sm:$0xff]   ;;  %v4416_v15 = vld [vmem:[#allocation5 + $0xa0] ss:$16 sps:$4 sm:$0xff]  }
 0x37a   :  { %5576 = vst [vmem:[#allocation35_spill] sm:$0xff] %v4413_v62  ;;  %5577 = vst [vmem:[#allocation36_spill] sm:$0xff] %v4416_v15 }
 0x37b   :  { %v1510_v19 = vpack.c.bf16 %v1509_v17, %v1509_v17  ;;  %v4419_v17 = vld [vmem:[#allocation5 + $0xa8] ss:$16 sps:$4 sm:$0xff]  }
 0x37c   :  { %5578 = vst [vmem:[#allocation37_spill] sm:$0xff] %v4419_v17 }
 0x37d   :  { %1545 = vmatmul.mubr.bf16.vlgmr.msra.gmra.mrb[36].mxu0 %v1510_v19  ;;  %1586 = vmatmul.mubr.bf16.vlgmr.msra.gmra.mrb[36].mxu1 %v1510_v19 }
 0x37e   :  { %1614 = vmatpush1.bf16.msra.mxu0 %v4142_v14  ;;  %1655 = vmatpush1.bf16.msra.mxu1 %v4145_v1 }
 0x37f   :  { %1615 = vmatprep.subr.bf16.mxu0 %v4148_v18  ;;  %1656 = vmatprep.subr.bf16.mxu1 %v4151_v2 }
 0x380   :  { %1645 = vmatprep.mubr.bf16.mxu0 %v5443_v0  ;;  %1686 = vmatprep.mubr.bf16.mxu1 %v5443_v0 }
 0x382   :  { %1616 = vmatpush1.bf16.msra.mxu0 %v4156_v6  ;;  %1657 = vmatpush1.bf16.msra.mxu1 %v4159_v23 }
 0x383   :  { %1617 = vmatprep.subr.bf16.mxu0 %v4162_v4  ;;  %1658 = vmatprep.subr.bf16.mxu1 %v4165_v12 }
 0x386   :  { %1618 = vmatpush1.bf16.msra.mxu0 %v4168_v16  ;;  %1659 = vmatpush1.bf16.msra.mxu1 %v4171_v10 }
 0x387   :  { %1619 = vmatprep.subr.bf16.mxu0 %v4174_v33  ;;  %1660 = vmatprep.subr.bf16.mxu1 %v4177_v53 }
 0x38a   :  { %1620 = vmatpush1.bf16.msra.mxu0 %v4180_v11  ;;  %1661 = vmatpush1.bf16.msra.mxu1 %v4183_v38 }
 0x38b   :  { %1621 = vmatprep.subr.bf16.mxu0 %v5557_v28  ;;  %1662 = vmatprep.subr.bf16.mxu1 %v5558_v20 }
 0x38e   :  { %1622 = vmatpush1.bf16.msra.mxu0 %v5559_v21  ;;  %1663 = vmatpush1.bf16.msra.mxu1 %v5560_v22 }
 0x38f   :  { %1623 = vmatprep.subr.bf16.mxu0 %v5561_v24  ;;  %1664 = vmatprep.subr.bf16.mxu1 %v5562_v25 }
 0x392   :  { %1624 = vmatpush1.bf16.msra.mxu0 %v5563_v26  ;;  %1665 = vmatpush1.bf16.msra.mxu1 %v5564_v27 }
 0x393   :  { %1625 = vmatprep.subr.bf16.mxu0 %v4210_v9  ;;  %1666 = vmatprep.subr.bf16.mxu1 %v4213_v3 }
 0x396   :  { %1626 = vmatpush1.bf16.msra.mxu0 %v4216_v5  ;;  %1667 = vmatpush1.bf16.msra.mxu1 %v4219_v8 }
 0x397   :  { %1627 = vmatprep.subr.bf16.mxu0 %v4222_v7  ;;  %1668 = vmatprep.subr.bf16.mxu1 %v4343_v29 }
 0x39a   :  { %1628 = vmatpush1.bf16.msra.mxu0 %v4226_v43  ;;  %1669 = vmatpush1.bf16.msra.mxu1 %v4347_v30 }
 0x39b   :  { %1716 = vmatprep.subr.bf16.mxu0 %v4350_v31  ;;  %1757 = vmatprep.subr.bf16.mxu1 %v4353_v35 }
 0x39d   :  { %1646 = vmatmul.mubr.bf16.vlgmr.msra.gmra.mrb[40].mxu0 %v1510_v19  ;;  %1687 = vmatmul.mubr.bf16.vlgmr.msra.gmra.mrb[40].mxu1 %v1510_v19  ;;  %v4422_v19 = vld [vmem:[#allocation5 + $0xc4] ss:$16 sps:$4 sm:$0xff]  }
 0x39e   :  { %1717 = vmatpush1.bf16.msra.mxu0 %v4356_v36  ;;  %1758 = vmatpush1.bf16.msra.mxu1 %v4359_v39  ;;  %5579 = vst [vmem:[#allocation63_spill] sm:$0xff] %v4422_v19 }
 0x39f   :  { %1718 = vmatprep.subr.bf16.mxu0 %v4362_v40  ;;  %1759 = vmatprep.subr.bf16.mxu1 %v4365_v41 }
 0x3a2   :  { %1719 = vmatpush1.bf16.msra.mxu0 %v4368_v44  ;;  %1760 = vmatpush1.bf16.msra.mxu1 %v4371_v45 }
 0x3a3   :  { %1720 = vmatprep.subr.bf16.mxu0 %v4374_v46  ;;  %1761 = vmatprep.subr.bf16.mxu1 %v4377_v49 }
 0x3a6   :  { %1721 = vmatpush1.bf16.msra.mxu0 %v4380_v50  ;;  %1762 = vmatpush1.bf16.msra.mxu1 %v4383_v48 }
 0x3a7   :  { %1722 = vmatprep.subr.bf16.mxu0 %v4386_v51  ;;  %1763 = vmatprep.subr.bf16.mxu1 %v4389_v52 }
 0x3aa   :  { %1723 = vmatpush1.bf16.msra.mxu0 %v4392_v54  ;;  %1764 = vmatpush1.bf16.msra.mxu1 %v4395_v55 }
 0x3ab   :  { %1724 = vmatprep.subr.bf16.mxu0 %v4398_v56  ;;  %1765 = vmatprep.subr.bf16.mxu1 %v4401_v57 }
 0x3ae   :  { %1725 = vmatpush1.bf16.msra.mxu0 %v4404_v58  ;;  %1766 = vmatpush1.bf16.msra.mxu1 %v4407_v60  ;;  %v4425_v60 = vld [vmem:[#allocation5 + $0xcc] ss:$16 sps:$4 sm:$0xff]  }
 0x3af   :  { %1726 = vmatprep.subr.bf16.mxu0 %v4410_v61  ;;  %1767 = vmatprep.subr.bf16.mxu1 %v4413_v62  ;;  %5580 = vst [vmem:[#allocation65_spill] sm:$0xff] %v4425_v60  ;;  %v4428_v61 = vld [vmem:[#allocation5 + $0xc0] ss:$16 sps:$4 sm:$0xff]   ;;  %v4431_v62 = vld [vmem:[#allocation5 + $0xc8] ss:$16 sps:$4 sm:$0xff]  }
 0x3b0   :  { %5581 = vst [vmem:[#allocation64_spill] sm:$0xff] %v4428_v61  ;;  %5582 = vst [vmem:[#allocation66_spill] sm:$0xff] %v4431_v62 }
 0x3b2   :  { %1727 = vmatpush1.bf16.msra.mxu0 %v4416_v15  ;;  %1768 = vmatpush1.bf16.msra.mxu1 %v4419_v17  ;;  %v4434_v15 = vld [vmem:[#allocation5 + $0xe4] ss:$16 sps:$4 sm:$0xff]   ;;  %v4437_v17 = vld [vmem:[#allocation5 + $0xec] ss:$16 sps:$4 sm:$0xff]  }
 0x3b3   :  { %1728 = vmatprep.subr.bf16.mxu0 %v4422_v19  ;;  %1769 = vmatprep.subr.bf16.mxu1 %v4425_v60  ;;  %5583 = vst [vmem:[#allocation38_spill] sm:$0xff] %v4434_v15  ;;  %5584 = vst [vmem:[#allocation39_spill] sm:$0xff] %v4437_v17  ;;  %v4440_v19 = vld [vmem:[#allocation5 + $0xe0] ss:$16 sps:$4 sm:$0xff]   ;;  %v4443_v60 = vld [vmem:[#allocation5 + $0xe8] ss:$16 sps:$4 sm:$0xff]  }
 0x3b4   :  { %5585 = vst [vmem:[#allocation40_spill] sm:$0xff] %v4440_v19  ;;  %5586 = vst [vmem:[#allocation41_spill] sm:$0xff] %v4443_v60 }
 0x3b6   :  { %1729 = vmatpush1.bf16.msra.mxu0 %v4428_v61  ;;  %1770 = vmatpush1.bf16.msra.mxu1 %v4431_v62  ;;  %v4446_v61 = vld [vmem:[#allocation5 + $0x104] ss:$16 sps:$4 sm:$0xff]   ;;  %v4449_v62 = vld [vmem:[#allocation5 + $0x10c] ss:$16 sps:$4 sm:$0xff]  }
 0x3b7   :  { %1730 = vmatprep.subr.bf16.mxu0 %v4434_v15  ;;  %1771 = vmatprep.subr.bf16.mxu1 %v4437_v17  ;;  %5587 = vst [vmem:[#allocation42_spill] sm:$0xff] %v4446_v61  ;;  %5588 = vst [vmem:[#allocation43_spill] sm:$0xff] %v4449_v62  ;;  %v4452_v15 = vld [vmem:[#allocation5 + $0x100] ss:$16 sps:$4 sm:$0xff]   ;;  %v4455_v17 = vld [vmem:[#allocation5 + $0x108] ss:$16 sps:$4 sm:$0xff]  }
 0x3b8   :  { %5589 = vst [vmem:[#allocation44_spill] sm:$0xff] %v4452_v15  ;;  %5590 = vst [vmem:[#allocation45_spill] sm:$0xff] %v4455_v17 }
 0x3ba   :  { %1731 = vmatpush1.bf16.msra.mxu0 %v4440_v19  ;;  %1772 = vmatpush1.bf16.msra.mxu1 %v4443_v60  ;;  %v4458_v19 = vld [vmem:[#allocation5 + $0x124] ss:$16 sps:$4 sm:$0xff]   ;;  %v4461_v60 = vld [vmem:[#allocation5 + $0x12c] ss:$16 sps:$4 sm:$0xff]  }
 0x3bb   :  { %1732 = vmatprep.subr.bf16.mxu0 %v4446_v61  ;;  %1773 = vmatprep.subr.bf16.mxu1 %v4449_v62  ;;  %5591 = vst [vmem:[#allocation46_spill] sm:$0xff] %v4458_v19  ;;  %5592 = vst [vmem:[#allocation47_spill] sm:$0xff] %v4461_v60  ;;  %v4464_v61 = vld [vmem:[#allocation5 + $0x120] ss:$16 sps:$4 sm:$0xff]   ;;  %v4467_v62 = vld [vmem:[#allocation5 + $0x128] ss:$16 sps:$4 sm:$0xff]  }
 0x3bc   :  { %5593 = vst [vmem:[#allocation48_spill] sm:$0xff] %v4464_v61  ;;  %5594 = vst [vmem:[#allocation49_spill] sm:$0xff] %v4467_v62 }
 0x3be   :  { %1733 = vmatpush1.bf16.msra.mxu0 %v4452_v15  ;;  %1774 = vmatpush1.bf16.msra.mxu1 %v4455_v17  ;;  %v4470_v15 = vld [vmem:[#allocation5 + $0x144] ss:$16 sps:$4 sm:$0xff]   ;;  %v4473_v17 = vld [vmem:[#allocation5 + $0x14c] ss:$16 sps:$4 sm:$0xff]  }
 0x3bf   :  { %1734 = vmatprep.subr.bf16.mxu0 %v4458_v19  ;;  %1775 = vmatprep.subr.bf16.mxu1 %v4461_v60  ;;  %5595 = vst [vmem:[#allocation50_spill] sm:$0xff] %v4470_v15  ;;  %5596 = vst [vmem:[#allocation51_spill] sm:$0xff] %v4473_v17  ;;  %v4476_v19 = vld [vmem:[#allocation5 + $0x140] ss:$16 sps:$4 sm:$0xff]   ;;  %v4479_v60 = vld [vmem:[#allocation5 + $0x148] ss:$16 sps:$4 sm:$0xff]  }
 0x3c0   :  { %5597 = vst [vmem:[#allocation52_spill] sm:$0xff] %v4476_v19  ;;  %5598 = vst [vmem:[#allocation53_spill] sm:$0xff] %v4479_v60 }
 0x3c2   :  { %1735 = vmatpush1.bf16.msra.mxu0 %v4464_v61  ;;  %1776 = vmatpush1.bf16.msra.mxu1 %v4467_v62  ;;  %v4482_v61 = vld [vmem:[#allocation5 + $0x164] ss:$16 sps:$4 sm:$0xff]   ;;  %v4485_v62 = vld [vmem:[#allocation5 + $0x16c] ss:$16 sps:$4 sm:$0xff]  }
 0x3c3   :  { %1736 = vmatprep.subr.bf16.mxu0 %v4470_v15  ;;  %1777 = vmatprep.subr.bf16.mxu1 %v4473_v17  ;;  %5599 = vst [vmem:[#allocation54_spill] sm:$0xff] %v4482_v61  ;;  %5600 = vst [vmem:[#allocation55_spill] sm:$0xff] %v4485_v62  ;;  %v4488_v15 = vld [vmem:[#allocation5 + $0x160] ss:$16 sps:$4 sm:$0xff]   ;;  %v4491_v17 = vld [vmem:[#allocation5 + $0x168] ss:$16 sps:$4 sm:$0xff]  }
 0x3c4   :  { %5601 = vst [vmem:[#allocation56_spill] sm:$0xff] %v4488_v15  ;;  %5602 = vst [vmem:[#allocation57_spill] sm:$0xff] %v4491_v17 }
 0x3c6   :  { %1737 = vmatpush1.bf16.msra.mxu0 %v4476_v19  ;;  %1778 = vmatpush1.bf16.msra.mxu1 %v4479_v60  ;;  %v4494_v19 = vld [vmem:[#allocation5 + $0x184] ss:$16 sps:$4 sm:$0xff]   ;;  %v4497_v60 = vld [vmem:[#allocation5 + $0x18c] ss:$16 sps:$4 sm:$0xff]  }
 0x3c7   :  { %1738 = vmatprep.subr.bf16.mxu0 %v4482_v61  ;;  %1779 = vmatprep.subr.bf16.mxu1 %v4485_v62  ;;  %5603 = vst [vmem:[#allocation58_spill] sm:$0xff] %v4494_v19  ;;  %5604 = vst [vmem:[#allocation59_spill] sm:$0xff] %v4497_v60  ;;  %v4500_v61 = vld [vmem:[#allocation5 + $0x180] ss:$16 sps:$4 sm:$0xff]   ;;  %v4503_v62 = vld [vmem:[#allocation5 + $0x188] ss:$16 sps:$4 sm:$0xff]  }
 0x3c8   :  { %5605 = vst [vmem:[#allocation60_spill] sm:$0xff] %v4500_v61  ;;  %5606 = vst [vmem:[#allocation61_spill] sm:$0xff] %v4503_v62 }
 0x3ca   :  { %1739 = vmatpush1.bf16.msra.mxu0 %v4488_v15  ;;  %1780 = vmatpush1.bf16.msra.mxu1 %v4491_v17  ;;  %v4506_v15 = vld [vmem:[#allocation5 + $0x1a4] ss:$16 sps:$4 sm:$0xff]   ;;  %v4509_v17 = vld [vmem:[#allocation5 + $0x1ac] ss:$16 sps:$4 sm:$0xff]  }
 0x3cb   :  { %1740 = vmatprep.subr.bf16.mxu0 %v4494_v19  ;;  %1781 = vmatprep.subr.bf16.mxu1 %v4497_v60  ;;  %5607 = vst [vmem:[#allocation62_spill] sm:$0xff] %v4506_v15  ;;  %5608 = vst [vmem:[#allocation9_spill] sm:$0xff] %v4509_v17  ;;  %v4512_v19 = vld [vmem:[#allocation5 + $0x1a0] ss:$16 sps:$4 sm:$0xff]   ;;  %v4515_v60 = vld [vmem:[#allocation5 + $0x1a8] ss:$16 sps:$4 sm:$0xff]  }
 0x3cc   :  { %5609 = vst [vmem:[#allocation10_spill] sm:$0xff] %v4512_v19  ;;  %5610 = vst [vmem:[#allocation15_spill] sm:$0xff] %v4515_v60 }
 0x3ce   :  { %1741 = vmatpush1.bf16.msra.mxu0 %v4500_v61  ;;  %1782 = vmatpush1.bf16.msra.mxu1 %v4503_v62  ;;  %v4518_v61 = vld [vmem:[#allocation5 + $0x1c4] ss:$16 sps:$4 sm:$0xff]   ;;  %v4521_v62 = vld [vmem:[#allocation5 + $0x1cc] ss:$16 sps:$4 sm:$0xff]  }
 0x3cf   :  { %1742 = vmatprep.subr.bf16.mxu0 %v4506_v15  ;;  %1783 = vmatprep.subr.bf16.mxu1 %v4509_v17  ;;  %5611 = vst [vmem:[#allocation67_spill] sm:$0xff] %v4518_v61  ;;  %5612 = vst [vmem:[#allocation69_spill] sm:$0xff] %v4521_v62  ;;  %v4524_v15 = vld [vmem:[#allocation5 + $0x1c0] ss:$16 sps:$4 sm:$0xff]   ;;  %v4527_v17 = vld [vmem:[#allocation5 + $0x1c8] ss:$16 sps:$4 sm:$0xff]  }
 0x3d0   :  { %5613 = vst [vmem:[#allocation68_spill] sm:$0xff] %v4524_v15  ;;  %5614 = vst [vmem:[#allocation70_spill] sm:$0xff] %v4527_v17 }
 0x3d2   :  { %1743 = vmatpush1.bf16.msra.mxu0 %v4512_v19  ;;  %1784 = vmatpush1.bf16.msra.mxu1 %v4515_v60  ;;  %v4530_v19 = vld [vmem:[#allocation5 + $0x1e4] ss:$16 sps:$4 sm:$0xff]   ;;  %v4533_v60 = vld [vmem:[#allocation5 + $0x1ec] ss:$16 sps:$4 sm:$0xff]  }
 0x3d3   :  { %1744 = vmatprep.subr.bf16.mxu0 %v4518_v61  ;;  %1785 = vmatprep.subr.bf16.mxu1 %v4521_v62  ;;  %5615 = vst [vmem:[#allocation16_spill] sm:$0xff] %v4530_v19  ;;  %5616 = vst [vmem:[#allocation17_spill] sm:$0xff] %v4533_v60  ;;  %v4536_v61 = vld [vmem:[#allocation5 + $0x1e0] ss:$16 sps:$4 sm:$0xff]   ;;  %v4539_v62 = vld [vmem:[#allocation5 + $0x1e8] ss:$16 sps:$4 sm:$0xff]  }
 0x3d4   :  { %5617 = vst [vmem:[#allocation18_spill] sm:$0xff] %v4536_v61  ;;  %5618 = vst [vmem:[#allocation19_spill] sm:$0xff] %v4539_v62 }
 0x3d6   :  { %1745 = vmatpush1.bf16.msra.mxu0 %v4524_v15  ;;  %1786 = vmatpush1.bf16.msra.mxu1 %v4527_v17 }
 0x3d7   :  { %1746 = vmatprep.subr.bf16.mxu0 %v4530_v19  ;;  %1787 = vmatprep.subr.bf16.mxu1 %v4533_v60 }
 0x3da   :  { %1747 = vmatpush1.bf16.msra.mxu0 %v4536_v61  ;;  %1788 = vmatpush1.bf16.msra.mxu1 %v4539_v62 }
 0x3db   :  { %1817 = vmatprep.subr.bf16.mxu0 %v5546_v32  ;;  %1858 = vmatprep.subr.bf16.mxu1 %v5547_v34 }
 0x450   :  { %v1546_v17 = vpop.f32.mrb[36].mxu0  ;;  %v1587_v15 = vpop.f32.mrb[36].mxu1 }
 0x451   :  { %v1547_v19 = vadd.f32 %v1546_v17, %v5548_v37  ;;  %v1548_v58 = vpop.f32.mrb[37].mxu0  ;;  %v1589_v57 = vpop.f32.mrb[37].mxu1  ;;  %v1588_v61 = vadd.f32 %v1587_v15, %v5550_v47  ;;  %v5620_v15 = vld [vmem:[#allocation71_spill] sm:$0xff] }
 0x452   :  { %v1549_v60 = vadd.f32 %v1548_v58, %v5549_v42  ;;  %v1550_v56 = vpop.f32.mrb[38].mxu0  ;;  %v1591_v55 = vpop.f32.mrb[38].mxu1  ;;  %v1590_v32 = vadd.f32 %v1589_v57, %v5551_v13 }
 0x453   :  { %3126 = vtanh.f32 %v1547_v19  ;;  %v1551_v54 = vpop.f32.mrb[39].mxu0  ;;  %v1592_v52 = vpop.f32.mrb[39].mxu1 }
 0x454   :  { %3128 = vtanh.f32 %v1549_v60 }
 0x455   :  { %3130 = vtanh.f32 %v1588_v61 }
 0x456   :  { %3132 = vtanh.f32 %v1590_v32 }
 0x45d   :  { %v3127_v34 = vpop.eup %3126 }
 0x45e   :  { %v1595_v62 = vmul.f32 0.5, %v3127_v34  ;;  %v3129_v51 = vpop.eup %3128  ;;  %v5621_v34 = vld [vmem:[#allocation73_spill] sm:$0xff] }
 0x45f   :  { %v1598_v17 = vmul.f32 0.5, %v3129_v51  ;;  %v3131_v37 = vpop.eup %3130 }
 0x460   :  { %v1596_v48 = vadd.f32 0.5, %v1595_v62  ;;  %v3133_v52 = vpop.eup %3132 }
 0x461   :  { %v1599_v50 = vadd.f32 0.5, %v1598_v17  ;;  %v1602_v54 = vmul.f32 0.5, %v3133_v52  ;;  %v5622_v17 = vld [vmem:[#allocation72_spill] sm:$0xff] }
 0x462   :  { %v1605_v58 = vmul.f32 %v3131_v37, %v1596_v48  ;;  %v5623_v48 = vld [vmem:[#allocation74_spill] sm:$0xff] }
 0x463   :  { %v1604_v55 = vmul.f32 %v1599_v50, %v4303_v63  ;;  %v1603_v57 = vadd.f32 0.5, %v1602_v54 }
 0x465   :  { %v4549_v56 = vadd.f32 %v1605_v58, %v1604_v55 }
 0x467   :  { %5619 = vst [vmem:[#allocation20_spill] sm:$0xff] %v4549_v56  ;;  %3134 = vtanh.f32 %v4549_v56 }
 0x470   :  { %v1647_v60 = vpop.f32.mrb[40].mxu0  ;;  %v1688_v61 = vpop.f32.mrb[40].mxu1 }
 0x471   :  { %v1695_v19 = vadd.f32 %v1647_v60, %v5620_v15  ;;  %v1697_v62 = vadd.f32 %v1688_v61, %v5621_v34  ;;  %v1649_v51 = vpop.f32.mrb[41].mxu0  ;;  %v1690_v32 = vpop.f32.mrb[41].mxu1 }
 0x472   :  { %v3135_v13 = vpop.eup %3134  ;;  %v1696_v37 = vadd.f32 %v1649_v51, %v5622_v17  ;;  %v1698_v63 = vadd.f32 %v1690_v32, %v5623_v48  ;;  %v1651_v50 = vpop.f32.mrb[42].mxu0 }
 0x473   :  { %v1692_v58 = vpop.f32.mrb[42].mxu1  ;;  %3136 = vtanh.f32 %v1695_v19  ;;  %v1652_v55 = vpop.f32.mrb[43].mxu0  ;;  %v1608_v52 = vmul.f32 %v3135_v13, %v1603_v57  ;;  %v5626_v50 = vld [vmem:[#allocation26_spill] sm:$0xff] }
 0x474   :  { %v1693_v56 = vpop.f32.mrb[43].mxu1  ;;  %3138 = vtanh.f32 %v1696_v37  ;;  %v5627_v58 = vld [vmem:[#allocation27_spill] sm:$0xff]  ;;  %v5628_v55 = vld [vmem:[#allocation28_spill] sm:$0xff] }
 0x475   :  { %v1715_v47 = vpack.c.bf16 %v1608_v52, %v1608_v52  ;;  %3140 = vtanh.f32 %v1697_v62  ;;  %v5629_v52 = vld [vmem:[#allocation29_spill] sm:$0xff] }
 0x476   :  { %3142 = vtanh.f32 %v1698_v63  ;;  %v5625_v63 = vld [vmem:[#allocation25_spill] sm:$0xff] }
 0x477   :  { %1748 = vmatprep.mubr.bf16.mxu0 %v1715_v47  ;;  %1789 = vmatprep.mubr.bf16.mxu1 %v1715_v47 }
 0x47d   :  { %v3137_v54 = vpop.eup %3136 }
 0x47e   :  { %v1700_v60 = vmul.f32 0.5, %v3137_v54  ;;  %v3139_v61 = vpop.eup %3138  ;;  %v5630_v54 = vld [vmem:[#allocation30_spill] sm:$0xff] }
 0x47f   :  { %v1703_v34 = vmul.f32 0.5, %v3139_v61  ;;  %v3141_v51 = vpop.eup %3140  ;;  %v5632_v61 = vld [vmem:[#allocation32_spill] sm:$0xff] }
 0x480   :  { %v1701_v15 = vadd.f32 0.5, %v1700_v60  ;;  %v3143_v13 = vpop.eup %3142  ;;  %v5631_v60 = vld [vmem:[#allocation31_spill] sm:$0xff] }
 0x481   :  { %v1704_v17 = vadd.f32 0.5, %v1703_v34  ;;  %v1707_v56 = vmul.f32 0.5, %v3143_v13  ;;  %v5634_v34 = vld [vmem:[#allocation34_spill] sm:$0xff]  ;;  %v5639_v13 = vld [vmem:[#allocation65_spill] sm:$0xff] }
 0x482   :  { %v1710_v32 = vmul.f32 %v3141_v51, %v1701_v15  ;;  %v5633_v15 = vld [vmem:[#allocation33_spill] sm:$0xff]  ;;  %v5635_v51 = vld [vmem:[#allocation35_spill] sm:$0xff] }
 0x483   :  { %v1709_v48 = vmul.f32 %v1704_v17, %v4311_v59  ;;  %v1708_v57 = vadd.f32 0.5, %v1707_v56  ;;  %v5624_v59 = vld [vmem:[#allocation24_spill] sm:$0xff] }
 0x484   :  { %v5636_v17 = vld [vmem:[#allocation36_spill] sm:$0xff] }
 0x485   :  { %v4557_v19 = vadd.f32 %v1710_v32, %v1709_v48  ;;  %v5637_v32 = vld [vmem:[#allocation37_spill] sm:$0xff]  ;;  %v5638_v48 = vld [vmem:[#allocation63_spill] sm:$0xff]  ;;  %v5640_v56 = vld [vmem:[#allocation64_spill] sm:$0xff] }
 0x487   :  { %3144 = vtanh.f32 %v4557_v19 }
 0x491   :  { %v3145_v62 = vpop.eup %3144 }
 0x492   :  { %v1713_v47 = vmul.f32 %v3145_v62, %v1708_v57  ;;  %v5641_v57 = vld [vmem:[#allocation66_spill] sm:$0xff] }
 0x493   :  { %v5642_v62 = vld [vmem:[#allocation38_spill] sm:$0xff] }
 0x494   :  { %v1714_v37 = vpack.c.bf16 %v1713_v47, %v1713_v47  ;;  %v5643_v47 = vld [vmem:[#allocation39_spill] sm:$0xff] }
 0x496   :  { %1749 = vmatmul.mubr.bf16.vlgmr.msra.gmra.mrb[44].mxu0 %v1714_v37  ;;  %1790 = vmatmul.mubr.bf16.vlgmr.msra.gmra.mrb[44].mxu1 %v1714_v37 }
 0x497   :  { %1818 = vmatpush1.bf16.msra.mxu0 %v4142_v14  ;;  %1859 = vmatpush1.bf16.msra.mxu1 %v4145_v1 }
 0x498   :  { %1819 = vmatprep.subr.bf16.mxu0 %v4148_v18  ;;  %1860 = vmatprep.subr.bf16.mxu1 %v4151_v2 }
 0x499   :  { %1849 = vmatprep.mubr.bf16.mxu0 %v5443_v0  ;;  %1890 = vmatprep.mubr.bf16.mxu1 %v5443_v0 }
 0x49b   :  { %1820 = vmatpush1.bf16.msra.mxu0 %v4156_v6  ;;  %1861 = vmatpush1.bf16.msra.mxu1 %v4159_v23 }
 0x49c   :  { %1821 = vmatprep.subr.bf16.mxu0 %v4162_v4  ;;  %1862 = vmatprep.subr.bf16.mxu1 %v4165_v12 }
 0x49f   :  { %1822 = vmatpush1.bf16.msra.mxu0 %v4168_v16  ;;  %1863 = vmatpush1.bf16.msra.mxu1 %v4171_v10 }
 0x4a0   :  { %1823 = vmatprep.subr.bf16.mxu0 %v4174_v33  ;;  %1864 = vmatprep.subr.bf16.mxu1 %v4177_v53 }
 0x4a3   :  { %1824 = vmatpush1.bf16.msra.mxu0 %v4180_v11  ;;  %1865 = vmatpush1.bf16.msra.mxu1 %v4183_v38 }
 0x4a4   :  { %1825 = vmatprep.subr.bf16.mxu0 %v5557_v28  ;;  %1866 = vmatprep.subr.bf16.mxu1 %v5558_v20 }
 0x4a7   :  { %1826 = vmatpush1.bf16.msra.mxu0 %v5559_v21  ;;  %1867 = vmatpush1.bf16.msra.mxu1 %v5560_v22 }
 0x4a8   :  { %1827 = vmatprep.subr.bf16.mxu0 %v5561_v24  ;;  %1868 = vmatprep.subr.bf16.mxu1 %v5562_v25 }
 0x4ab   :  { %1828 = vmatpush1.bf16.msra.mxu0 %v5563_v26  ;;  %1869 = vmatpush1.bf16.msra.mxu1 %v5564_v27 }
 0x4ac   :  { %1829 = vmatprep.subr.bf16.mxu0 %v4210_v9  ;;  %1870 = vmatprep.subr.bf16.mxu1 %v4213_v3 }
 0x4af   :  { %1830 = vmatpush1.bf16.msra.mxu0 %v4216_v5  ;;  %1871 = vmatpush1.bf16.msra.mxu1 %v4219_v8 }
 0x4b0   :  { %1831 = vmatprep.subr.bf16.mxu0 %v4222_v7  ;;  %1872 = vmatprep.subr.bf16.mxu1 %v4343_v29 }
 0x4b3   :  { %1832 = vmatpush1.bf16.msra.mxu0 %v4226_v43  ;;  %1873 = vmatpush1.bf16.msra.mxu1 %v4347_v30 }
 0x4b4   :  { %1920 = vmatprep.subr.bf16.mxu0 %v4350_v31  ;;  %1961 = vmatprep.subr.bf16.mxu1 %v4353_v35 }
 0x4b6   :  { %1850 = vmatmul.mubr.bf16.vlgmr.msra.gmra.mrb[48].mxu0 %v1714_v37  ;;  %1891 = vmatmul.mubr.bf16.vlgmr.msra.gmra.mrb[48].mxu1 %v1714_v37  ;;  %v5644_v37 = vld [vmem:[#allocation40_spill] sm:$0xff] }
 0x4b7   :  { %1921 = vmatpush1.bf16.msra.mxu0 %v4356_v36  ;;  %1962 = vmatpush1.bf16.msra.mxu1 %v4359_v39 }
 0x4b8   :  { %1922 = vmatprep.subr.bf16.mxu0 %v4362_v40  ;;  %1963 = vmatprep.subr.bf16.mxu1 %v4365_v41 }
 0x4bb   :  { %1923 = vmatpush1.bf16.msra.mxu0 %v4368_v44  ;;  %1964 = vmatpush1.bf16.msra.mxu1 %v4371_v45 }
 0x4bc   :  { %1924 = vmatprep.subr.bf16.mxu0 %v4374_v46  ;;  %1965 = vmatprep.subr.bf16.mxu1 %v4377_v49 }
 0x4bf   :  { %1925 = vmatpush1.bf16.msra.mxu0 %v5624_v59  ;;  %1966 = vmatpush1.bf16.msra.mxu1 %v5625_v63 }
 0x4c0   :  { %1926 = vmatprep.subr.bf16.mxu0 %v5626_v50  ;;  %1967 = vmatprep.subr.bf16.mxu1 %v5627_v58 }
 0x4c3   :  { %1927 = vmatpush1.bf16.msra.mxu0 %v5628_v55  ;;  %1968 = vmatpush1.bf16.msra.mxu1 %v5629_v52 }
 0x4c4   :  { %1928 = vmatprep.subr.bf16.mxu0 %v5630_v54  ;;  %1969 = vmatprep.subr.bf16.mxu1 %v5631_v60 }
 0x4c7   :  { %1929 = vmatpush1.bf16.msra.mxu0 %v5632_v61  ;;  %1970 = vmatpush1.bf16.msra.mxu1 %v5633_v15 }
 0x4c8   :  { %1930 = vmatprep.subr.bf16.mxu0 %v5634_v34  ;;  %1971 = vmatprep.subr.bf16.mxu1 %v5635_v51  ;;  %v5645_v34 = vld [vmem:[#allocation41_spill] sm:$0xff]  ;;  %v5646_v51 = vld [vmem:[#allocation42_spill] sm:$0xff] }
 0x4cb   :  { %1931 = vmatpush1.bf16.msra.mxu0 %v5636_v17  ;;  %1972 = vmatpush1.bf16.msra.mxu1 %v5637_v32  ;;  %v5647_v17 = vld [vmem:[#allocation43_spill] sm:$0xff]  ;;  %v5648_v32 = vld [vmem:[#allocation44_spill] sm:$0xff] }
 0x4cc   :  { %1932 = vmatprep.subr.bf16.mxu0 %v5638_v48  ;;  %1973 = vmatprep.subr.bf16.mxu1 %v5639_v13  ;;  %v5649_v48 = vld [vmem:[#allocation45_spill] sm:$0xff]  ;;  %v5650_v13 = vld [vmem:[#allocation46_spill] sm:$0xff] }
 0x4cf   :  { %1933 = vmatpush1.bf16.msra.mxu0 %v5640_v56  ;;  %1974 = vmatpush1.bf16.msra.mxu1 %v5641_v57  ;;  %v5651_v56 = vld [vmem:[#allocation47_spill] sm:$0xff]  ;;  %v5652_v57 = vld [vmem:[#allocation48_spill] sm:$0xff] }
 0x4d0   :  { %1934 = vmatprep.subr.bf16.mxu0 %v5642_v62  ;;  %1975 = vmatprep.subr.bf16.mxu1 %v5643_v47  ;;  %v5653_v62 = vld [vmem:[#allocation49_spill] sm:$0xff]  ;;  %v5654_v47 = vld [vmem:[#allocation50_spill] sm:$0xff] }
 0x4d3   :  { %1935 = vmatpush1.bf16.msra.mxu0 %v5644_v37  ;;  %1976 = vmatpush1.bf16.msra.mxu1 %v5645_v34  ;;  %v5655_v37 = vld [vmem:[#allocation51_spill] sm:$0xff]  ;;  %v5656_v34 = vld [vmem:[#allocation52_spill] sm:$0xff] }
 0x4d4   :  { %1936 = vmatprep.subr.bf16.mxu0 %v5646_v51  ;;  %1977 = vmatprep.subr.bf16.mxu1 %v5647_v17  ;;  %v5657_v51 = vld [vmem:[#allocation53_spill] sm:$0xff]  ;;  %v5658_v17 = vld [vmem:[#allocation54_spill] sm:$0xff] }
 0x4d7   :  { %1937 = vmatpush1.bf16.msra.mxu0 %v5648_v32  ;;  %1978 = vmatpush1.bf16.msra.mxu1 %v5649_v48  ;;  %v5659_v32 = vld [vmem:[#allocation55_spill] sm:$0xff]  ;;  %v5660_v48 = vld [vmem:[#allocation56_spill] sm:$0xff] }
 0x4d8   :  { %1938 = vmatprep.subr.bf16.mxu0 %v5650_v13  ;;  %1979 = vmatprep.subr.bf16.mxu1 %v5651_v56  ;;  %v5661_v13 = vld [vmem:[#allocation57_spill] sm:$0xff]  ;;  %v5662_v56 = vld [vmem:[#allocation58_spill] sm:$0xff] }
 0x4db   :  { %1939 = vmatpush1.bf16.msra.mxu0 %v5652_v57  ;;  %1980 = vmatpush1.bf16.msra.mxu1 %v5653_v62  ;;  %v5663_v57 = vld [vmem:[#allocation59_spill] sm:$0xff]  ;;  %v5664_v62 = vld [vmem:[#allocation60_spill] sm:$0xff] }
 0x4dc   :  { %1940 = vmatprep.subr.bf16.mxu0 %v5654_v47  ;;  %1981 = vmatprep.subr.bf16.mxu1 %v5655_v37  ;;  %v5665_v47 = vld [vmem:[#allocation61_spill] sm:$0xff]  ;;  %v5666_v37 = vld [vmem:[#allocation62_spill] sm:$0xff] }
 0x4df   :  { %1941 = vmatpush1.bf16.msra.mxu0 %v5656_v34  ;;  %1982 = vmatpush1.bf16.msra.mxu1 %v5657_v51  ;;  %v5667_v34 = vld [vmem:[#allocation9_spill] sm:$0xff]  ;;  %v5668_v51 = vld [vmem:[#allocation10_spill] sm:$0xff] }
 0x4e0   :  { %1942 = vmatprep.subr.bf16.mxu0 %v5658_v17  ;;  %1983 = vmatprep.subr.bf16.mxu1 %v5659_v32  ;;  %v5669_v17 = vld [vmem:[#allocation15_spill] sm:$0xff] }
 0x4e1   :  { %v5670_v32 = vld [vmem:[#allocation67_spill] sm:$0xff] }
 0x4e3   :  { %1943 = vmatpush1.bf16.msra.mxu0 %v5660_v48  ;;  %1984 = vmatpush1.bf16.msra.mxu1 %v5661_v13  ;;  %v5671_v48 = vld [vmem:[#allocation69_spill] sm:$0xff]  ;;  %v5672_v13 = vld [vmem:[#allocation68_spill] sm:$0xff] }
 0x4e4   :  { %1944 = vmatprep.subr.bf16.mxu0 %v5662_v56  ;;  %1985 = vmatprep.subr.bf16.mxu1 %v5663_v57  ;;  %v5673_v56 = vld [vmem:[#allocation70_spill] sm:$0xff]  ;;  %v5674_v57 = vld [vmem:[#allocation16_spill] sm:$0xff] }
 0x4e7   :  { %1945 = vmatpush1.bf16.msra.mxu0 %v5664_v62  ;;  %1986 = vmatpush1.bf16.msra.mxu1 %v5665_v47  ;;  %v5675_v62 = vld [vmem:[#allocation17_spill] sm:$0xff]  ;;  %v5676_v47 = vld [vmem:[#allocation18_spill] sm:$0xff] }
 0x4e8   :  { %1946 = vmatprep.subr.bf16.mxu0 %v5666_v37  ;;  %1987 = vmatprep.subr.bf16.mxu1 %v5667_v34  ;;  %v5677_v37 = vld [vmem:[#allocation19_spill] sm:$0xff] }
 0x4e9   :  { %v4656_v34 = vld [vmem:[#allocation3 + $0x4] ss:$16 sps:$4 sm:$0xff]  }
 0x4ea   :  { %5678 = vst [vmem:[#allocation21_spill] sm:$0xff] %v4656_v34 }
 0x4eb   :  { %1947 = vmatpush1.bf16.msra.mxu0 %v5668_v51  ;;  %1988 = vmatpush1.bf16.msra.mxu1 %v5669_v17  ;;  %v4659_v17 = vld [vmem:[#allocation3 + $0xc] ss:$16 sps:$4 sm:$0xff]  }
 0x4ec   :  { %1948 = vmatprep.subr.bf16.mxu0 %v5670_v32  ;;  %1989 = vmatprep.subr.bf16.mxu1 %v5671_v48  ;;  %5679 = vst [vmem:[#allocation22_spill] sm:$0xff] %v4659_v17  ;;  %v5680_v32 = vld [vmem:[#allocation11_spill] sm:$0xff] }
 0x4ef   :  { %1949 = vmatpush1.bf16.msra.mxu0 %v5672_v13  ;;  %1990 = vmatpush1.bf16.msra.mxu1 %v5673_v56 }
 0x4f0   :  { %1950 = vmatprep.subr.bf16.mxu0 %v5674_v57  ;;  %1991 = vmatprep.subr.bf16.mxu1 %v5675_v62 }
 0x4f3   :  { %1951 = vmatpush1.bf16.msra.mxu0 %v5676_v47  ;;  %1992 = vmatpush1.bf16.msra.mxu1 %v5677_v37  ;;  %v5681_v37 = vld [vmem:[#allocation13_spill] sm:$0xff] }
 0x4f4   :  { %2021 = vmatprep.subr.bf16.mxu0 %v4656_v34  ;;  %2062 = vmatprep.subr.bf16.mxu1 %v4659_v17  ;;  %v5682_v34 = vld [vmem:[#allocation14_spill] sm:$0xff] }
 0x569   :  { %v1750_v48 = vpop.f32.mrb[44].mxu0  ;;  %v1791_v13 = vpop.f32.mrb[44].mxu1 }
 0x56a   :  { %v1751_v56 = vadd.f32 %v1750_v48, %v5680_v32  ;;  %v1752_v51 = vpop.f32.mrb[45].mxu0  ;;  %v1793_v57 = vpop.f32.mrb[45].mxu1  ;;  %v1792_v61 = vadd.f32 %v1791_v13, %v5681_v37 }
 0x56b   :  { %v1753_v62 = vadd.f32 %v1752_v51, %v5549_v42  ;;  %v1754_v15 = vpop.f32.mrb[46].mxu0  ;;  %v1795_v47 = vpop.f32.mrb[46].mxu1  ;;  %v1794_v52 = vadd.f32 %v1793_v57, %v5682_v34  ;;  %v5686_v34 = vld [vmem:[#allocation77_spill] sm:$0xff] }
 0x56c   :  { %3146 = vtanh.f32 %v1751_v56  ;;  %v1755_v60 = vpop.f32.mrb[47].mxu0  ;;  %v1796_v54 = vpop.f32.mrb[47].mxu1  ;;  %v5683_v15 = vld [vmem:[#allocation20_spill] sm:$0xff] }
 0x56d   :  { %3148 = vtanh.f32 %v1753_v62  ;;  %v5685_v62 = vld [vmem:[#allocation75_spill] sm:$0xff] }
 0x56e   :  { %3150 = vtanh.f32 %v1792_v61 }
 0x56f   :  { %3152 = vtanh.f32 %v1794_v52 }
 0x576   :  { %v3147_v17 = vpop.eup %3146 }
 0x577   :  { %v1799_v55 = vmul.f32 0.5, %v3147_v17  ;;  %v3149_v58 = vpop.eup %3148 }
 0x578   :  { %v1802_v48 = vmul.f32 0.5, %v3149_v58  ;;  %v3151_v32 = vpop.eup %3150 }
 0x579   :  { %v1800_v50 = vadd.f32 0.5, %v1799_v55  ;;  %v3153_v54 = vpop.eup %3152 }
 0x57a   :  { %v1803_v63 = vadd.f32 0.5, %v1802_v48  ;;  %v1806_v60 = vmul.f32 0.5, %v3153_v54  ;;  %v5687_v48 = vld [vmem:[#allocation76_spill] sm:$0xff] }
 0x57b   :  { %v1809_v51 = vmul.f32 %v3151_v32, %v1800_v50  ;;  %v5688_v32 = vld [vmem:[#allocation78_spill] sm:$0xff] }
 0x57c   :  { %v1808_v47 = vmul.f32 %v1803_v63, %v5683_v15  ;;  %v1807_v57 = vadd.f32 0.5, %v1806_v60 }
 0x57e   :  { %v4667_v56 = vadd.f32 %v1809_v51, %v1808_v47 }
 0x580   :  { %5684 = vst [vmem:[#allocation23_spill] sm:$0xff] %v4667_v56  ;;  %3154 = vtanh.f32 %v4667_v56 }
 0x589   :  { %v1851_v61 = vpop.f32.mrb[48].mxu0  ;;  %v1892_v13 = vpop.f32.mrb[48].mxu1 }
 0x58a   :  { %v1899_v17 = vadd.f32 %v1851_v61, %v5685_v62  ;;  %v1901_v55 = vadd.f32 %v1892_v13, %v5686_v34  ;;  %v1853_v58 = vpop.f32.mrb[49].mxu0  ;;  %v1894_v52 = vpop.f32.mrb[49].mxu1 }
 0x58b   :  { %v3155_v37 = vpop.eup %3154  ;;  %v1900_v50 = vadd.f32 %v1853_v58, %v5687_v48  ;;  %v1902_v63 = vadd.f32 %v1894_v52, %v5688_v32  ;;  %v1855_v51 = vpop.f32.mrb[50].mxu0 }
 0x58c   :  { %v1896_v15 = vpop.f32.mrb[50].mxu1  ;;  %3156 = vtanh.f32 %v1899_v17  ;;  %v1856_v47 = vpop.f32.mrb[51].mxu0  ;;  %v1812_v54 = vmul.f32 %v3155_v37, %v1807_v57  ;;  %v5719_v51 = vld [vmem:[#allocation51_spill] sm:$0xff] }
 0x58d   :  { %v1897_v56 = vpop.f32.mrb[51].mxu1  ;;  %3158 = vtanh.f32 %v1900_v50  ;;  %v5720_v15 = vld [vmem:[#allocation52_spill] sm:$0xff]  ;;  %v5721_v47 = vld [vmem:[#allocation53_spill] sm:$0xff] }
 0x58e   :  { %v1919_v42 = vpack.c.bf16 %v1812_v54, %v1812_v54  ;;  %3160 = vtanh.f32 %v1901_v55  ;;  %v5722_v54 = vld [vmem:[#allocation54_spill] sm:$0xff] }
 0x58f   :  { %3162 = vtanh.f32 %v1902_v63  ;;  %v5718_v63 = vld [vmem:[#allocation50_spill] sm:$0xff] }
 0x590   :  { %1952 = vmatprep.mubr.bf16.mxu0 %v1919_v42  ;;  %1993 = vmatprep.mubr.bf16.mxu1 %v1919_v42 }
 0x596   :  { %v3157_v60 = vpop.eup %3156 }
 0x597   :  { %v1904_v34 = vmul.f32 0.5, %v3157_v60  ;;  %v3159_v61 = vpop.eup %3158  ;;  %v5723_v60 = vld [vmem:[#allocation55_spill] sm:$0xff] }
 0x598   :  { %v1907_v62 = vmul.f32 0.5, %v3159_v61  ;;  %v3161_v58 = vpop.eup %3160  ;;  %v5725_v61 = vld [vmem:[#allocation57_spill] sm:$0xff] }
 0x599   :  { %v1905_v13 = vadd.f32 0.5, %v1904_v34  ;;  %v3163_v37 = vpop.eup %3162  ;;  %v5724_v34 = vld [vmem:[#allocation56_spill] sm:$0xff] }
 0x59a   :  { %v1908_v48 = vadd.f32 0.5, %v1907_v62  ;;  %v1911_v56 = vmul.f32 0.5, %v3163_v37  ;;  %v5727_v62 = vld [vmem:[#allocation59_spill] sm:$0xff]  ;;  %v5732_v37 = vld [vmem:[#allocation10_spill] sm:$0xff] }
 0x59b   :  { %v1914_v52 = vmul.f32 %v3161_v58, %v1905_v13  ;;  %v5726_v13 = vld [vmem:[#allocation58_spill] sm:$0xff]  ;;  %v5728_v58 = vld [vmem:[#allocation60_spill] sm:$0xff] }
 0x59c   :  { %v1913_v32 = vmul.f32 %v1908_v48, %v4557_v19  ;;  %v1912_v57 = vadd.f32 0.5, %v1911_v56  ;;  %v5717_v19 = vld [vmem:[#allocation49_spill] sm:$0xff]  ;;  %v5733_v56 = vld [vmem:[#allocation15_spill] sm:$0xff] }
 0x59d   :  { %v5729_v48 = vld [vmem:[#allocation61_spill] sm:$0xff] }
 0x59e   :  { %v4675_v17 = vadd.f32 %v1914_v52, %v1913_v32  ;;  %v5730_v52 = vld [vmem:[#allocation62_spill] sm:$0xff]  ;;  %v5731_v32 = vld [vmem:[#allocation9_spill] sm:$0xff] }
 0x5a0   :  { %3164 = vtanh.f32 %v4675_v17 }
 0x5aa   :  { %v3165_v55 = vpop.eup %3164 }
 0x5ab   :  { %v1917_v42 = vmul.f32 %v3165_v55, %v1912_v57  ;;  %v5734_v57 = vld [vmem:[#allocation67_spill] sm:$0xff]  ;;  %v5735_v55 = vld [vmem:[#allocation69_spill] sm:$0xff] }
 0x5ad   :  { %v1918_v50 = vpack.c.bf16 %v1917_v42, %v1917_v42  ;;  %v5736_v42 = vld [vmem:[#allocation68_spill] sm:$0xff] }
 0x5af   :  { %1953 = vmatmul.mubr.bf16.vlgmr.msra.gmra.mrb[52].mxu0 %v1918_v50  ;;  %1994 = vmatmul.mubr.bf16.vlgmr.msra.gmra.mrb[52].mxu1 %v1918_v50 }
 0x5b0   :  { %2022 = vmatpush1.bf16.msra.mxu0 %v4142_v14  ;;  %2063 = vmatpush1.bf16.msra.mxu1 %v4145_v1  ;;  %v5689_v14 = vld [vmem:[#allocation25_spill] sm:$0xff]  ;;  %v5690_v1 = vld [vmem:[#allocation26_spill] sm:$0xff] }
 0x5b1   :  { %2023 = vmatprep.subr.bf16.mxu0 %v4148_v18  ;;  %2064 = vmatprep.subr.bf16.mxu1 %v4151_v2  ;;  %v5691_v18 = vld [vmem:[#allocation27_spill] sm:$0xff]  ;;  %v5692_v2 = vld [vmem:[#allocation28_spill] sm:$0xff] }
 0x5b2   :  { %2053 = vmatprep.mubr.bf16.mxu0 %v5443_v0  ;;  %2094 = vmatprep.mubr.bf16.mxu1 %v5443_v0 }
 0x5b4   :  { %2024 = vmatpush1.bf16.msra.mxu0 %v4156_v6  ;;  %2065 = vmatpush1.bf16.msra.mxu1 %v4159_v23  ;;  %v5693_v6 = vld [vmem:[#allocation29_spill] sm:$0xff]  ;;  %v5694_v23 = vld [vmem:[#allocation30_spill] sm:$0xff] }
 0x5b5   :  { %2025 = vmatprep.subr.bf16.mxu0 %v4162_v4  ;;  %2066 = vmatprep.subr.bf16.mxu1 %v4165_v12  ;;  %v5695_v4 = vld [vmem:[#allocation31_spill] sm:$0xff]  ;;  %v5696_v12 = vld [vmem:[#allocation32_spill] sm:$0xff] }
 0x5b8   :  { %2026 = vmatpush1.bf16.msra.mxu0 %v4168_v16  ;;  %2067 = vmatpush1.bf16.msra.mxu1 %v4171_v10  ;;  %v5697_v16 = vld [vmem:[#allocation33_spill] sm:$0xff]  ;;  %v5698_v10 = vld [vmem:[#allocation34_spill] sm:$0xff] }
 0x5b9   :  { %2027 = vmatprep.subr.bf16.mxu0 %v4174_v33  ;;  %2068 = vmatprep.subr.bf16.mxu1 %v4177_v53  ;;  %v5699_v33 = vld [vmem:[#allocation35_spill] sm:$0xff]  ;;  %v5700_v53 = vld [vmem:[#allocation36_spill] sm:$0xff] }
 0x5bc   :  { %2028 = vmatpush1.bf16.msra.mxu0 %v4180_v11  ;;  %2069 = vmatpush1.bf16.msra.mxu1 %v4183_v38  ;;  %v5701_v11 = vld [vmem:[#allocation37_spill] sm:$0xff]  ;;  %v5702_v38 = vld [vmem:[#allocation63_spill] sm:$0xff] }
 0x5bd   :  { %2029 = vmatprep.subr.bf16.mxu0 %v5557_v28  ;;  %2070 = vmatprep.subr.bf16.mxu1 %v5558_v20  ;;  %v5709_v28 = vld [vmem:[#allocation41_spill] sm:$0xff]  ;;  %v5710_v20 = vld [vmem:[#allocation42_spill] sm:$0xff] }
 0x5c0   :  { %2030 = vmatpush1.bf16.msra.mxu0 %v5559_v21  ;;  %2071 = vmatpush1.bf16.msra.mxu1 %v5560_v22  ;;  %v5711_v21 = vld [vmem:[#allocation43_spill] sm:$0xff]  ;;  %v5712_v22 = vld [vmem:[#allocation44_spill] sm:$0xff] }
 0x5c1   :  { %2031 = vmatprep.subr.bf16.mxu0 %v5561_v24  ;;  %2072 = vmatprep.subr.bf16.mxu1 %v5562_v25  ;;  %v5713_v24 = vld [vmem:[#allocation45_spill] sm:$0xff]  ;;  %v5714_v25 = vld [vmem:[#allocation46_spill] sm:$0xff] }
 0x5c4   :  { %2032 = vmatpush1.bf16.msra.mxu0 %v5563_v26  ;;  %2073 = vmatpush1.bf16.msra.mxu1 %v5564_v27  ;;  %v5715_v26 = vld [vmem:[#allocation47_spill] sm:$0xff]  ;;  %v5716_v27 = vld [vmem:[#allocation48_spill] sm:$0xff] }
 0x5c5   :  { %2033 = vmatprep.subr.bf16.mxu0 %v4210_v9  ;;  %2074 = vmatprep.subr.bf16.mxu1 %v4213_v3  ;;  %v5705_v9 = vld [vmem:[#allocation66_spill] sm:$0xff] }
 0x5c6   :  { %v5706_v3 = vld [vmem:[#allocation38_spill] sm:$0xff] }
 0x5c8   :  { %2034 = vmatpush1.bf16.msra.mxu0 %v4216_v5  ;;  %2075 = vmatpush1.bf16.msra.mxu1 %v4219_v8  ;;  %v5707_v5 = vld [vmem:[#allocation39_spill] sm:$0xff]  ;;  %v5708_v8 = vld [vmem:[#allocation40_spill] sm:$0xff] }
 0x5c9   :  { %2035 = vmatprep.subr.bf16.mxu0 %v4222_v7  ;;  %2076 = vmatprep.subr.bf16.mxu1 %v4343_v29  ;;  %v5703_v7 = vld [vmem:[#allocation65_spill] sm:$0xff] }
 0x5cc   :  { %2036 = vmatpush1.bf16.msra.mxu0 %v4226_v43  ;;  %2077 = vmatpush1.bf16.msra.mxu1 %v4347_v30  ;;  %v5704_v43 = vld [vmem:[#allocation64_spill] sm:$0xff] }
 0x5cd   :  { %2124 = vmatprep.subr.bf16.mxu0 %v4350_v31  ;;  %2165 = vmatprep.subr.bf16.mxu1 %v4353_v35 }
 0x5cf   :  { %2054 = vmatmul.mubr.bf16.vlgmr.msra.gmra.mrb[56].mxu0 %v1918_v50  ;;  %2095 = vmatmul.mubr.bf16.vlgmr.msra.gmra.mrb[56].mxu1 %v1918_v50  ;;  %v5737_v50 = vld [vmem:[#allocation70_spill] sm:$0xff] }
 0x5d0   :  { %2125 = vmatpush1.bf16.msra.mxu0 %v4356_v36  ;;  %2166 = vmatpush1.bf16.msra.mxu1 %v4359_v39 }
 0x5d1   :  { %2126 = vmatprep.subr.bf16.mxu0 %v4362_v40  ;;  %2167 = vmatprep.subr.bf16.mxu1 %v4365_v41 }
 0x5d4   :  { %2127 = vmatpush1.bf16.msra.mxu0 %v4368_v44  ;;  %2168 = vmatpush1.bf16.msra.mxu1 %v4371_v45 }
 0x5d5   :  { %2128 = vmatprep.subr.bf16.mxu0 %v4374_v46  ;;  %2169 = vmatprep.subr.bf16.mxu1 %v4377_v49 }
 0x5d8   :  { %2129 = vmatpush1.bf16.msra.mxu0 %v5624_v59  ;;  %2170 = vmatpush1.bf16.msra.mxu1 %v5689_v14 }
 0x5d9   :  { %2130 = vmatprep.subr.bf16.mxu0 %v5690_v1  ;;  %2171 = vmatprep.subr.bf16.mxu1 %v5691_v18 }
 0x5dc   :  { %2131 = vmatpush1.bf16.msra.mxu0 %v5692_v2  ;;  %2172 = vmatpush1.bf16.msra.mxu1 %v5693_v6 }
 0x5dd   :  { %2132 = vmatprep.subr.bf16.mxu0 %v5694_v23  ;;  %2173 = vmatprep.subr.bf16.mxu1 %v5695_v4 }
 0x5e0   :  { %2133 = vmatpush1.bf16.msra.mxu0 %v5696_v12  ;;  %2174 = vmatpush1.bf16.msra.mxu1 %v5697_v16 }
 0x5e1   :  { %2134 = vmatprep.subr.bf16.mxu0 %v5698_v10  ;;  %2175 = vmatprep.subr.bf16.mxu1 %v5699_v33 }
 0x5e4   :  { %2135 = vmatpush1.bf16.msra.mxu0 %v5700_v53  ;;  %2176 = vmatpush1.bf16.msra.mxu1 %v5701_v11 }
 0x5e5   :  { %2136 = vmatprep.subr.bf16.mxu0 %v5702_v38  ;;  %2177 = vmatprep.subr.bf16.mxu1 %v5703_v7 }
 0x5e8   :  { %2137 = vmatpush1.bf16.msra.mxu0 %v5704_v43  ;;  %2178 = vmatpush1.bf16.msra.mxu1 %v5705_v9 }
 0x5e9   :  { %2138 = vmatprep.subr.bf16.mxu0 %v5706_v3  ;;  %2179 = vmatprep.subr.bf16.mxu1 %v5707_v5 }
 0x5ec   :  { %2139 = vmatpush1.bf16.msra.mxu0 %v5708_v8  ;;  %2180 = vmatpush1.bf16.msra.mxu1 %v5709_v28 }
 0x5ed   :  { %2140 = vmatprep.subr.bf16.mxu0 %v5710_v20  ;;  %2181 = vmatprep.subr.bf16.mxu1 %v5711_v21 }
 0x5f0   :  { %2141 = vmatpush1.bf16.msra.mxu0 %v5712_v22  ;;  %2182 = vmatpush1.bf16.msra.mxu1 %v5713_v24 }
 0x5f1   :  { %2142 = vmatprep.subr.bf16.mxu0 %v5714_v25  ;;  %2183 = vmatprep.subr.bf16.mxu1 %v5715_v26 }
 0x5f4   :  { %2143 = vmatpush1.bf16.msra.mxu0 %v5716_v27  ;;  %2184 = vmatpush1.bf16.msra.mxu1 %v5717_v19 }
 0x5f5   :  { %2144 = vmatprep.subr.bf16.mxu0 %v5718_v63  ;;  %2185 = vmatprep.subr.bf16.mxu1 %v5719_v51 }
 0x5f8   :  { %2145 = vmatpush1.bf16.msra.mxu0 %v5720_v15  ;;  %2186 = vmatpush1.bf16.msra.mxu1 %v5721_v47 }
 0x5f9   :  { %2146 = vmatprep.subr.bf16.mxu0 %v5722_v54  ;;  %2187 = vmatprep.subr.bf16.mxu1 %v5723_v60 }
 0x5fc   :  { %2147 = vmatpush1.bf16.msra.mxu0 %v5724_v34  ;;  %2188 = vmatpush1.bf16.msra.mxu1 %v5725_v61  ;;  %v5745_v34 = vld [vmem:[#allocation12_spill] sm:$0xff] }
 0x5fd   :  { %2148 = vmatprep.subr.bf16.mxu0 %v5726_v13  ;;  %2189 = vmatprep.subr.bf16.mxu1 %v5727_v62  ;;  %v5738_v62 = vld [vmem:[#allocation16_spill] sm:$0xff]  ;;  %v5744_v13 = vld [vmem:[#allocation11_spill] sm:$0xff] }
 0x600   :  { %2149 = vmatpush1.bf16.msra.mxu0 %v5728_v58  ;;  %2190 = vmatpush1.bf16.msra.mxu1 %v5729_v48  ;;  %v5739_v58 = vld [vmem:[#allocation17_spill] sm:$0xff]  ;;  %v5740_v48 = vld [vmem:[#allocation18_spill] sm:$0xff] }
 0x601   :  { %2150 = vmatprep.subr.bf16.mxu0 %v5730_v52  ;;  %2191 = vmatprep.subr.bf16.mxu1 %v5731_v32  ;;  %v5741_v52 = vld [vmem:[#allocation19_spill] sm:$0xff]  ;;  %v5742_v32 = vld [vmem:[#allocation21_spill] sm:$0xff] }
 0x604   :  { %2151 = vmatpush1.bf16.msra.mxu0 %v5732_v37  ;;  %2192 = vmatpush1.bf16.msra.mxu1 %v5733_v56  ;;  %v5743_v37 = vld [vmem:[#allocation22_spill] sm:$0xff] }
 0x605   :  { %2152 = vmatprep.subr.bf16.mxu0 %v5734_v57  ;;  %2193 = vmatprep.subr.bf16.mxu1 %v5735_v55 }
 0x608   :  { %2153 = vmatpush1.bf16.msra.mxu0 %v5736_v42  ;;  %2194 = vmatpush1.bf16.msra.mxu1 %v5737_v50 }
 0x609   :  { %2154 = vmatprep.subr.bf16.mxu0 %v5738_v62  ;;  %2195 = vmatprep.subr.bf16.mxu1 %v5739_v58  ;;  %v5746_v58 = vld [vmem:[#allocation13_spill] sm:$0xff] }
 0x60c   :  { %2155 = vmatpush1.bf16.msra.mxu0 %v5740_v48  ;;  %2196 = vmatpush1.bf16.msra.mxu1 %v5741_v52 }
 0x60d   :  { %2225 = vmatprep.subr.bf16.mxu0 %v5742_v32  ;;  %2266 = vmatprep.subr.bf16.mxu1 %v5743_v37  ;;  %v5747_v32 = vld [vmem:[#allocation14_spill] sm:$0xff] }
 0x682   :  { %v1954_v56 = vpop.f32.mrb[52].mxu0  ;;  %v1995_v57 = vpop.f32.mrb[52].mxu1 }
 0x683   :  { %v1955_v55 = vadd.f32 %v1954_v56, %v5744_v13  ;;  %v1956_v61 = vpop.f32.mrb[53].mxu0  ;;  %v1997_v42 = vpop.f32.mrb[53].mxu1  ;;  %v1996_v54 = vadd.f32 %v1995_v57, %v5746_v58 }
 0x684   :  { %v1957_v50 = vadd.f32 %v1956_v61, %v5745_v34  ;;  %v1958_v60 = vpop.f32.mrb[54].mxu0  ;;  %v1999_v62 = vpop.f32.mrb[54].mxu1  ;;  %v1998_v52 = vadd.f32 %v1997_v42, %v5747_v32  ;;  %v5751_v32 = vld [vmem:[#allocation81_spill] sm:$0xff] }
 0x685   :  { %3166 = vtanh.f32 %v1955_v55  ;;  %v1959_v48 = vpop.f32.mrb[55].mxu0  ;;  %v2000_v47 = vpop.f32.mrb[55].mxu1  ;;  %v5748_v60 = vld [vmem:[#allocation23_spill] sm:$0xff] }
 0x686   :  { %3168 = vtanh.f32 %v1957_v50  ;;  %v5750_v50 = vld [vmem:[#allocation79_spill] sm:$0xff] }
 0x687   :  { %3170 = vtanh.f32 %v1996_v54 }
 0x688   :  { %3172 = vtanh.f32 %v1998_v52 }
 0x68f   :  { %v3167_v37 = vpop.eup %3166 }
 0x690   :  { %v2003_v15 = vmul.f32 0.5, %v3167_v37  ;;  %v3169_v51 = vpop.eup %3168 }
 0x691   :  { %v2006_v56 = vmul.f32 0.5, %v3169_v51  ;;  %v3171_v13 = vpop.eup %3170 }
 0x692   :  { %v2004_v63 = vadd.f32 0.5, %v2003_v15  ;;  %v3173_v47 = vpop.eup %3172 }
 0x693   :  { %v2007_v19 = vadd.f32 0.5, %v2006_v56  ;;  %v2010_v48 = vmul.f32 0.5, %v3173_v47  ;;  %v5752_v56 = vld [vmem:[#allocation80_spill] sm:$0xff] }
 0x694   :  { %v2013_v61 = vmul.f32 %v3171_v13, %v2004_v63  ;;  %v5753_v13 = vld [vmem:[#allocation82_spill] sm:$0xff] }
 0x695   :  { %v2012_v62 = vmul.f32 %v2007_v19, %v5748_v60  ;;  %v2011_v42 = vadd.f32 0.5, %v2010_v48 }
 0x697   :  { %v4781_v55 = vadd.f32 %v2013_v61, %v2012_v62 }
 0x699   :  { %5749 = vst [vmem:[#allocation71_spill] sm:$0xff] %v4781_v55  ;;  %3174 = vtanh.f32 %v4781_v55 }
 0x6a2   :  { %v2055_v54 = vpop.f32.mrb[56].mxu0  ;;  %v2096_v57 = vpop.f32.mrb[56].mxu1 }
 0x6a3   :  { %v2103_v37 = vadd.f32 %v2055_v54, %v5750_v50  ;;  %v2105_v15 = vadd.f32 %v2096_v57, %v5751_v32  ;;  %v2057_v51 = vpop.f32.mrb[57].mxu0  ;;  %v2098_v52 = vpop.f32.mrb[57].mxu1 }
 0x6a4   :  { %v3175_v58 = vpop.eup %3174  ;;  %v2104_v63 = vadd.f32 %v2057_v51, %v5752_v56  ;;  %v2106_v19 = vadd.f32 %v2098_v52, %v5753_v13  ;;  %v2059_v61 = vpop.f32.mrb[58].mxu0 }
 0x6a5   :  { %v2100_v60 = vpop.f32.mrb[58].mxu1  ;;  %3176 = vtanh.f32 %v2103_v37  ;;  %v2060_v62 = vpop.f32.mrb[59].mxu0  ;;  %v2016_v47 = vmul.f32 %v3175_v58, %v2011_v42  ;;  %v4802_v61 = vld [vmem:[#allocation3 + $0x24] ss:$16 sps:$4 sm:$0xff]  }
 0x6a6   :  { %v2101_v55 = vpop.f32.mrb[59].mxu1  ;;  %3178 = vtanh.f32 %v2104_v63  ;;  %v4805_v60 = vld [vmem:[#allocation3 + $0x2c] ss:$16 sps:$4 sm:$0xff]   ;;  %v4810_v62 = vld [vmem:[#allocation3 + $0x20] ss:$16 sps:$4 sm:$0xff]  }
 0x6a7   :  { %v2123_v34 = vpack.c.bf16 %v2016_v47, %v2016_v47  ;;  %3180 = vtanh.f32 %v2105_v15  ;;  %v4813_v47 = vld [vmem:[#allocation3 + $0x28] ss:$16 sps:$4 sm:$0xff]  }
 0x6a8   :  { %3182 = vtanh.f32 %v2106_v19  ;;  %v4796_v19 = vld [vmem:[#allocation3] ss:$16 sps:$4 sm:$0xff]  }
 0x6a9   :  { %2156 = vmatprep.mubr.bf16.mxu0 %v2123_v34  ;;  %2197 = vmatprep.mubr.bf16.mxu1 %v2123_v34 }
 0x6af   :  { %v3177_v48 = vpop.eup %3176 }
 0x6b0   :  { %v2108_v32 = vmul.f32 0.5, %v3177_v48  ;;  %v3179_v54 = vpop.eup %3178  ;;  %v4816_v48 = vld [vmem:[#allocation3 + $0x44] ss:$16 sps:$4 sm:$0xff]  }
 0x6b1   :  { %v2111_v50 = vmul.f32 0.5, %v3179_v54  ;;  %v3181_v51 = vpop.eup %3180  ;;  %v4822_v54 = vld [vmem:[#allocation3 + $0x40] ss:$16 sps:$4 sm:$0xff]  }
 0x6b2   :  { %v2109_v57 = vadd.f32 0.5, %v2108_v32  ;;  %v3183_v58 = vpop.eup %3182  ;;  %v4819_v32 = vld [vmem:[#allocation3 + $0x4c] ss:$16 sps:$4 sm:$0xff]  }
 0x6b3   :  { %v2112_v56 = vadd.f32 0.5, %v2111_v50  ;;  %v2115_v55 = vmul.f32 0.5, %v3183_v58  ;;  %v4828_v50 = vld [vmem:[#allocation3 + $0x64] ss:$16 sps:$4 sm:$0xff]   ;;  %v4843_v58 = vld [vmem:[#allocation3 + $0x8c] ss:$16 sps:$4 sm:$0xff]  }
 0x6b4   :  { %v2118_v52 = vmul.f32 %v3181_v51, %v2109_v57  ;;  %v4825_v57 = vld [vmem:[#allocation3 + $0x48] ss:$16 sps:$4 sm:$0xff]   ;;  %v4831_v51 = vld [vmem:[#allocation3 + $0x6c] ss:$16 sps:$4 sm:$0xff]   ;;  %5755 = vst [vmem:[#allocation72_spill] sm:$0xff] %v4843_v58 }
 0x6b5   :  { %v2117_v13 = vmul.f32 %v2112_v56, %v4675_v17  ;;  %v2116_v42 = vadd.f32 0.5, %v2115_v55  ;;  %v4799_v17 = vld [vmem:[#allocation3 + $0x8] ss:$16 sps:$4 sm:$0xff]   ;;  %v4834_v56 = vld [vmem:[#allocation3 + $0x60] ss:$16 sps:$4 sm:$0xff]  }
 0x6b6   :  { %v4846_v55 = vld [vmem:[#allocation3 + $0x80] ss:$16 sps:$4 sm:$0xff]  }
 0x6b7   :  { %v4789_v37 = vadd.f32 %v2118_v52, %v2117_v13  ;;  %v4837_v52 = vld [vmem:[#allocation3 + $0x68] ss:$16 sps:$4 sm:$0xff]   ;;  %v4840_v13 = vld [vmem:[#allocation3 + $0x84] ss:$16 sps:$4 sm:$0xff]   ;;  %5756 = vst [vmem:[#allocation74_spill] sm:$0xff] %v4846_v55 }
 0x6b8   :  { %5754 = vst [vmem:[#allocation73_spill] sm:$0xff] %v4840_v13 }
 0x6b9   :  { %3184 = vtanh.f32 %v4789_v37 }
 0x6c3   :  { %v3185_v15 = vpop.eup %3184 }
 0x6c4   :  { %v2121_v34 = vmul.f32 %v3185_v15, %v2116_v42  ;;  %v4849_v42 = vld [vmem:[#allocation3 + $0x88] ss:$16 sps:$4 sm:$0xff]   ;;  %v4852_v15 = vld [vmem:[#allocation3 + $0xa4] ss:$16 sps:$4 sm:$0xff]  }
 0x6c5   :  { %5757 = vst [vmem:[#allocation24_spill] sm:$0xff] %v4849_v42  ;;  %5758 = vst [vmem:[#allocation20_spill] sm:$0xff] %v4852_v15 }
 0x6c6   :  { %v4792_v63 = vpack.c.bf16 %v2121_v34, %v2121_v34  ;;  %v4855_v34 = vld [vmem:[#allocation3 + $0xac] ss:$16 sps:$4 sm:$0xff]  }
 0x6c7   :  { %5759 = vst [vmem:[#allocation75_spill] sm:$0xff] %v4855_v34 }
 0x6c8   :  { %2157 = vmatmul.mubr.bf16.vlgmr.msra.gmra.mrb[60].mxu0 %v4792_v63  ;;  %2198 = vmatmul.mubr.bf16.vlgmr.msra.gmra.mrb[60].mxu1 %v4792_v63 }
 0x6c9   :  { %2226 = vmatpush1.bf16.msra.mxu0 %v4796_v19  ;;  %2267 = vmatpush1.bf16.msra.mxu1 %v4799_v17 }
 0x6ca   :  { %2227 = vmatprep.subr.bf16.mxu0 %v4802_v61  ;;  %2268 = vmatprep.subr.bf16.mxu1 %v4805_v60 }
 0x6cb   :  { %2257 = vmatprep.mubr.bf16.mxu0 %v5443_v0  ;;  %2298 = vmatprep.mubr.bf16.mxu1 %v5443_v0 }
 0x6cd   :  { %2228 = vmatpush1.bf16.msra.mxu0 %v4810_v62  ;;  %2269 = vmatpush1.bf16.msra.mxu1 %v4813_v47 }
 0x6ce   :  { %2229 = vmatprep.subr.bf16.mxu0 %v4816_v48  ;;  %2270 = vmatprep.subr.bf16.mxu1 %v4819_v32 }
 0x6d1   :  { %2230 = vmatpush1.bf16.msra.mxu0 %v4822_v54  ;;  %2271 = vmatpush1.bf16.msra.mxu1 %v4825_v57 }
 0x6d2   :  { %2231 = vmatprep.subr.bf16.mxu0 %v4828_v50  ;;  %2272 = vmatprep.subr.bf16.mxu1 %v4831_v51 }
 0x6d5   :  { %2232 = vmatpush1.bf16.msra.mxu0 %v4834_v56  ;;  %2273 = vmatpush1.bf16.msra.mxu1 %v4837_v52 }
 0x6d6   :  { %2233 = vmatprep.subr.bf16.mxu0 %v4840_v13  ;;  %2274 = vmatprep.subr.bf16.mxu1 %v4843_v58  ;;  %v4858_v13 = vld [vmem:[#allocation3 + $0xa0] ss:$16 sps:$4 sm:$0xff]   ;;  %v4861_v58 = vld [vmem:[#allocation3 + $0xa8] ss:$16 sps:$4 sm:$0xff]  }
 0x6d7   :  { %5760 = vst [vmem:[#allocation77_spill] sm:$0xff] %v4858_v13  ;;  %5761 = vst [vmem:[#allocation76_spill] sm:$0xff] %v4861_v58 }
 0x6d9   :  { %2234 = vmatpush1.bf16.msra.mxu0 %v4846_v55  ;;  %2275 = vmatpush1.bf16.msra.mxu1 %v4849_v42  ;;  %v4864_v55 = vld [vmem:[#allocation3 + $0xc4] ss:$16 sps:$4 sm:$0xff]   ;;  %v4867_v42 = vld [vmem:[#allocation3 + $0xcc] ss:$16 sps:$4 sm:$0xff]  }
 0x6da   :  { %2235 = vmatprep.subr.bf16.mxu0 %v4852_v15  ;;  %2276 = vmatprep.subr.bf16.mxu1 %v4855_v34  ;;  %v4870_v15 = vld [vmem:[#allocation3 + $0xc0] ss:$16 sps:$4 sm:$0xff]   ;;  %v4873_v34 = vld [vmem:[#allocation3 + $0xc8] ss:$16 sps:$4 sm:$0xff]  }
 0x6dd   :  { %2236 = vmatpush1.bf16.msra.mxu0 %v4858_v13  ;;  %2277 = vmatpush1.bf16.msra.mxu1 %v4861_v58  ;;  %v4876_v13 = vld [vmem:[#allocation3 + $0xe4] ss:$16 sps:$4 sm:$0xff]   ;;  %v4880_v58 = vld [vmem:[#allocation3 + $0xe0] ss:$16 sps:$4 sm:$0xff]  }
 0x6de   :  { %2237 = vmatprep.subr.bf16.mxu0 %v4864_v55  ;;  %2278 = vmatprep.subr.bf16.mxu1 %v4867_v42 }
 0x6e1   :  { %2238 = vmatpush1.bf16.msra.mxu0 %v4870_v15  ;;  %2279 = vmatpush1.bf16.msra.mxu1 %v4873_v34 }
 0x6e2   :  { %2239 = vmatprep.subr.bf16.mxu0 %v4876_v13  ;;  %2280 = vmatprep.subr.bf16.mxu1 %v4343_v29  ;;  %v5762_v29 = vld [vmem:[#allocation49_spill] sm:$0xff] }
 0x6e5   :  { %2240 = vmatpush1.bf16.msra.mxu0 %v4880_v58  ;;  %2281 = vmatpush1.bf16.msra.mxu1 %v4347_v30  ;;  %v5763_v30 = vld [vmem:[#allocation50_spill] sm:$0xff] }
 0x6e6   :  { %2328 = vmatprep.subr.bf16.mxu0 %v4350_v31  ;;  %2369 = vmatprep.subr.bf16.mxu1 %v4353_v35  ;;  %v5764_v31 = vld [vmem:[#allocation51_spill] sm:$0xff]  ;;  %v5765_v35 = vld [vmem:[#allocation52_spill] sm:$0xff] }
 0x6e8   :  { %2258 = vmatmul.mubr.bf16.vlgmr.msra.gmra.mrb[64].mxu0 %v4792_v63  ;;  %2299 = vmatmul.mubr.bf16.vlgmr.msra.gmra.mrb[64].mxu1 %v4792_v63  ;;  %v5792_v63 = vld [vmem:[#allocation14_spill] sm:$0xff] }
 0x6e9   :  { %2329 = vmatpush1.bf16.msra.mxu0 %v4356_v36  ;;  %2370 = vmatpush1.bf16.msra.mxu1 %v4359_v39  ;;  %v5766_v36 = vld [vmem:[#allocation53_spill] sm:$0xff]  ;;  %v5767_v39 = vld [vmem:[#allocation54_spill] sm:$0xff] }
 0x6ea   :  { %2330 = vmatprep.subr.bf16.mxu0 %v4362_v40  ;;  %2371 = vmatprep.subr.bf16.mxu1 %v4365_v41  ;;  %v5768_v40 = vld [vmem:[#allocation55_spill] sm:$0xff]  ;;  %v5769_v41 = vld [vmem:[#allocation56_spill] sm:$0xff] }
 0x6ed   :  { %2331 = vmatpush1.bf16.msra.mxu0 %v4368_v44  ;;  %2372 = vmatpush1.bf16.msra.mxu1 %v4371_v45  ;;  %v5770_v44 = vld [vmem:[#allocation57_spill] sm:$0xff]  ;;  %v5771_v45 = vld [vmem:[#allocation58_spill] sm:$0xff] }
 0x6ee   :  { %2332 = vmatprep.subr.bf16.mxu0 %v4374_v46  ;;  %2373 = vmatprep.subr.bf16.mxu1 %v4377_v49  ;;  %v5772_v46 = vld [vmem:[#allocation59_spill] sm:$0xff]  ;;  %v5773_v49 = vld [vmem:[#allocation60_spill] sm:$0xff] }
 0x6f1   :  { %2333 = vmatpush1.bf16.msra.mxu0 %v5624_v59  ;;  %2374 = vmatpush1.bf16.msra.mxu1 %v5689_v14  ;;  %v5774_v59 = vld [vmem:[#allocation61_spill] sm:$0xff]  ;;  %v5775_v14 = vld [vmem:[#allocation62_spill] sm:$0xff] }
 0x6f2   :  { %2334 = vmatprep.subr.bf16.mxu0 %v5690_v1  ;;  %2375 = vmatprep.subr.bf16.mxu1 %v5691_v18  ;;  %v5776_v1 = vld [vmem:[#allocation9_spill] sm:$0xff]  ;;  %v5777_v18 = vld [vmem:[#allocation10_spill] sm:$0xff] }
 0x6f5   :  { %2335 = vmatpush1.bf16.msra.mxu0 %v5692_v2  ;;  %2376 = vmatpush1.bf16.msra.mxu1 %v5693_v6  ;;  %v5778_v2 = vld [vmem:[#allocation15_spill] sm:$0xff] }
 0x6f6   :  { %2336 = vmatprep.subr.bf16.mxu0 %v5694_v23  ;;  %2377 = vmatprep.subr.bf16.mxu1 %v5695_v4  ;;  %v5779_v6 = vld [vmem:[#allocation67_spill] sm:$0xff]  ;;  %v5780_v23 = vld [vmem:[#allocation69_spill] sm:$0xff]  ;;  %v5781_v4 = vld [vmem:[#allocation68_spill] sm:$0xff] }
 0x6f9   :  { %2337 = vmatpush1.bf16.msra.mxu0 %v5696_v12  ;;  %2378 = vmatpush1.bf16.msra.mxu1 %v5697_v16  ;;  %v5782_v12 = vld [vmem:[#allocation70_spill] sm:$0xff]  ;;  %v5783_v16 = vld [vmem:[#allocation16_spill] sm:$0xff] }
 0x6fa   :  { %2338 = vmatprep.subr.bf16.mxu0 %v5698_v10  ;;  %2379 = vmatprep.subr.bf16.mxu1 %v5699_v33  ;;  %v5784_v10 = vld [vmem:[#allocation17_spill] sm:$0xff]  ;;  %v5785_v33 = vld [vmem:[#allocation18_spill] sm:$0xff] }
 0x6fd   :  { %2339 = vmatpush1.bf16.msra.mxu0 %v5700_v53  ;;  %2380 = vmatpush1.bf16.msra.mxu1 %v5701_v11  ;;  %v5786_v53 = vld [vmem:[#allocation19_spill] sm:$0xff]  ;;  %v5787_v11 = vld [vmem:[#allocation21_spill] sm:$0xff] }
 0x6fe   :  { %2340 = vmatprep.subr.bf16.mxu0 %v5702_v38  ;;  %2381 = vmatprep.subr.bf16.mxu1 %v5703_v7  ;;  %v5788_v38 = vld [vmem:[#allocation22_spill] sm:$0xff] }
 0x701   :  { %2341 = vmatpush1.bf16.msra.mxu0 %v5704_v43  ;;  %2382 = vmatpush1.bf16.msra.mxu1 %v5705_v9  ;;  %v5789_v9 = vld [vmem:[#allocation11_spill] sm:$0xff] }
 0x702   :  { %2342 = vmatprep.subr.bf16.mxu0 %v5706_v3  ;;  %2383 = vmatprep.subr.bf16.mxu1 %v5707_v5 }
 0x705   :  { %2343 = vmatpush1.bf16.msra.mxu0 %v5708_v8  ;;  %2384 = vmatpush1.bf16.msra.mxu1 %v5709_v28  ;;  %v5790_v28 = vld [vmem:[#allocation12_spill] sm:$0xff] }
 0x706   :  { %2344 = vmatprep.subr.bf16.mxu0 %v5710_v20  ;;  %2385 = vmatprep.subr.bf16.mxu1 %v5711_v21 }
 0x709   :  { %2345 = vmatpush1.bf16.msra.mxu0 %v5712_v22  ;;  %2386 = vmatpush1.bf16.msra.mxu1 %v5713_v24  ;;  %v5791_v24 = vld [vmem:[#allocation13_spill] sm:$0xff] }
 0x70a   :  { %2346 = vmatprep.subr.bf16.mxu0 %v5714_v25  ;;  %2387 = vmatprep.subr.bf16.mxu1 %v5715_v26 }
 0x70d   :  { %2347 = vmatpush1.bf16.msra.mxu0 %v5716_v27  ;;  %2388 = vmatpush1.bf16.msra.mxu1 %v5762_v29 }
 0x70e   :  { %2348 = vmatprep.subr.bf16.mxu0 %v5763_v30  ;;  %2389 = vmatprep.subr.bf16.mxu1 %v5764_v31 }
 0x711   :  { %2349 = vmatpush1.bf16.msra.mxu0 %v5765_v35  ;;  %2390 = vmatpush1.bf16.msra.mxu1 %v5766_v36 }
 0x712   :  { %2350 = vmatprep.subr.bf16.mxu0 %v5767_v39  ;;  %2391 = vmatprep.subr.bf16.mxu1 %v5768_v40 }
 0x715   :  { %2351 = vmatpush1.bf16.msra.mxu0 %v5769_v41  ;;  %2392 = vmatpush1.bf16.msra.mxu1 %v5770_v44 }
 0x716   :  { %2352 = vmatprep.subr.bf16.mxu0 %v5771_v45  ;;  %2393 = vmatprep.subr.bf16.mxu1 %v5772_v46  ;;  %v5793_v45 = vld [vmem:[#allocation71_spill] sm:$0xff] }
 0x719   :  { %2353 = vmatpush1.bf16.msra.mxu0 %v5773_v49  ;;  %2394 = vmatpush1.bf16.msra.mxu1 %v5774_v59 }
 0x71a   :  { %2354 = vmatprep.subr.bf16.mxu0 %v5775_v14  ;;  %2395 = vmatprep.subr.bf16.mxu1 %v5776_v1 }
 0x71d   :  { %2355 = vmatpush1.bf16.msra.mxu0 %v5777_v18  ;;  %2396 = vmatpush1.bf16.msra.mxu1 %v5778_v2 }
 0x71e   :  { %2356 = vmatprep.subr.bf16.mxu0 %v5779_v6  ;;  %2397 = vmatprep.subr.bf16.mxu1 %v5780_v23  ;;  %v5794_v6 = vld [vmem:[#allocation83_spill] sm:$0xff] }
 0x721   :  { %2357 = vmatpush1.bf16.msra.mxu0 %v5781_v4  ;;  %2398 = vmatpush1.bf16.msra.mxu1 %v5782_v12  ;;  %v5795_v4 = vld [vmem:[#allocation85_spill] sm:$0xff] }
 0x722   :  { %2358 = vmatprep.subr.bf16.mxu0 %v5783_v16  ;;  %2399 = vmatprep.subr.bf16.mxu1 %v5784_v10 }
 0x725   :  { %2359 = vmatpush1.bf16.msra.mxu0 %v5785_v33  ;;  %2400 = vmatpush1.bf16.msra.mxu1 %v5786_v53  ;;  %v5796_v53 = vld [vmem:[#allocation84_spill] sm:$0xff] }
 0x726   :  { %2429 = vmatprep.subr.bf16.mxu0 %v5787_v11  ;;  %2470 = vmatprep.subr.bf16.mxu1 %v5788_v38  ;;  %v5797_v38 = vld [vmem:[#allocation86_spill] sm:$0xff] }
 0x79b   :  { %v2158_v7 = vpop.f32.mrb[60].mxu0  ;;  %v2199_v43 = vpop.f32.mrb[60].mxu1 }
 0x79c   :  { %v2159_v3 = vadd.f32 %v2158_v7, %v5789_v9  ;;  %v2160_v5 = vpop.f32.mrb[61].mxu0  ;;  %v2201_v8 = vpop.f32.mrb[61].mxu1  ;;  %v2200_v25 = vadd.f32 %v2199_v43, %v5791_v24 }
 0x79d   :  { %v2161_v20 = vadd.f32 %v2160_v5, %v5790_v28  ;;  %v2162_v21 = vpop.f32.mrb[62].mxu0  ;;  %v2203_v22 = vpop.f32.mrb[62].mxu1  ;;  %v2202_v29 = vadd.f32 %v2201_v8, %v5792_v63 }
 0x79e   :  { %3186 = vtanh.f32 %v2159_v3  ;;  %v2163_v26 = vpop.f32.mrb[63].mxu0  ;;  %v2204_v27 = vpop.f32.mrb[63].mxu1 }
 0x79f   :  { %3188 = vtanh.f32 %v2161_v20 }
 0x7a0   :  { %3190 = vtanh.f32 %v2200_v25 }
 0x7a1   :  { %3192 = vtanh.f32 %v2202_v29 }
 0x7a8   :  { %v3187_v30 = vpop.eup %3186 }
 0x7a9   :  { %v2207_v31 = vmul.f32 0.5, %v3187_v30  ;;  %v3189_v35 = vpop.eup %3188 }
 0x7aa   :  { %v2210_v39 = vmul.f32 0.5, %v3189_v35  ;;  %v3191_v40 = vpop.eup %3190 }
 0x7ab   :  { %v2208_v36 = vadd.f32 0.5, %v2207_v31  ;;  %v3193_v59 = vpop.eup %3192 }
 0x7ac   :  { %v2211_v41 = vadd.f32 0.5, %v2210_v39  ;;  %v2214_v14 = vmul.f32 0.5, %v3193_v59 }
 0x7ad   :  { %v2217_v44 = vmul.f32 %v3191_v40, %v2208_v36 }
 0x7ae   :  { %v2216_v46 = vmul.f32 %v2211_v41, %v5793_v45  ;;  %v2215_v2 = vadd.f32 0.5, %v2214_v14  ;;  %v3376_v14 = vld [vmem:[#allocation5 + $0x64] ss:$16 sps:$4 sm:$0xff]  }
 0x7b0   :  { %v4957_v49 = vadd.f32 %v2217_v44, %v2216_v46 }
 0x7b2   :  { %3194 = vtanh.f32 %v4957_v49 }
 0x7bb   :  { %v2259_v1 = vpop.f32.mrb[64].mxu0  ;;  %v2300_v18 = vpop.f32.mrb[64].mxu1 }
 0x7bc   :  { %v2307_v23 = vadd.f32 %v2259_v1, %v5794_v6  ;;  %v2309_v12 = vadd.f32 %v2300_v18, %v5795_v4  ;;  %v2261_v16 = vpop.f32.mrb[65].mxu0  ;;  %v2302_v10 = vpop.f32.mrb[65].mxu1  ;;  %v3377_v1 = vld [vmem:[#allocation5 + $0x6c] ss:$16 sps:$4 sm:$0xff]   ;;  %v3378_v18 = vld [vmem:[#allocation5 + $0x60] ss:$16 sps:$4 sm:$0xff]  }
 0x7bd   :  { %v3195_v33 = vpop.eup %3194  ;;  %v2308_v11 = vadd.f32 %v2261_v16, %v5796_v53  ;;  %v2310_v7 = vadd.f32 %v2302_v10, %v5797_v38  ;;  %v2263_v43 = vpop.f32.mrb[66].mxu0  ;;  %v3380_v6 = vld [vmem:[#allocation5 + $0x84] ss:$16 sps:$4 sm:$0xff]   ;;  %v3382_v4 = vld [vmem:[#allocation5 + $0x80] ss:$16 sps:$4 sm:$0xff]  }
 0x7be   :  { %v2304_v3 = vpop.f32.mrb[66].mxu1  ;;  %3196 = vtanh.f32 %v2307_v23  ;;  %v2264_v5 = vpop.f32.mrb[67].mxu0  ;;  %v2220_v20 = vmul.f32 %v3195_v33, %v2215_v2  ;;  %v3379_v2 = vld [vmem:[#allocation5 + $0x68] ss:$16 sps:$4 sm:$0xff]   ;;  %v3381_v23 = vld [vmem:[#allocation5 + $0x8c] ss:$16 sps:$4 sm:$0xff]  }
 0x7bf   :  { %v2305_v8 = vpop.f32.mrb[67].mxu1  ;;  %3198 = vtanh.f32 %v2308_v11  ;;  %v3384_v16 = vld [vmem:[#allocation5 + $0xa4] ss:$16 sps:$4 sm:$0xff]   ;;  %v3385_v10 = vld [vmem:[#allocation5 + $0xac] ss:$16 sps:$4 sm:$0xff]  }
 0x7c0   :  { %v2327_v21 = vpack.c.bf16 %v2220_v20, %v2220_v20  ;;  %3200 = vtanh.f32 %v2309_v12  ;;  %v3383_v12 = vld [vmem:[#allocation5 + $0x88] ss:$16 sps:$4 sm:$0xff]   ;;  %v3386_v33 = vld [vmem:[#allocation5 + $0xa0] ss:$16 sps:$4 sm:$0xff]   ;;  %v3388_v11 = vld [vmem:[#allocation5 + $0xc4] ss:$16 sps:$4 sm:$0xff]  }
 0x7c1   :  { %3202 = vtanh.f32 %v2310_v7  ;;  %v3387_v53 = vld [vmem:[#allocation5 + $0xa8] ss:$16 sps:$4 sm:$0xff]   ;;  %v3389_v38 = vld [vmem:[#allocation5 + $0xcc] ss:$16 sps:$4 sm:$0xff]   ;;  %v3390_v7 = vld [vmem:[#allocation5 + $0xc0] ss:$16 sps:$4 sm:$0xff]  }
 0x7c2   :  { %2360 = vmatprep.mubr.bf16.mxu0 %v2327_v21  ;;  %2401 = vmatprep.mubr.bf16.mxu1 %v2327_v21  ;;  %v3391_v43 = vld [vmem:[#allocation5 + $0xc8] ss:$16 sps:$4 sm:$0xff]   ;;  %v3392_v3 = vld [vmem:[#allocation5 + $0xe4] ss:$16 sps:$4 sm:$0xff]   ;;  %v3393_v5 = vld [vmem:[#allocation5 + $0xec] ss:$16 sps:$4 sm:$0xff]  }
 0x7c3   :  { %v3394_v8 = vld [vmem:[#allocation5 + $0xe0] ss:$16 sps:$4 sm:$0xff]   ;;  %v3395_v20 = vld [vmem:[#allocation5 + $0xe8] ss:$16 sps:$4 sm:$0xff]   ;;  %v3396_v21 = vld [vmem:[#allocation5 + $0x104] ss:$16 sps:$4 sm:$0xff]  }
 0x7c8   :  { %v3197_v22 = vpop.eup %3196 }
 0x7c9   :  { %v2312_v25 = vmul.f32 0.5, %v3197_v22  ;;  %v3199_v26 = vpop.eup %3198  ;;  %v3397_v22 = vld [vmem:[#allocation5 + $0x10c] ss:$16 sps:$4 sm:$0xff]  }
 0x7ca   :  { %v2315_v29 = vmul.f32 0.5, %v3199_v26  ;;  %v3201_v30 = vpop.eup %3200  ;;  %v3399_v26 = vld [vmem:[#allocation5 + $0x108] ss:$16 sps:$4 sm:$0xff]  }
 0x7cb   :  { %v2313_v27 = vadd.f32 0.5, %v2312_v25  ;;  %v3203_v40 = vpop.eup %3202  ;;  %v3398_v25 = vld [vmem:[#allocation5 + $0x100] ss:$16 sps:$4 sm:$0xff]  }
 0x7cc   :  { %v2316_v31 = vadd.f32 0.5, %v2315_v29  ;;  %v2319_v41 = vmul.f32 0.5, %v3203_v40  ;;  %v3401_v29 = vld [vmem:[#allocation5 + $0x12c] ss:$16 sps:$4 sm:$0xff]   ;;  %v3406_v40 = vld [vmem:[#allocation5 + $0x140] ss:$16 sps:$4 sm:$0xff]  }
 0x7cd   :  { %v2322_v35 = vmul.f32 %v3201_v30, %v2313_v27  ;;  %v3400_v27 = vld [vmem:[#allocation5 + $0x124] ss:$16 sps:$4 sm:$0xff]   ;;  %v3402_v30 = vld [vmem:[#allocation5 + $0x120] ss:$16 sps:$4 sm:$0xff]  }
 0x7ce   :  { %v2321_v36 = vmul.f32 %v2316_v31, %v4789_v37  ;;  %v2320_v44 = vadd.f32 0.5, %v2319_v41  ;;  %v5799_v37 = vld [vmem:[#allocation72_spill] sm:$0xff] }
 0x7cf   :  { %v3403_v31 = vld [vmem:[#allocation5 + $0x128] ss:$16 sps:$4 sm:$0xff]  }
 0x7d0   :  { %v4965_v39 = vadd.f32 %v2322_v35, %v2321_v36  ;;  %v3404_v35 = vld [vmem:[#allocation5 + $0x144] ss:$16 sps:$4 sm:$0xff]   ;;  %v3405_v36 = vld [vmem:[#allocation5 + $0x14c] ss:$16 sps:$4 sm:$0xff]   ;;  %v3407_v41 = vld [vmem:[#allocation5 + $0x148] ss:$16 sps:$4 sm:$0xff]  }
 0x7d2   :  { %3204 = vtanh.f32 %v4965_v39 }
 0x7dc   :  { %v3205_v45 = vpop.eup %3204 }
 0x7dd   :  { %v2325_v46 = vmul.f32 %v3205_v45, %v2320_v44  ;;  %v3408_v44 = vld [vmem:[#allocation5 + $0x164] ss:$16 sps:$4 sm:$0xff]   ;;  %v3409_v45 = vld [vmem:[#allocation5 + $0x16c] ss:$16 sps:$4 sm:$0xff]  }
 0x7df   :  { %v2326_v59 = vpack.c.bf16 %v2325_v46, %v2325_v46  ;;  %v3410_v46 = vld [vmem:[#allocation5 + $0x160] ss:$16 sps:$4 sm:$0xff]  }
 0x7e1   :  { %2361 = vmatmul.mubr.bf16.vlgmr.msra.gmra.mrb[68].mxu0 %v2326_v59  ;;  %2402 = vmatmul.mubr.bf16.vlgmr.msra.gmra.mrb[68].mxu1 %v2326_v59 }
 0x7e2   :  { %2430 = vmatpush1.bf16.msra.mxu0 %v4796_v19  ;;  %2471 = vmatpush1.bf16.msra.mxu1 %v4799_v17  ;;  %v5800_v19 = vld [vmem:[#allocation74_spill] sm:$0xff]  ;;  %v5801_v17 = vld [vmem:[#allocation24_spill] sm:$0xff] }
 0x7e3   :  { %2431 = vmatprep.subr.bf16.mxu0 %v4802_v61  ;;  %2472 = vmatprep.subr.bf16.mxu1 %v4805_v60  ;;  %v5802_v61 = vld [vmem:[#allocation20_spill] sm:$0xff]  ;;  %v5803_v60 = vld [vmem:[#allocation75_spill] sm:$0xff] }
 0x7e4   :  { %2461 = vmatprep.mubr.bf16.mxu0 %v5443_v0  ;;  %2502 = vmatprep.mubr.bf16.mxu1 %v5443_v0  ;;  %v5798_v0 = vld [vmem:[#allocation73_spill] sm:$0xff] }
 0x7e6   :  { %2432 = vmatpush1.bf16.msra.mxu0 %v4810_v62  ;;  %2473 = vmatpush1.bf16.msra.mxu1 %v4813_v47  ;;  %v5804_v62 = vld [vmem:[#allocation77_spill] sm:$0xff]  ;;  %v5805_v47 = vld [vmem:[#allocation76_spill] sm:$0xff] }
 0x7e7   :  { %2433 = vmatprep.subr.bf16.mxu0 %v4816_v48  ;;  %2474 = vmatprep.subr.bf16.mxu1 %v4819_v32  ;;  %v3362_v48 = vld [vmem:[#allocation3 + $0xec] ss:$16 sps:$4 sm:$0xff]   ;;  %v3363_v32 = vld [vmem:[#allocation3 + $0xe8] ss:$16 sps:$4 sm:$0xff]  }
 0x7ea   :  { %2434 = vmatpush1.bf16.msra.mxu0 %v4822_v54  ;;  %2475 = vmatpush1.bf16.msra.mxu1 %v4825_v57  ;;  %v3364_v54 = vld [vmem:[#allocation5 + $0x4] ss:$16 sps:$4 sm:$0xff]   ;;  %v3365_v57 = vld [vmem:[#allocation5 + $0xc] ss:$16 sps:$4 sm:$0xff]  }
 0x7eb   :  { %2435 = vmatprep.subr.bf16.mxu0 %v4828_v50  ;;  %2476 = vmatprep.subr.bf16.mxu1 %v4831_v51  ;;  %v3366_v50 = vld [vmem:[#allocation5] ss:$16 sps:$4 sm:$0xff]   ;;  %v3367_v51 = vld [vmem:[#allocation5 + $0x8] ss:$16 sps:$4 sm:$0xff]  }
 0x7ee   :  { %2436 = vmatpush1.bf16.msra.mxu0 %v4834_v56  ;;  %2477 = vmatpush1.bf16.msra.mxu1 %v4837_v52  ;;  %v3368_v56 = vld [vmem:[#allocation5 + $0x24] ss:$16 sps:$4 sm:$0xff]   ;;  %v3369_v52 = vld [vmem:[#allocation5 + $0x2c] ss:$16 sps:$4 sm:$0xff]  }
 0x7ef   :  { %2437 = vmatprep.subr.bf16.mxu0 %v5798_v0  ;;  %2478 = vmatprep.subr.bf16.mxu1 %v5799_v37  ;;  %v3412_v0 = vld [vmem:[#allocation5 + $0x184] ss:$16 sps:$4 sm:$0xff]   ;;  %v3413_v37 = vld [vmem:[#allocation5 + $0x18c] ss:$16 sps:$4 sm:$0xff]  }
 0x7f2   :  { %2438 = vmatpush1.bf16.msra.mxu0 %v5800_v19  ;;  %2479 = vmatpush1.bf16.msra.mxu1 %v5801_v17  ;;  %v3414_v19 = vld [vmem:[#allocation5 + $0x180] ss:$16 sps:$4 sm:$0xff]   ;;  %v3415_v17 = vld [vmem:[#allocation5 + $0x188] ss:$16 sps:$4 sm:$0xff]  }
 0x7f3   :  { %2439 = vmatprep.subr.bf16.mxu0 %v5802_v61  ;;  %2480 = vmatprep.subr.bf16.mxu1 %v5803_v60  ;;  %v3416_v61 = vld [vmem:[#allocation5 + $0x1a4] ss:$16 sps:$4 sm:$0xff]   ;;  %v3417_v60 = vld [vmem:[#allocation5 + $0x1ac] ss:$16 sps:$4 sm:$0xff]  }
 0x7f6   :  { %2440 = vmatpush1.bf16.msra.mxu0 %v5804_v62  ;;  %2481 = vmatpush1.bf16.msra.mxu1 %v5805_v47  ;;  %v3418_v62 = vld [vmem:[#allocation5 + $0x1a0] ss:$16 sps:$4 sm:$0xff]   ;;  %v3419_v47 = vld [vmem:[#allocation5 + $0x1a8] ss:$16 sps:$4 sm:$0xff]  }
 0x7f7   :  { %2441 = vmatprep.subr.bf16.mxu0 %v4864_v55  ;;  %2482 = vmatprep.subr.bf16.mxu1 %v4867_v42  ;;  %v3371_v55 = vld [vmem:[#allocation5 + $0x28] ss:$16 sps:$4 sm:$0xff]   ;;  %v3373_v42 = vld [vmem:[#allocation5 + $0x4c] ss:$16 sps:$4 sm:$0xff]  }
 0x7fa   :  { %2442 = vmatpush1.bf16.msra.mxu0 %v4870_v15  ;;  %2483 = vmatpush1.bf16.msra.mxu1 %v4873_v34  ;;  %v3374_v15 = vld [vmem:[#allocation5 + $0x40] ss:$16 sps:$4 sm:$0xff]   ;;  %v3375_v34 = vld [vmem:[#allocation5 + $0x48] ss:$16 sps:$4 sm:$0xff]  }
 0x7fb   :  { %2443 = vmatprep.subr.bf16.mxu0 %v4876_v13  ;;  %2484 = vmatprep.subr.bf16.mxu1 %v3362_v48  ;;  %v3370_v13 = vld [vmem:[#allocation5 + $0x20] ss:$16 sps:$4 sm:$0xff]   ;;  %v3420_v48 = vld [vmem:[#allocation5 + $0x1c4] ss:$16 sps:$4 sm:$0xff]  }
 0x7fe   :  { %2444 = vmatpush1.bf16.msra.mxu0 %v4880_v58  ;;  %2485 = vmatpush1.bf16.msra.mxu1 %v3363_v32  ;;  %v3372_v58 = vld [vmem:[#allocation5 + $0x44] ss:$16 sps:$4 sm:$0xff]   ;;  %v3421_v32 = vld [vmem:[#allocation5 + $0x1cc] ss:$16 sps:$4 sm:$0xff]  }
 0x7ff   :  { %2532 = vmatprep.subr.bf16.mxu0 %v3364_v54  ;;  %2573 = vmatprep.subr.bf16.mxu1 %v3365_v57  ;;  %v3422_v54 = vld [vmem:[#allocation5 + $0x1c0] ss:$16 sps:$4 sm:$0xff]   ;;  %v3423_v57 = vld [vmem:[#allocation5 + $0x1c8] ss:$16 sps:$4 sm:$0xff]  }
 0x801   :  { %2462 = vmatmul.mubr.bf16.vlgmr.msra.gmra.mrb[72].mxu0 %v2326_v59  ;;  %2503 = vmatmul.mubr.bf16.vlgmr.msra.gmra.mrb[72].mxu1 %v2326_v59  ;;  %v3411_v59 = vld [vmem:[#allocation5 + $0x168] ss:$16 sps:$4 sm:$0xff]  }
 0x802   :  { %2533 = vmatpush1.bf16.msra.mxu0 %v3366_v50  ;;  %2574 = vmatpush1.bf16.msra.mxu1 %v3367_v51  ;;  %v3424_v50 = vld [vmem:[#allocation5 + $0x1e4] ss:$16 sps:$4 sm:$0xff]   ;;  %v3425_v51 = vld [vmem:[#allocation5 + $0x1ec] ss:$16 sps:$4 sm:$0xff]  }
 0x803   :  { %2534 = vmatprep.subr.bf16.mxu0 %v3368_v56  ;;  %2575 = vmatprep.subr.bf16.mxu1 %v3369_v52  ;;  %v3426_v56 = vld [vmem:[#allocation5 + $0x1e0] ss:$16 sps:$4 sm:$0xff]   ;;  %v3427_v52 = vld [vmem:[#allocation5 + $0x1e8] ss:$16 sps:$4 sm:$0xff]  }
 0x806   :  { %2535 = vmatpush1.bf16.msra.mxu0 %v3370_v13  ;;  %2576 = vmatpush1.bf16.msra.mxu1 %v3371_v55  ;;  %v5806_v13 = vmov 0.0|0.0  }
 0x807   :  { %2536 = vmatprep.subr.bf16.mxu0 %v3372_v58  ;;  %2577 = vmatprep.subr.bf16.mxu1 %v3373_v42 }
 0x80a   :  { %2537 = vmatpush1.bf16.msra.mxu0 %v3374_v15  ;;  %2578 = vmatpush1.bf16.msra.mxu1 %v3375_v34 }
 0x80b   :  { %2538 = vmatprep.subr.bf16.mxu0 %v3376_v14  ;;  %2579 = vmatprep.subr.bf16.mxu1 %v3377_v1 }
 0x80e   :  { %2539 = vmatpush1.bf16.msra.mxu0 %v3378_v18  ;;  %2580 = vmatpush1.bf16.msra.mxu1 %v3379_v2 }
 0x80f   :  { %2540 = vmatprep.subr.bf16.mxu0 %v3380_v6  ;;  %2581 = vmatprep.subr.bf16.mxu1 %v3381_v23 }
 0x812   :  { %2541 = vmatpush1.bf16.msra.mxu0 %v3382_v4  ;;  %2582 = vmatpush1.bf16.msra.mxu1 %v3383_v12 }
 0x813   :  { %2542 = vmatprep.subr.bf16.mxu0 %v3384_v16  ;;  %2583 = vmatprep.subr.bf16.mxu1 %v3385_v10 }
 0x816   :  { %2543 = vmatpush1.bf16.msra.mxu0 %v3386_v33  ;;  %2584 = vmatpush1.bf16.msra.mxu1 %v3387_v53 }
 0x817   :  { %2544 = vmatprep.subr.bf16.mxu0 %v3388_v11  ;;  %2585 = vmatprep.subr.bf16.mxu1 %v3389_v38 }
 0x81a   :  { %2545 = vmatpush1.bf16.msra.mxu0 %v3390_v7  ;;  %2586 = vmatpush1.bf16.msra.mxu1 %v3391_v43 }
 0x81b   :  { %2546 = vmatprep.subr.bf16.mxu0 %v3392_v3  ;;  %2587 = vmatprep.subr.bf16.mxu1 %v3393_v5 }
 0x81e   :  { %2547 = vmatpush1.bf16.msra.mxu0 %v3394_v8  ;;  %2588 = vmatpush1.bf16.msra.mxu1 %v3395_v20 }
 0x81f   :  { %2548 = vmatprep.subr.bf16.mxu0 %v3396_v21  ;;  %2589 = vmatprep.subr.bf16.mxu1 %v3397_v22 }
 0x822   :  { %2549 = vmatpush1.bf16.msra.mxu0 %v3398_v25  ;;  %2590 = vmatpush1.bf16.msra.mxu1 %v3399_v26  ;;  %v5807_v25 = vld [vmem:[#allocation87_spill] sm:$0xff] }
 0x823   :  { %2550 = vmatprep.subr.bf16.mxu0 %v3400_v27  ;;  %2591 = vmatprep.subr.bf16.mxu1 %v3401_v29  ;;  %v5808_v27 = vld [vmem:[#allocation89_spill] sm:$0xff] }
 0x826   :  { %2551 = vmatpush1.bf16.msra.mxu0 %v3402_v30  ;;  %2592 = vmatpush1.bf16.msra.mxu1 %v3403_v31 }
 0x827   :  { %2552 = vmatprep.subr.bf16.mxu0 %v3404_v35  ;;  %2593 = vmatprep.subr.bf16.mxu1 %v3405_v36  ;;  %v5809_v36 = vld [vmem:[#allocation88_spill] sm:$0xff] }
 0x82a   :  { %2553 = vmatpush1.bf16.msra.mxu0 %v3406_v40  ;;  %2594 = vmatpush1.bf16.msra.mxu1 %v3407_v41  ;;  %v5810_v41 = vld [vmem:[#allocation90_spill] sm:$0xff] }
 0x82b   :  { %2554 = vmatprep.subr.bf16.mxu0 %v3408_v44  ;;  %2595 = vmatprep.subr.bf16.mxu1 %v3409_v45 }
 0x82e   :  { %2555 = vmatpush1.bf16.msra.mxu0 %v3410_v46  ;;  %2596 = vmatpush1.bf16.msra.mxu1 %v3411_v59 }
 0x82f   :  { %2556 = vmatprep.subr.bf16.mxu0 %v3412_v0  ;;  %2597 = vmatprep.subr.bf16.mxu1 %v3413_v37 }
 0x832   :  { %2557 = vmatpush1.bf16.msra.mxu0 %v3414_v19  ;;  %2598 = vmatpush1.bf16.msra.mxu1 %v3415_v17 }
 0x833   :  { %2558 = vmatprep.subr.bf16.mxu0 %v3416_v61  ;;  %2599 = vmatprep.subr.bf16.mxu1 %v3417_v60 }
 0x836   :  { %2559 = vmatpush1.bf16.msra.mxu0 %v3418_v62  ;;  %2600 = vmatpush1.bf16.msra.mxu1 %v3419_v47 }
 0x837   :  { %2560 = vmatprep.subr.bf16.mxu0 %v3420_v48  ;;  %2601 = vmatprep.subr.bf16.mxu1 %v3421_v32 }
 0x83a   :  { %2561 = vmatpush1.bf16.msra.mxu0 %v3422_v54  ;;  %2602 = vmatpush1.bf16.msra.mxu1 %v3423_v57 }
 0x83b   :  { %2562 = vmatprep.subr.bf16.mxu0 %v3424_v50  ;;  %2603 = vmatprep.subr.bf16.mxu1 %v3425_v51 }
 0x83e   :  { %2563 = vmatpush1.bf16.msra.mxu0 %v3426_v56  ;;  %2604 = vmatpush1.bf16.msra.mxu1 %v3427_v52 }
 0x83f   :  { %2898 = vmatprep.subr.bf16.mxu0 %v5806_v13 }
 0x8b4   :  { %v2362_v55 = vpop.f32.mrb[68].mxu0  ;;  %v2403_v58 = vpop.f32.mrb[68].mxu1 }
 0x8b5   :  { %v2363_v42 = vadd.f32 %v2362_v55, %v5789_v9  ;;  %v2364_v15 = vpop.f32.mrb[69].mxu0  ;;  %v2405_v34 = vpop.f32.mrb[69].mxu1  ;;  %v2404_v2 = vadd.f32 %v2403_v58, %v5791_v24 }
 0x8b6   :  { %v2365_v14 = vadd.f32 %v2364_v15, %v5790_v28  ;;  %v2366_v1 = vpop.f32.mrb[70].mxu0  ;;  %v2407_v18 = vpop.f32.mrb[70].mxu1  ;;  %v2406_v4 = vadd.f32 %v2405_v34, %v5792_v63  ;;  %v2630_v15 = vld [vmem:[%s5085_s6 + $0x8] sm:$0xff] }
 0x8b7   :  { %3206 = vtanh.f32 %v2363_v42  ;;  %v2367_v6 = vpop.f32.mrb[71].mxu0  ;;  %v2408_v23 = vpop.f32.mrb[71].mxu1  ;;  %v2629_v42 = vld [vmem:[%s5085_s6] sm:$0xff] }
 0x8b8   :  { %3208 = vtanh.f32 %v2365_v14  ;;  %v2899_v34 = vpack.c.bf16 %v2630_v15, %v2629_v42  ;;  %v2632_v14 = vld [vmem:[%s5085_s6 + $0x18] sm:$0xff]  ;;  %v2633_v18 = vld [vmem:[%s5085_s6 + $0x20] sm:$0xff]  ;;  %v2635_v23 = vld [vmem:[%s5085_s6 + $0x30] sm:$0xff] }
 0x8b9   :  { %3210 = vtanh.f32 %v2404_v2  ;;  %v2634_v2 = vld [vmem:[%s5085_s6 + $0x28] sm:$0xff] }
 0x8ba   :  { %3212 = vtanh.f32 %v2406_v4  ;;  %v2905_v6 = vpack.c.bf16 %v2634_v2, %v2633_v18  ;;  %v2636_v4 = vld [vmem:[%s5085_s6 + $0x38] sm:$0xff] }
 0x8c1   :  { %v3207_v12 = vpop.eup %3206 }
 0x8c2   :  { %v2411_v16 = vmul.f32 0.5, %v3207_v12  ;;  %v3209_v10 = vpop.eup %3208  ;;  %v2908_v12 = vpack.c.bf16 %v2636_v4, %v2635_v23 }
 0x8c3   :  { %v2414_v53 = vmul.f32 0.5, %v3209_v10  ;;  %v3211_v11 = vpop.eup %3210  ;;  %v2638_v10 = vld [vmem:[%s5085_s6 + $0x48] sm:$0xff] }
 0x8c4   :  { %v2412_v33 = vadd.f32 0.5, %v2411_v16  ;;  %v3213_v5 = vpop.eup %3212  ;;  %v2637_v16 = vld [vmem:[%s5085_s6 + $0x40] sm:$0xff] }
 0x8c5   :  { %v2415_v38 = vadd.f32 0.5, %v2414_v53  ;;  %v2418_v8 = vmul.f32 0.5, %v3213_v5  ;;  %v2639_v53 = vld [vmem:[%s5085_s6 + $0x50] sm:$0xff] }
 0x8c6   :  { %v2421_v7 = vmul.f32 %v3211_v11, %v2412_v33  ;;  %v2911_v33 = vpack.c.bf16 %v2638_v10, %v2637_v16  ;;  %v2640_v11 = vld [vmem:[%s5085_s6 + $0x58] sm:$0xff] }
 0x8c7   :  { %v2420_v43 = vmul.f32 %v2415_v38, %v4957_v49  ;;  %v2419_v22 = vadd.f32 0.5, %v2418_v8  ;;  %v2914_v38 = vpack.c.bf16 %v2640_v11, %v2639_v53  ;;  %v2643_v8 = vld [vmem:[%s5085_s6 + $0x70] sm:$0xff] }
 0x8c9   :  { %v5004_v3 = vadd.f32 %v2421_v7, %v2420_v43  ;;  %v2641_v7 = vld [vmem:[%s5085_s6 + $0x60] sm:$0xff]  ;;  %v2642_v43 = vld [vmem:[%s5085_s6 + $0x68] sm:$0xff] }
 0x8ca   :  { %v2917_v5 = vpack.c.bf16 %v2642_v43, %v2641_v7 }
 0x8cb   :  { %3214 = vtanh.f32 %v5004_v3 }
 0x8d4   :  { %v2463_v20 = vpop.f32.mrb[72].mxu0  ;;  %v2504_v21 = vpop.f32.mrb[72].mxu1 }
 0x8d5   :  { %v2511_v26 = vadd.f32 %v2463_v20, %v5807_v25  ;;  %v2513_v29 = vadd.f32 %v2504_v21, %v5808_v27  ;;  %v2465_v30 = vpop.f32.mrb[73].mxu0  ;;  %v2506_v31 = vpop.f32.mrb[73].mxu1  ;;  %v2644_v20 = vld [vmem:[%s5085_s6 + $0x78] sm:$0xff] }
 0x8d6   :  { %v3215_v35 = vpop.eup %3214  ;;  %v2512_v40 = vadd.f32 %v2465_v30, %v5809_v36  ;;  %v2514_v49 = vadd.f32 %v2506_v31, %v5810_v41  ;;  %v2467_v44 = vpop.f32.mrb[74].mxu0  ;;  %v2920_v21 = vpack.c.bf16 %v2644_v20, %v2643_v8 }
 0x8d7   :  { %v2508_v45 = vpop.f32.mrb[74].mxu1  ;;  %3216 = vtanh.f32 %v2511_v26  ;;  %v2468_v46 = vpop.f32.mrb[75].mxu0  ;;  %v2424_v0 = vmul.f32 %v3215_v35, %v2419_v22  ;;  %v5811_v22 = vmov 0.0  }
 0x8d8   :  { %v2509_v59 = vpop.f32.mrb[75].mxu1  ;;  %3218 = vtanh.f32 %v2512_v40 }
 0x8d9   :  { %v2531_v37 = vpack.c.bf16 %v2424_v0, %v2424_v0  ;;  %3220 = vtanh.f32 %v2513_v29 }
 0x8da   :  { %3222 = vtanh.f32 %v2514_v49 }
 0x8db   :  { %2564 = vmatprep.mubr.bf16.mxu0 %v2531_v37  ;;  %2605 = vmatprep.mubr.bf16.mxu1 %v2531_v37 }
 0x8e1   :  { %v3217_v19 = vpop.eup %3216 }
 0x8e2   :  { %v2516_v17 = vmul.f32 0.5, %v3217_v19  ;;  %v3219_v61 = vpop.eup %3218 }
 0x8e3   :  { %v2519_v62 = vmul.f32 0.5, %v3219_v61  ;;  %v3221_v47 = vpop.eup %3220 }
 0x8e4   :  { %v2517_v60 = vadd.f32 0.5, %v2516_v17  ;;  %v3223_v50 = vpop.eup %3222 }
 0x8e5   :  { %v2520_v48 = vadd.f32 0.5, %v2519_v62  ;;  %v2523_v51 = vmul.f32 0.5, %v3223_v50 }
 0x8e6   :  { %v2526_v32 = vmul.f32 %v3221_v47, %v2517_v60 }
 0x8e7   :  { %v2525_v54 = vmul.f32 %v2520_v48, %v4965_v39  ;;  %v2524_v56 = vadd.f32 0.5, %v2523_v51  ;;  %v2631_v39 = vld [vmem:[%s5085_s6 + $0x10] sm:$0xff] }
 0x8e8   :  { %v2902_v1 = vpack.c.bf16 %v2632_v14, %v2631_v39 }
 0x8e9   :  { %v2527_v57 = vadd.f32 %v2526_v32, %v2525_v54 }
 0x8eb   :  { %3224 = vtanh.f32 %v2527_v57 }
 0x8f5   :  { %v3225_v52 = vpop.eup %3224 }
 0x8f6   :  { %v2529_v55 = vmul.f32 %v3225_v52, %v2524_v56 }
 0x8f8   :  { %v2530_v58 = vpack.c.bf16 %v2529_v55, %v2529_v55 }
 0x8fa   :  { %2565 = vmatmul.mubr.bf16.vlgmr.msra.gmra.mrb[76].mxu0 %v2530_v58  ;;  %2606 = vmatmul.mubr.bf16.vlgmr.msra.gmra.mrb[76].mxu1 %v2530_v58 }
 0x8fb   :  { %2900 = vmatpush3.bf16.msra.mxu0 %v2899_v34  ;;  %2895 = vmatprep.mubr.msk.f32.mxu0 %vm3484_vm2, %v5811_v22 }
 0x8fc   :  { %2901 = vmatprep.subr.bf16.mxu0 %v5806_v13 }
 0x8ff   :  { %2903 = vmatpush3.bf16.msra.mxu0 %v2902_v1 }
 0x900   :  { %2904 = vmatprep.subr.bf16.mxu0 %v5806_v13 }
 0x903   :  { %2906 = vmatpush3.bf16.msra.mxu0 %v2905_v6 }
 0x904   :  { %2907 = vmatprep.subr.bf16.mxu0 %v5806_v13 }
 0x907   :  { %2909 = vmatpush3.bf16.msra.mxu0 %v2908_v12 }
 0x908   :  { %2910 = vmatprep.subr.bf16.mxu0 %v5806_v13 }
 0x90b   :  { %2912 = vmatpush3.bf16.msra.mxu0 %v2911_v33 }
 0x90c   :  { %2913 = vmatprep.subr.bf16.mxu0 %v5806_v13 }
 0x90f   :  { %2915 = vmatpush3.bf16.msra.mxu0 %v2914_v38 }
 0x910   :  { %2916 = vmatprep.subr.bf16.mxu0 %v5806_v13 }
 0x913   :  { %2918 = vmatpush3.bf16.msra.mxu0 %v2917_v5 }
 0x914   :  { %2919 = vmatprep.subr.bf16.mxu0 %v5806_v13 }
 0x917   :  { %2921 = vmatpush3.bf16.msra.mxu0 %v2920_v21 }
 0x9cd   :  { %v2566_v25 = vpop.f32.mrb[76].mxu0  ;;  %v2607_v26 = vpop.f32.mrb[76].mxu1 }
 0x9ce   :  { %v2567_v27 = vadd.f32 %v2566_v25, %v5789_v9  ;;  %v2568_v29 = vpop.f32.mrb[77].mxu0  ;;  %v2609_v30 = vpop.f32.mrb[77].mxu1  ;;  %v2608_v36 = vadd.f32 %v2607_v26, %v5791_v24 }
 0x9cf   :  { %v2569_v13 = vadd.f32 %v2568_v29, %v5790_v28  ;;  %v2570_v31 = vpop.f32.mrb[78].mxu0  ;;  %v2611_v35 = vpop.f32.mrb[78].mxu1  ;;  %v2610_v49 = vadd.f32 %v2609_v30, %v5792_v63  ;;  %v2845_v63 = vld [vmem:[%s5086_s7] ss:$0 sm:$0xff] }
 0x9d0   :  { %3226 = vtanh.f32 %v2567_v27  ;;  %v2571_v40 = vpop.f32.mrb[79].mxu0  ;;  %v2612_v41 = vpop.f32.mrb[79].mxu1 }
 0x9d1   :  { %3228 = vtanh.f32 %v2569_v13 }
 0x9d2   :  { %3230 = vtanh.f32 %v2608_v36 }
 0x9d3   :  { %3232 = vtanh.f32 %v2610_v49 }
 0x9da   :  { %v3227_v44 = vpop.eup %3226 }
 0x9db   :  { %v2615_v45 = vmul.f32 0.5, %v3227_v44  ;;  %v3229_v46 = vpop.eup %3228 }
 0x9dc   :  { %v2618_v9 = vmul.f32 0.5, %v3229_v46  ;;  %v3231_v0 = vpop.eup %3230 }
 0x9dd   :  { %v2616_v59 = vadd.f32 0.5, %v2615_v45  ;;  %v3233_v24 = vpop.eup %3232 }
 0x9de   :  { %v2619_v37 = vadd.f32 0.5, %v2618_v9  ;;  %v2622_v61 = vmul.f32 0.5, %v3233_v24 }
 0x9df   :  { %v2625_v28 = vmul.f32 %v3231_v0, %v2616_v59 }
 0x9e0   :  { %v2624_v19 = vmul.f32 %v2619_v37, %v5004_v3  ;;  %v2623_v60 = vadd.f32 0.5, %v2622_v61 }
 0x9e2   :  { %v2626_v17 = vadd.f32 %v2625_v28, %v2624_v19 }
 0x9e4   :  { %3234 = vtanh.f32 %v2626_v17 }
 0x9ee   :  { %v3235_v62 = vpop.eup %3234 }
 0x9ef   :  { %v2628_v47 = vmul.f32 %v3235_v62, %v2623_v60 }
 0x9f1   :  { %2896 = vmatmul.mubr.f32.vlgmr.msra.gmra.mrb[80].mxu0 %v2628_v47 }
 0xac4   :  { %v2718_v48 = vpop.f32.mrb[80].mxu0 }
 0xac5   :  { %v2719_v32 = vadd.f32 %v2845_v63, %v2718_v48  ;;  %v2897_v54 = vpop.f32.mrb[81].mxu0 }
 0xac7   :  { %2722 = vst [vmem:[%s5087_s8] sm:$0xff] %v2719_v32 }
 0xac8   :  { %2727 = vsyncpa [#allocation4], 1 }
 0xac9   :  { %2728 = vsyncpa [#allocation6], 1 }

</bundles_post_ra>
